<compile_context>
chip_gen: v7x
topology: tpu7x:2x2x1
jax: 0.10.0
libtpu: 0.0.40
codegen_flags: <defaults>
</compile_context>

<pallas_src>
import jax
import jax.numpy as jnp
from jax.experimental import pallas as pl
from jax.experimental.pallas import tpu as pltpu


# --------------------------- host-side constant builders ------------------------------

def _depthwise_shift_matrices(h, w):
    """9 constant 0/1 (hw,hw) matrices: tap (oy,ox) -> flattened-spatial shift + edge mask."""
    hw = h * w
    src = jnp.arange(hw, dtype=jnp.int32)[:, None]      # source flat index (rows)
    dst = jnp.arange(hw, dtype=jnp.int32)[None, :]      # output flat index (cols)
    prow = dst // w
    pcol = dst - prow * w
    mats = []
    for oy in (-1, 0, 1):
        for ox in (-1, 0, 1):
            s = oy * w + ox
            valid = ((prow + oy >= 0) & (prow + oy < h) &
                     (pcol + ox >= 0) & (pcol + ox < w))
            mats.append(jnp.where((src == dst + s) & valid, 1.0, 0.0))
    return jnp.stack(mats, axis=0).astype(jnp.float32)   # (9, hw, hw), tap = 3*di + dj


# ------------------------- fused forward (single pallas_call) -------------------------

def attention_base_forward(x, y, z, params):
    b, c, h, w = x.shape
    heads = int(params['num_heads'])
    ch = c // heads
    hw = h * w
    c5, c2 = 5 * c, 2 * c

    # Free row-major views (no data movement).
    xf = x.reshape(b, c, hw)
    yf = y.reshape(b, c, hw)
    zf = z.reshape(b, c, hw)

    # Host-precomputed constants (constant index_map -> fetched to VMEM once, stay resident).
    w_qkv1 = params['w_qkv1'].astype(jnp.float32)                        # (5c, c)
    w_taps = params['w_qkv2'].reshape(c5, 9).T.reshape(9, c5, 1)         # (9, 5c, 1)
    w_taps = w_taps.astype(jnp.float32)
    w_proj = params['w_proj'].astype(jnp.float32)                        # (2c, 2c)
    shift_mats = _depthwise_shift_matrices(h, w)                         # (9, hw, hw)

    # Per-row softmax scale for both stacked branches: row i -> scale[head(i)].
    scale_rows = jnp.tile(jnp.repeat(params['scale'].reshape(heads), ch), 2)
    scale_rows = scale_rows.reshape(c2, 1).astype(jnp.float32)           # (2c, 1)

    # Additive softmax bias: 0 for (same branch & same head), -1e30 elsewhere.
    idx = jnp.arange(c2) // ch
    attn_bias = jnp.where(idx[:, None] == idx[None, :], 0.0, -1e30).astype(jnp.float32)

    def kernel(x_ref, y_ref, z_ref, w1_ref, wt_ref, sm_ref, sc_ref, bias_ref,
               wp_ref, o_ref):
        xb = x_ref[0]                                                    # (c, hw)

        # ---- qkv1: 1x1 conv as weight-stationary matmul, spatial on lanes ----
        qkv = jnp.dot(w1_ref[...], xb, preferred_element_type=jnp.float32)   # (5c, hw)

        # ---- qkv2: depthwise 3x3 conv, stride 1, padding 1 --------------------
        # Each tap: per-channel weight (5c,1) broadcast * qkv, then a constant
        # shift+edge-mask matrix on the MXU.  All constants are host-precomputed.
        dwc = jnp.dot(qkv * wt_ref[0], sm_ref[0], preferred_element_type=jnp.float32)
        for tap in range(1, 9):
            dwc = dwc + jnp.dot(qkv * wt_ref[tap], sm_ref[tap],
                                preferred_element_type=jnp.float32)          # (5c, hw)

        # ---- split (torch chunk order: q1, q2, k1, k2, v) + residual adds ----
        yb = y_ref[0]
        zb = z_ref[0]
        q1 = dwc[0 * c:1 * c] + yb
        q2 = dwc[1 * c:2 * c] + zb
        k1 = dwc[2 * c:3 * c] + yb
        k2 = dwc[3 * c:4 * c] + zb
        v = dwc[4 * c:5 * c]

        # ---- L2 normalize along spatial (matches F.normalize eps clamp) ------
        def l2n(t):
            nrm = jnp.sqrt(jnp.sum(t * t, axis=-1, keepdims=True))
            return t * pl.reciprocal(jnp.maximum(nrm, 1e-12), approx=False)

        # ---- both branches + all heads in ONE masked channel attention -------
        # Sublane-stack (cheap: 32 | multiple of 8); output is already the concat.
        q = jnp.concatenate([l2n(q1), l2n(q2)], axis=0)                  # (2c, hw)
        k = jnp.concatenate([l2n(k1), l2n(k2)], axis=0)                  # (2c, hw)
        vv = jnp.concatenate([v, v], axis=0)                             # (2c, hw)

        a = jax.lax.dot_general(q, k, (((1,), (1,)), ((), ())),
                                preferred_element_type=jnp.float32)      # q @ k^T
        a = a * sc_ref[...] + bias_ref[...]
        a = a - jnp.max(a, axis=-1, keepdims=True)
        e = jnp.exp(a)
        p = e * pl.reciprocal(jnp.sum(e, axis=-1, keepdims=True), approx=True)
        cat = jnp.dot(p, vv, preferred_element_type=jnp.float32)         # (2c, hw)

        # ---- 1x1 proj ---------------------------------------------------------
        o_ref[0] = jnp.dot(wp_ref[...], cat, preferred_element_type=jnp.float32)

    out = pl.pallas_call(
        kernel,
        out_shape=jax.ShapeDtypeStruct((b, c2, hw), jnp.float32),
        grid=(b,),
        in_specs=[
            pl.BlockSpec((1, c, hw), lambda i: (i, 0, 0)),      # x
            pl.BlockSpec((1, c, hw), lambda i: (i, 0, 0)),      # y
            pl.BlockSpec((1, c, hw), lambda i: (i, 0, 0)),      # z
            pl.BlockSpec((c5, c), lambda i: (0, 0)),            # w_qkv1
            pl.BlockSpec((9, c5, 1), lambda i: (0, 0, 0)),      # per-tap dw weights
            pl.BlockSpec((9, hw, hw), lambda i: (0, 0, 0)),     # shift+mask matrices
            pl.BlockSpec((c2, 1), lambda i: (0, 0)),            # per-row head scale
            pl.BlockSpec((c2, c2), lambda i: (0, 0)),           # head/branch bias
            pl.BlockSpec((c2, c2), lambda i: (0, 0)),           # w_proj
        ],
        out_specs=pl.BlockSpec((1, c2, hw), lambda i: (i, 0, 0)),
        compiler_params=pltpu.CompilerParams(dimension_semantics=("parallel",)),
    )(xf, yf, zf, w_qkv1, w_taps, shift_mats, scale_rows, attn_bias, w_proj)
    return out.reshape(b, c2, h, w)


# ------------------------------ pure-JAX reference ------------------------------------

def reference_forward(x, y, z, params):
    b, c, h, w = x.shape
    heads = params['num_heads']
    ch = c // heads
    hw = h * w
    qkv = jnp.einsum('oi,bihw->bohw', params['w_qkv1'], x)
    qp = jnp.pad(qkv, ((0, 0), (0, 0), (1, 1), (1, 1)))
    dw = params['w_qkv2']
    acc = jnp.zeros_like(qkv)
    for di in range(3):
        for dj in range(3):
            acc = acc + qp[:, :, di:di + h, dj:dj + w] * dw[None, :, di, dj, None, None]
    q1, q2, k1, k2, v = jnp.split(acc, 5, axis=1)
    q1, k1, q2, k2 = q1 + y, k1 + y, q2 + z, k2 + z

    def toh(t):
        return t.reshape(b, heads, ch, hw)

    q1, k1, q2, k2, v = map(toh, (q1, k1, q2, k2, v))

    def l2n(t):
        n = jnp.sqrt(jnp.sum(t * t, axis=-1, keepdims=True))
        return t / jnp.maximum(n, 1e-12)

    q1, k1, q2, k2 = map(l2n, (q1, k1, q2, k2))
    scale = params['scale'][None]
    a1 = jax.nn.softmax(jnp.einsum('bhcn,bhdn->bhcd', q1, k1) * scale, axis=-1)
    o1 = jnp.einsum('bhcd,bhdn->bhcn', a1, v).reshape(b, c, h, w)
    a2 = jax.nn.softmax(jnp.einsum('bhcn,bhdn->bhcd', q2, k2) * scale, axis=-1)
    o2 = jnp.einsum('bhcd,bhdn->bhcn', a2, v).reshape(b, c, h, w)
    cat = jnp.concatenate([o1, o2], axis=1)
    return jnp.einsum('oi,bihw->bohw', params['w_proj'], cat)


# ------------------------------------- main --------------------------------------------

if __name__ == "__main__":
    key = jax.random.PRNGKey(0)
    kx, ky, kz, kw1, kw2, kw3 = jax.random.split(key, 6)

    b, dim, h, w = 2, 32, 8, 8     # dim=32 required: proj is Conv2d(64, 64) and concat has 2*dim chans
    num_heads = 8

    x = jax.random.normal(kx, (b, dim, h, w), jnp.float32)
    y = jax.random.normal(ky, (b, dim, h, w), jnp.float32)
    z = jax.random.normal(kz, (b, dim, h, w), jnp.float32)

    params = {
        'num_heads': num_heads,
        'scale': jnp.ones((num_heads, 1, 1), jnp.float32),                        # nn.Parameter(ones)
        'w_qkv1': 0.1 * jax.random.normal(kw1, (5 * dim, dim), jnp.float32),      # Conv2d(dim, 5*dim, 1), no bias
        'w_qkv2': 0.1 * jax.random.normal(kw2, (5 * dim, 3, 3), jnp.float32),     # depthwise 3x3, groups=5*dim
        'w_proj': 0.1 * jax.random.normal(kw3, (2 * dim, 2 * dim), jnp.float32),  # Conv2d(64, 64, 1), no bias
    }

    out = attention_base_forward(x, y, z, params)
    out = jax.block_until_ready(out)

    ref = reference_forward(x, y, z, params)
    assert out.shape == (b, 2 * dim, h, w)
    assert bool(jnp.all(jnp.isfinite(out)))
    assert bool(jnp.allclose(out, ref, atol=5e-2, rtol=5e-2))
    print("KERNEL_OK")
</pallas_src>

<mosaic_0001>
module attributes {stable_mosaic.version = 11 : i64} {
  func.func @kernel(%arg0: i32, %arg1: memref<1x32x64xf32, #tpu.memory_space<vmem>>, %arg2: memref<1x32x64xf32, #tpu.memory_space<vmem>>, %arg3: memref<1x32x64xf32, #tpu.memory_space<vmem>>, %arg4: memref<160x32xf32, #tpu.memory_space<vmem>>, %arg5: memref<9x160x1xf32, #tpu.memory_space<vmem>>, %arg6: memref<9x64x64xf32, #tpu.memory_space<vmem>>, %arg7: memref<64x1xf32, #tpu.memory_space<vmem>>, %arg8: memref<64x64xf32, #tpu.memory_space<vmem>>, %arg9: memref<64x64xf32, #tpu.memory_space<vmem>>, %arg10: memref<1x64x64xf32, #tpu.memory_space<vmem>>) attributes {dimension_semantics = [#tpu.dimension_semantics<parallel>], iteration_bounds = array<i64: 2>, scalar_prefetch = 0 : i64, scratch_operands = 0 : i64, tpu.core_type = #tpu.core_type<tc>, window_params = [{transform_indices = @transform_0, window_bounds = array<i64: 1, 32, 64>}, {transform_indices = @transform_1, window_bounds = array<i64: 1, 32, 64>}, {transform_indices = @transform_2, window_bounds = array<i64: 1, 32, 64>}, {pipeline_mode = #tpu.pipeline_mode<synchronous>, transform_indices = @transform_3, window_bounds = array<i64: 160, 32>}, {pipeline_mode = #tpu.pipeline_mode<synchronous>, transform_indices = @transform_4, window_bounds = array<i64: 9, 160, 1>}, {pipeline_mode = #tpu.pipeline_mode<synchronous>, transform_indices = @transform_5, window_bounds = array<i64: 9, 64, 64>}, {pipeline_mode = #tpu.pipeline_mode<synchronous>, transform_indices = @transform_6, window_bounds = array<i64: 64, 1>}, {pipeline_mode = #tpu.pipeline_mode<synchronous>, transform_indices = @transform_7, window_bounds = array<i64: 64, 64>}, {pipeline_mode = #tpu.pipeline_mode<synchronous>, transform_indices = @transform_8, window_bounds = array<i64: 64, 64>}, {transform_indices = @transform_9, window_bounds = array<i64: 1, 64, 64>}]} {
    %c0 = arith.constant 0 : index
    %c0_0 = arith.constant 0 : index
    %c0_1 = arith.constant 0 : index
    %0 = vector.load %arg1[%c0, %c0_0, %c0_1] : memref<1x32x64xf32, #tpu.memory_space<vmem>>, vector<1x32x64xf32>
    %1 = vector.shape_cast %0 : vector<1x32x64xf32> to vector<32x64xf32>
    %c0_2 = arith.constant 0 : index
    %c0_3 = arith.constant 0 : index
    %2 = vector.load %arg4[%c0_2, %c0_3] : memref<160x32xf32, #tpu.memory_space<vmem>>, vector<160x32xf32>
    %cst = arith.constant dense<0.000000e+00> : vector<160x64xf32>
    %3 = tpu.matmul %2, %1, %cst {dimension_numbers = #tpu.dot_dimension_numbers<[1], [0], [0], [1], [0, 0, 1, 1], [], []>} : vector<160x32xf32>, vector<32x64xf32>, vector<160x64xf32> -> vector<160x64xf32>
    %c0_4 = arith.constant 0 : index
    %c0_5 = arith.constant 0 : index
    %c0_6 = arith.constant 0 : index
    %4 = vector.load %arg5[%c0_4, %c0_5, %c0_6] : memref<9x160x1xf32, #tpu.memory_space<vmem>>, vector<1x160x1xf32>
    %5 = vector.shape_cast %4 : vector<1x160x1xf32> to vector<160x1xf32>
    %6 = vector.broadcast %5 : vector<160x1xf32> to vector<160x64xf32>
    %7 = arith.mulf %3, %6 : vector<160x64xf32>
    %c0_7 = arith.constant 0 : index
    %c0_8 = arith.constant 0 : index
    %c0_9 = arith.constant 0 : index
    %8 = vector.load %arg6[%c0_7, %c0_8, %c0_9] : memref<9x64x64xf32, #tpu.memory_space<vmem>>, vector<1x64x64xf32>
    %9 = vector.shape_cast %8 : vector<1x64x64xf32> to vector<64x64xf32>
    %cst_10 = arith.constant dense<0.000000e+00> : vector<160x64xf32>
    %10 = tpu.matmul %7, %9, %cst_10 {dimension_numbers = #tpu.dot_dimension_numbers<[1], [0], [0], [1], [0, 0, 1, 1], [], []>} : vector<160x64xf32>, vector<64x64xf32>, vector<160x64xf32> -> vector<160x64xf32>
    %c1 = arith.constant 1 : index
    %c0_11 = arith.constant 0 : index
    %c0_12 = arith.constant 0 : index
    %11 = vector.load %arg5[%c1, %c0_11, %c0_12] : memref<9x160x1xf32, #tpu.memory_space<vmem>>, vector<1x160x1xf32>
    %12 = vector.shape_cast %11 : vector<1x160x1xf32> to vector<160x1xf32>
    %13 = vector.broadcast %12 : vector<160x1xf32> to vector<160x64xf32>
    %14 = arith.mulf %3, %13 : vector<160x64xf32>
    %c1_13 = arith.constant 1 : index
    %c0_14 = arith.constant 0 : index
    %c0_15 = arith.constant 0 : index
    %15 = vector.load %arg6[%c1_13, %c0_14, %c0_15] : memref<9x64x64xf32, #tpu.memory_space<vmem>>, vector<1x64x64xf32>
    %16 = vector.shape_cast %15 : vector<1x64x64xf32> to vector<64x64xf32>
    %cst_16 = arith.constant dense<0.000000e+00> : vector<160x64xf32>
    %17 = tpu.matmul %14, %16, %cst_16 {dimension_numbers = #tpu.dot_dimension_numbers<[1], [0], [0], [1], [0, 0, 1, 1], [], []>} : vector<160x64xf32>, vector<64x64xf32>, vector<160x64xf32> -> vector<160x64xf32>
    %18 = arith.addf %10, %17 : vector<160x64xf32>
    %c2 = arith.constant 2 : index
    %c0_17 = arith.constant 0 : index
    %c0_18 = arith.constant 0 : index
    %19 = vector.load %arg5[%c2, %c0_17, %c0_18] : memref<9x160x1xf32, #tpu.memory_space<vmem>>, vector<1x160x1xf32>
    %20 = vector.shape_cast %19 : vector<1x160x1xf32> to vector<160x1xf32>
    %21 = vector.broadcast %20 : vector<160x1xf32> to vector<160x64xf32>
    %22 = arith.mulf %3, %21 : vector<160x64xf32>
    %c2_19 = arith.constant 2 : index
    %c0_20 = arith.constant 0 : index
    %c0_21 = arith.constant 0 : index
    %23 = vector.load %arg6[%c2_19, %c0_20, %c0_21] : memref<9x64x64xf32, #tpu.memory_space<vmem>>, vector<1x64x64xf32>
    %24 = vector.shape_cast %23 : vector<1x64x64xf32> to vector<64x64xf32>
    %cst_22 = arith.constant dense<0.000000e+00> : vector<160x64xf32>
    %25 = tpu.matmul %22, %24, %cst_22 {dimension_numbers = #tpu.dot_dimension_numbers<[1], [0], [0], [1], [0, 0, 1, 1], [], []>} : vector<160x64xf32>, vector<64x64xf32>, vector<160x64xf32> -> vector<160x64xf32>
    %26 = arith.addf %18, %25 : vector<160x64xf32>
    %c3 = arith.constant 3 : index
    %c0_23 = arith.constant 0 : index
    %c0_24 = arith.constant 0 : index
    %27 = vector.load %arg5[%c3, %c0_23, %c0_24] : memref<9x160x1xf32, #tpu.memory_space<vmem>>, vector<1x160x1xf32>
    %28 = vector.shape_cast %27 : vector<1x160x1xf32> to vector<160x1xf32>
    %29 = vector.broadcast %28 : vector<160x1xf32> to vector<160x64xf32>
    %30 = arith.mulf %3, %29 : vector<160x64xf32>
    %c3_25 = arith.constant 3 : index
    %c0_26 = arith.constant 0 : index
    %c0_27 = arith.constant 0 : index
    %31 = vector.load %arg6[%c3_25, %c0_26, %c0_27] : memref<9x64x64xf32, #tpu.memory_space<vmem>>, vector<1x64x64xf32>
    %32 = vector.shape_cast %31 : vector<1x64x64xf32> to vector<64x64xf32>
    %cst_28 = arith.constant dense<0.000000e+00> : vector<160x64xf32>
    %33 = tpu.matmul %30, %32, %cst_28 {dimension_numbers = #tpu.dot_dimension_numbers<[1], [0], [0], [1], [0, 0, 1, 1], [], []>} : vector<160x64xf32>, vector<64x64xf32>, vector<160x64xf32> -> vector<160x64xf32>
    %34 = arith.addf %26, %33 : vector<160x64xf32>
    %c4 = arith.constant 4 : index
    %c0_29 = arith.constant 0 : index
    %c0_30 = arith.constant 0 : index
    %35 = vector.load %arg5[%c4, %c0_29, %c0_30] : memref<9x160x1xf32, #tpu.memory_space<vmem>>, vector<1x160x1xf32>
    %36 = vector.shape_cast %35 : vector<1x160x1xf32> to vector<160x1xf32>
    %37 = vector.broadcast %36 : vector<160x1xf32> to vector<160x64xf32>
    %38 = arith.mulf %3, %37 : vector<160x64xf32>
    %c4_31 = arith.constant 4 : index
    %c0_32 = arith.constant 0 : index
    %c0_33 = arith.constant 0 : index
    %39 = vector.load %arg6[%c4_31, %c0_32, %c0_33] : memref<9x64x64xf32, #tpu.memory_space<vmem>>, vector<1x64x64xf32>
    %40 = vector.shape_cast %39 : vector<1x64x64xf32> to vector<64x64xf32>
    %cst_34 = arith.constant dense<0.000000e+00> : vector<160x64xf32>
    %41 = tpu.matmul %38, %40, %cst_34 {dimension_numbers = #tpu.dot_dimension_numbers<[1], [0], [0], [1], [0, 0, 1, 1], [], []>} : vector<160x64xf32>, vector<64x64xf32>, vector<160x64xf32> -> vector<160x64xf32>
    %42 = arith.addf %34, %41 : vector<160x64xf32>
    %c5 = arith.constant 5 : index
    %c0_35 = arith.constant 0 : index
    %c0_36 = arith.constant 0 : index
    %43 = vector.load %arg5[%c5, %c0_35, %c0_36] : memref<9x160x1xf32, #tpu.memory_space<vmem>>, vector<1x160x1xf32>
    %44 = vector.shape_cast %43 : vector<1x160x1xf32> to vector<160x1xf32>
    %45 = vector.broadcast %44 : vector<160x1xf32> to vector<160x64xf32>
    %46 = arith.mulf %3, %45 : vector<160x64xf32>
    %c5_37 = arith.constant 5 : index
    %c0_38 = arith.constant 0 : index
    %c0_39 = arith.constant 0 : index
    %47 = vector.load %arg6[%c5_37, %c0_38, %c0_39] : memref<9x64x64xf32, #tpu.memory_space<vmem>>, vector<1x64x64xf32>
    %48 = vector.shape_cast %47 : vector<1x64x64xf32> to vector<64x64xf32>
    %cst_40 = arith.constant dense<0.000000e+00> : vector<160x64xf32>
    %49 = tpu.matmul %46, %48, %cst_40 {dimension_numbers = #tpu.dot_dimension_numbers<[1], [0], [0], [1], [0, 0, 1, 1], [], []>} : vector<160x64xf32>, vector<64x64xf32>, vector<160x64xf32> -> vector<160x64xf32>
    %50 = arith.addf %42, %49 : vector<160x64xf32>
    %c6 = arith.constant 6 : index
    %c0_41 = arith.constant 0 : index
    %c0_42 = arith.constant 0 : index
    %51 = vector.load %arg5[%c6, %c0_41, %c0_42] : memref<9x160x1xf32, #tpu.memory_space<vmem>>, vector<1x160x1xf32>
    %52 = vector.shape_cast %51 : vector<1x160x1xf32> to vector<160x1xf32>
    %53 = vector.broadcast %52 : vector<160x1xf32> to vector<160x64xf32>
    %54 = arith.mulf %3, %53 : vector<160x64xf32>
    %c6_43 = arith.constant 6 : index
    %c0_44 = arith.constant 0 : index
    %c0_45 = arith.constant 0 : index
    %55 = vector.load %arg6[%c6_43, %c0_44, %c0_45] : memref<9x64x64xf32, #tpu.memory_space<vmem>>, vector<1x64x64xf32>
    %56 = vector.shape_cast %55 : vector<1x64x64xf32> to vector<64x64xf32>
    %cst_46 = arith.constant dense<0.000000e+00> : vector<160x64xf32>
    %57 = tpu.matmul %54, %56, %cst_46 {dimension_numbers = #tpu.dot_dimension_numbers<[1], [0], [0], [1], [0, 0, 1, 1], [], []>} : vector<160x64xf32>, vector<64x64xf32>, vector<160x64xf32> -> vector<160x64xf32>
    %58 = arith.addf %50, %57 : vector<160x64xf32>
    %c7 = arith.constant 7 : index
    %c0_47 = arith.constant 0 : index
    %c0_48 = arith.constant 0 : index
    %59 = vector.load %arg5[%c7, %c0_47, %c0_48] : memref<9x160x1xf32, #tpu.memory_space<vmem>>, vector<1x160x1xf32>
    %60 = vector.shape_cast %59 : vector<1x160x1xf32> to vector<160x1xf32>
    %61 = vector.broadcast %60 : vector<160x1xf32> to vector<160x64xf32>
    %62 = arith.mulf %3, %61 : vector<160x64xf32>
    %c7_49 = arith.constant 7 : index
    %c0_50 = arith.constant 0 : index
    %c0_51 = arith.constant 0 : index
    %63 = vector.load %arg6[%c7_49, %c0_50, %c0_51] : memref<9x64x64xf32, #tpu.memory_space<vmem>>, vector<1x64x64xf32>
    %64 = vector.shape_cast %63 : vector<1x64x64xf32> to vector<64x64xf32>
    %cst_52 = arith.constant dense<0.000000e+00> : vector<160x64xf32>
    %65 = tpu.matmul %62, %64, %cst_52 {dimension_numbers = #tpu.dot_dimension_numbers<[1], [0], [0], [1], [0, 0, 1, 1], [], []>} : vector<160x64xf32>, vector<64x64xf32>, vector<160x64xf32> -> vector<160x64xf32>
    %66 = arith.addf %58, %65 : vector<160x64xf32>
    %c8 = arith.constant 8 : index
    %c0_53 = arith.constant 0 : index
    %c0_54 = arith.constant 0 : index
    %67 = vector.load %arg5[%c8, %c0_53, %c0_54] : memref<9x160x1xf32, #tpu.memory_space<vmem>>, vector<1x160x1xf32>
    %68 = vector.shape_cast %67 : vector<1x160x1xf32> to vector<160x1xf32>
    %69 = vector.broadcast %68 : vector<160x1xf32> to vector<160x64xf32>
    %70 = arith.mulf %3, %69 : vector<160x64xf32>
    %c8_55 = arith.constant 8 : index
    %c0_56 = arith.constant 0 : index
    %c0_57 = arith.constant 0 : index
    %71 = vector.load %arg6[%c8_55, %c0_56, %c0_57] : memref<9x64x64xf32, #tpu.memory_space<vmem>>, vector<1x64x64xf32>
    %72 = vector.shape_cast %71 : vector<1x64x64xf32> to vector<64x64xf32>
    %cst_58 = arith.constant dense<0.000000e+00> : vector<160x64xf32>
    %73 = tpu.matmul %70, %72, %cst_58 {dimension_numbers = #tpu.dot_dimension_numbers<[1], [0], [0], [1], [0, 0, 1, 1], [], []>} : vector<160x64xf32>, vector<64x64xf32>, vector<160x64xf32> -> vector<160x64xf32>
    %74 = arith.addf %66, %73 : vector<160x64xf32>
    %c0_59 = arith.constant 0 : index
    %c0_60 = arith.constant 0 : index
    %c0_61 = arith.constant 0 : index
    %75 = vector.load %arg2[%c0_59, %c0_60, %c0_61] : memref<1x32x64xf32, #tpu.memory_space<vmem>>, vector<1x32x64xf32>
    %76 = vector.shape_cast %75 : vector<1x32x64xf32> to vector<32x64xf32>
    %c0_62 = arith.constant 0 : index
    %c0_63 = arith.constant 0 : index
    %c0_64 = arith.constant 0 : index
    %77 = vector.load %arg3[%c0_62, %c0_63, %c0_64] : memref<1x32x64xf32, #tpu.memory_space<vmem>>, vector<1x32x64xf32>
    %78 = vector.shape_cast %77 : vector<1x32x64xf32> to vector<32x64xf32>
    %79 = vector.extract_strided_slice %74 {offsets = [0, 0], sizes = [32, 64], strides = [1, 1]} : vector<160x64xf32> to vector<32x64xf32>
    %80 = arith.addf %79, %76 : vector<32x64xf32>
    %81 = vector.extract_strided_slice %74 {offsets = [32, 0], sizes = [32, 64], strides = [1, 1]} : vector<160x64xf32> to vector<32x64xf32>
    %82 = arith.addf %81, %78 : vector<32x64xf32>
    %83 = vector.extract_strided_slice %74 {offsets = [64, 0], sizes = [32, 64], strides = [1, 1]} : vector<160x64xf32> to vector<32x64xf32>
    %84 = arith.addf %83, %76 : vector<32x64xf32>
    %85 = vector.extract_strided_slice %74 {offsets = [96, 0], sizes = [32, 64], strides = [1, 1]} : vector<160x64xf32> to vector<32x64xf32>
    %86 = arith.addf %85, %78 : vector<32x64xf32>
    %87 = vector.extract_strided_slice %74 {offsets = [128, 0], sizes = [32, 64], strides = [1, 1]} : vector<160x64xf32> to vector<32x64xf32>
    %88 = arith.mulf %80, %80 : vector<32x64xf32>
    %cst_65 = arith.constant dense<0.000000e+00> : vector<32xf32>
    %89 = vector.multi_reduction <add>, %88, %cst_65 [1] : vector<32x64xf32> to vector<32xf32>
    %90 = vector.shape_cast %89 : vector<32xf32> to vector<32x1xf32>
    %91 = math.sqrt %90 : vector<32x1xf32>
    %cst_66 = arith.constant 9.99999996E-13 : f32
    %92 = vector.broadcast %cst_66 : f32 to vector<32x1xf32>
    %93 = arith.maximumf %91, %92 : vector<32x1xf32>
    %94 = tpu.reciprocal %93 : vector<32x1xf32> -> vector<32x1xf32>
    %95 = vector.broadcast %94 : vector<32x1xf32> to vector<32x64xf32>
    %96 = arith.mulf %80, %95 : vector<32x64xf32>
    %97 = arith.mulf %82, %82 : vector<32x64xf32>
    %cst_67 = arith.constant dense<0.000000e+00> : vector<32xf32>
    %98 = vector.multi_reduction <add>, %97, %cst_67 [1] : vector<32x64xf32> to vector<32xf32>
    %99 = vector.shape_cast %98 : vector<32xf32> to vector<32x1xf32>
    %100 = math.sqrt %99 : vector<32x1xf32>
    %cst_68 = arith.constant 9.99999996E-13 : f32
    %101 = vector.broadcast %cst_68 : f32 to vector<32x1xf32>
    %102 = arith.maximumf %100, %101 : vector<32x1xf32>
    %103 = tpu.reciprocal %102 : vector<32x1xf32> -> vector<32x1xf32>
    %104 = vector.broadcast %103 : vector<32x1xf32> to vector<32x64xf32>
    %105 = arith.mulf %82, %104 : vector<32x64xf32>
    %106 = tpu.concatenate %96, %105 in 0 : vector<32x64xf32>, vector<32x64xf32> -> vector<64x64xf32>
    %107 = arith.mulf %84, %84 : vector<32x64xf32>
    %cst_69 = arith.constant dense<0.000000e+00> : vector<32xf32>
    %108 = vector.multi_reduction <add>, %107, %cst_69 [1] : vector<32x64xf32> to vector<32xf32>
    %109 = vector.shape_cast %108 : vector<32xf32> to vector<32x1xf32>
    %110 = math.sqrt %109 : vector<32x1xf32>
    %cst_70 = arith.constant 9.99999996E-13 : f32
    %111 = vector.broadcast %cst_70 : f32 to vector<32x1xf32>
    %112 = arith.maximumf %110, %111 : vector<32x1xf32>
    %113 = tpu.reciprocal %112 : vector<32x1xf32> -> vector<32x1xf32>
    %114 = vector.broadcast %113 : vector<32x1xf32> to vector<32x64xf32>
    %115 = arith.mulf %84, %114 : vector<32x64xf32>
    %116 = arith.mulf %86, %86 : vector<32x64xf32>
    %cst_71 = arith.constant dense<0.000000e+00> : vector<32xf32>
    %117 = vector.multi_reduction <add>, %116, %cst_71 [1] : vector<32x64xf32> to vector<32xf32>
    %118 = vector.shape_cast %117 : vector<32xf32> to vector<32x1xf32>
    %119 = math.sqrt %118 : vector<32x1xf32>
    %cst_72 = arith.constant 9.99999996E-13 : f32
    %120 = vector.broadcast %cst_72 : f32 to vector<32x1xf32>
    %121 = arith.maximumf %119, %120 : vector<32x1xf32>
    %122 = tpu.reciprocal %121 : vector<32x1xf32> -> vector<32x1xf32>
    %123 = vector.broadcast %122 : vector<32x1xf32> to vector<32x64xf32>
    %124 = arith.mulf %86, %123 : vector<32x64xf32>
    %125 = tpu.concatenate %115, %124 in 0 : vector<32x64xf32>, vector<32x64xf32> -> vector<64x64xf32>
    %126 = tpu.concatenate %87, %87 in 0 : vector<32x64xf32>, vector<32x64xf32> -> vector<64x64xf32>
    %cst_73 = arith.constant dense<0.000000e+00> : vector<64x64xf32>
    %127 = tpu.matmul %106, %125, %cst_73 {dimension_numbers = #tpu.dot_dimension_numbers<[1], [1], [0], [0], [0, 0, 1, 0], [], []>} : vector<64x64xf32>, vector<64x64xf32>, vector<64x64xf32> -> vector<64x64xf32>
    %c0_74 = arith.constant 0 : index
    %c0_75 = arith.constant 0 : index
    %128 = vector.load %arg7[%c0_74, %c0_75] : memref<64x1xf32, #tpu.memory_space<vmem>>, vector<64x1xf32>
    %129 = vector.broadcast %128 : vector<64x1xf32> to vector<64x64xf32>
    %130 = arith.mulf %127, %129 : vector<64x64xf32>
    %c0_76 = arith.constant 0 : index
    %c0_77 = arith.constant 0 : index
    %131 = vector.load %arg8[%c0_76, %c0_77] : memref<64x64xf32, #tpu.memory_space<vmem>>, vector<64x64xf32>
    %132 = arith.addf %130, %131 : vector<64x64xf32>
    %cst_78 = arith.constant dense<0xFF800000> : vector<64xf32>
    %133 = vector.multi_reduction <maximumf>, %132, %cst_78 [1] : vector<64x64xf32> to vector<64xf32>
    %134 = vector.shape_cast %133 : vector<64xf32> to vector<64x1xf32>
    %135 = vector.broadcast %134 : vector<64x1xf32> to vector<64x64xf32>
    %136 = arith.subf %132, %135 : vector<64x64xf32>
    %137 = math.exp %136 : vector<64x64xf32>
    %cst_79 = arith.constant dense<0.000000e+00> : vector<64xf32>
    %138 = vector.multi_reduction <add>, %137, %cst_79 [1] : vector<64x64xf32> to vector<64xf32>
    %139 = vector.shape_cast %138 : vector<64xf32> to vector<64x1xf32>
    %140 = tpu.reciprocal %139 {approx = true} : vector<64x1xf32> -> vector<64x1xf32>
    %141 = vector.broadcast %140 : vector<64x1xf32> to vector<64x64xf32>
    %142 = arith.mulf %137, %141 : vector<64x64xf32>
    %cst_80 = arith.constant dense<0.000000e+00> : vector<64x64xf32>
    %143 = tpu.matmul %142, %126, %cst_80 {dimension_numbers = #tpu.dot_dimension_numbers<[1], [0], [0], [1], [0, 0, 1, 1], [], []>} : vector<64x64xf32>, vector<64x64xf32>, vector<64x64xf32> -> vector<64x64xf32>
    %c0_81 = arith.constant 0 : index
    %c0_82 = arith.constant 0 : index
    %144 = vector.load %arg9[%c0_81, %c0_82] : memref<64x64xf32, #tpu.memory_space<vmem>>, vector<64x64xf32>
    %cst_83 = arith.constant dense<0.000000e+00> : vector<64x64xf32>
    %145 = tpu.matmul %144, %143, %cst_83 {dimension_numbers = #tpu.dot_dimension_numbers<[1], [0], [0], [1], [0, 0, 1, 1], [], []>} : vector<64x64xf32>, vector<64x64xf32>, vector<64x64xf32> -> vector<64x64xf32>
    %c0_84 = arith.constant 0 : index
    %c0_85 = arith.constant 0 : index
    %c0_86 = arith.constant 0 : index
    %146 = vector.load %arg10[%c0_84, %c0_85, %c0_86] : memref<1x64x64xf32, #tpu.memory_space<vmem>>, vector<1x64x64xf32>
    %147 = vector.shape_cast %146 : vector<1x64x64xf32> to vector<64x64xf32>
    %148 = vector.shape_cast %145 : vector<64x64xf32> to vector<1x64x64xf32>
    tpu.vector_store %arg10[%c0_84, %c0_85, %c0_86], %148 {strides = array<i32>} : memref<1x64x64xf32, #tpu.memory_space<vmem>>, vector<1x64x64xf32>,
    return
  }
  func.func @transform_0(%arg0: i32) -> (i32, i32, i32) {
    %c0_i32 = arith.constant 0 : i32
    %c0_i32_0 = arith.constant 0 : i32
    %c0_i32_1 = arith.constant 0 : i32
    return %arg0, %c0_i32, %c0_i32_0 : i32, i32, i32
  }
  func.func @transform_1(%arg0: i32) -> (i32, i32, i32) {
    %c0_i32 = arith.constant 0 : i32
    %c0_i32_0 = arith.constant 0 : i32
    %c0_i32_1 = arith.constant 0 : i32
    return %arg0, %c0_i32, %c0_i32_0 : i32, i32, i32
  }
  func.func @transform_2(%arg0: i32) -> (i32, i32, i32) {
    %c0_i32 = arith.constant 0 : i32
    %c0_i32_0 = arith.constant 0 : i32
    %c0_i32_1 = arith.constant 0 : i32
    return %arg0, %c0_i32, %c0_i32_0 : i32, i32, i32
  }
  func.func @transform_3(%arg0: i32) -> (i32, i32) {
    %c0_i32 = arith.constant 0 : i32
    %c0_i32_0 = arith.constant 0 : i32
    %c0_i32_1 = arith.constant 0 : i32
    return %c0_i32, %c0_i32_0 : i32, i32
  }
  func.func @transform_4(%arg0: i32) -> (i32, i32, i32) {
    %c0_i32 = arith.constant 0 : i32
    %c0_i32_0 = arith.constant 0 : i32
    %c0_i32_1 = arith.constant 0 : i32
    %c0_i32_2 = arith.constant 0 : i32
    return %c0_i32, %c0_i32_0, %c0_i32_1 : i32, i32, i32
  }
  func.func @transform_5(%arg0: i32) -> (i32, i32, i32) {
    %c0_i32 = arith.constant 0 : i32
    %c0_i32_0 = arith.constant 0 : i32
    %c0_i32_1 = arith.constant 0 : i32
    %c0_i32_2 = arith.constant 0 : i32
    return %c0_i32, %c0_i32_0, %c0_i32_1 : i32, i32, i32
  }
  func.func @transform_6(%arg0: i32) -> (i32, i32) {
    %c0_i32 = arith.constant 0 : i32
    %c0_i32_0 = arith.constant 0 : i32
    %c0_i32_1 = arith.constant 0 : i32
    return %c0_i32, %c0_i32_0 : i32, i32
  }
  func.func @transform_7(%arg0: i32) -> (i32, i32) {
    %c0_i32 = arith.constant 0 : i32
    %c0_i32_0 = arith.constant 0 : i32
    %c0_i32_1 = arith.constant 0 : i32
    return %c0_i32, %c0_i32_0 : i32, i32
  }
  func.func @transform_8(%arg0: i32) -> (i32, i32) {
    %c0_i32 = arith.constant 0 : i32
    %c0_i32_0 = arith.constant 0 : i32
    %c0_i32_1 = arith.constant 0 : i32
    return %c0_i32, %c0_i32_0 : i32, i32
  }
  func.func @transform_9(%arg0: i32) -> (i32, i32, i32) {
    %c0_i32 = arith.constant 0 : i32
    %c0_i32_0 = arith.constant 0 : i32
    %c0_i32_1 = arith.constant 0 : i32
    return %arg0, %c0_i32, %c0_i32_0 : i32, i32, i32
  }
}

</mosaic_0001>

<bundles_post_ra>
// kernel: tpu_custom_call.1
= control target key start
LH: loop header
LB: loop body
LE: loop exit
PB: predicated region body
PF: predicated region fallthrough
CT: control target
= control target key end

     0   :  { %14 = vsyncpa [#allocation3], 0  ;;  %s9115_s0 = inlined_call_operand.vmem [shape: f32[2,32,64], index: 0, kind: input, shape index: {}]   ;;  %s9116_s1 = inlined_call_operand.vmem [shape: f32[2,32,64], index: 1, kind: input, shape index: {}]   ;;  %s9117_s2 = inlined_call_operand.vmem [shape: f32[2,32,64], index: 2, kind: input, shape index: {}]   ;;  %s9118_s3 = inlined_call_operand.vmem [shape: f32[160,32], index: 3, kind: input, shape index: {}]   ;;  %s9119_s4 = inlined_call_operand.vmem [shape: f32[9,160,1], index: 4, kind: input, shape index: {}]   ;;  %s9120_s5 = inlined_call_operand.vmem [shape: f32[9,64,64], index: 5, kind: input, shape index: {}]   ;;  %s9121_s6 = inlined_call_operand.vmem [shape: f32[64,1], index: 6, kind: input, shape index: {}]   ;;  %s9122_s7 = inlined_call_operand.vmem [shape: f32[64,64], index: 7, kind: input, shape index: {}]   ;;  %s9123_s8 = inlined_call_operand.vmem [shape: f32[64,64], index: 8, kind: input, shape index: {}]   ;;  %s9124_s9 = inlined_call_operand.hbm [shape: f32[2,64,64], index: 9, kind: output, shape index: {}]  }
   0x1   :  { %16 = vsyncpa [#allocation3 + $0x1], 0  ;;  %s7048_s30 = smov 0   ;;  %s7050_s10 = smov 0  }
   0x2   :  { %s7052_s11 = smov 0   ;;  %s7054_s12 = smov 0  }
   0x3 LB: > { %s7069_s13 = sadd.s32 4294967295, %s6992_s12   ;;  %s5070_s14 = sadd.s32 4294967294, %s6992_s12   ;;  %s6992_s12 = sphi %s7054_s12, %s9176_s12   ;;  %s6988_s11 = sphi %s7052_s11, %s9175_s11   ;;  %s6984_s10 = sphi %s7050_s10, %s9174_s10   ;;  %s6980_s30 = sphi %s7048_s30, %s9173_s30  }
   0x4   : > { %s7073_s15 = sadd.s32 1, %s6992_s12   ;;  %s233_s16 = sadd.s32 1, %s6988_s11 }
   0x5   : > { %s230_s17 = ssub.s32 %s6992_s12, %s7073_s15  ;;  %p243_p0 = scmp.ne.s32.totalorder %s6988_s11, %s6984_s10 }
   0x6   : > { %p231_p1 = scmp.eq.s32.totalorder %s230_s17, 0  ;;  %p244_p2 = scmp.eq.s32.totalorder %s7069_s13, 1 }
   0x7   : > { %p249_p3 = scmp.ne.s32.totalorder %s6984_s10, %s6980_s30  ;;  %p250_p4 = scmp.eq.s32.totalorder %s5070_s14, 1 }
   0x8   : > { %s7084_s18 = scalar_select %p231_p1, %s6988_s11, %s233_s16  }
   0x9   : > { %p7086_p5 = por %p244_p2, %p243_p0  ;;  %p7090_p6 = por %p250_p4, %p249_p3 }
   0xa   : > { %p5073_p7 = scmp.ge.s32.totalorder %s6992_s12, 1  ;;  %p310_p8 = scmp.lt.s32.totalorder %s6992_s12, 3 }
   0xc   : > { %p311_p9 = pnand %p5073_p7, %p310_p8 }
   0xe   : > { %314 = sbr.rel (%p311_p9) target bundleno = 1916 (0x77c), region = 56 }
  0x15   : > { %v5231_v0 = vld [vmem:[%s9119_s4 + $0x250] sm:$0xff]  ;;  %v5229_v1 = vld [vmem:[%s9119_s4 + $0x240] sm:$0xff]  ;;  %p356_p10 = scmp.lt.s32.totalorder %s7069_s13, 1  ;;  %vm395_vm0 = vcmask 261120   ;;  %v6994_v2 = vmov 0   ;;  %v5232_v4 = vld [vmem:[%s9119_s4 + $0x258] sm:$0xff] }
  0x16   : > { %6833 = vset.pattern.permute.xlu1 %v6994_v2  ;;  %6832 = vset.pattern.permute.xlu0 %v6994_v2  ;;  %v375_v3 = vld [vmem:[%s9118_s3] sm:$0xff]  ;;  %v5230_v5 = vld [vmem:[%s9119_s4 + $0x248] sm:$0xff]  ;;  %v5236_v14 = vld [vmem:[%s9119_s4 + $0x278] sm:$0xff]  ;;  %vm919_vm1 = vcmask 523264   ;;  %s5545_s27 = sshll.u32 %s7069_s13, 10  ;;  %s6995_s21 = smov [#allocation2]  }
  0x17   : > { %1858 = vperm.xlu1 %6833, %v5231_v0   ;;  %1848 = vperm.xlu0 %6832, %v5229_v1   ;;  %s357_s25 = scalar_select %p356_p10, %s7069_s13, 1  ;;  %v5234_v10 = vld [vmem:[%s9119_s4 + $0x268] sm:$0xff]  ;;  %v5233_v11 = vld [vmem:[%s9119_s4 + $0x260] sm:$0xff]  ;;  %v5235_v15 = vld [vmem:[%s9119_s4 + $0x270] sm:$0xff] }
  0x18   : > { %5878 = vmatprep.mubr.msk.f32.mxu0 %vm395_vm0, %v375_v3  ;;  %v376_v16 = vld [vmem:[%s9118_s3 + $0x8] sm:$0xff]  ;;  %v5265_v18 = vld [vmem:[%s9119_s4 + $0x280] sm:$0xff]  ;;  %v377_v19 = vld [vmem:[%s9118_s3 + $0x10] sm:$0xff]  ;;  %s9066_s14 = scalar_lea.hbm %s9124_s9, %s5545_s27  ;;  %s6934_s22 = sshll.u32 %s6995_s21, 4  ;;  %s6935_s22 = int_to_ptr.vmem [resolvable:$false] %s6934_s22 }
  0x19   : > { %s7114_s17 = sshll.u32 %s357_s25, 5  ;;  %v5266_v17 = vld [vmem:[%s9119_s4 + $0x288] sm:$0xff]  ;;  %v378_v20 = vld [vmem:[%s9118_s3 + $0x18] sm:$0xff]  ;;  %v5267_v22 = vld [vmem:[%s9119_s4 + $0x290] sm:$0xff] }
  0x1a   : > { %s360_s23 = scalar_lea.vmem %s9115_s0, %s7114_s17  ;;  %v5268_v21 = vld [vmem:[%s9119_s4 + $0x298] sm:$0xff]  ;;  %v379_v23 = vld [vmem:[%s9118_s3 + $0x20] sm:$0xff]  ;;  %v380_v24 = vld [vmem:[%s9118_s3 + $0x28] sm:$0xff]  ;;  %s365_s24 = scalar_lea.vmem %s9116_s1, %s7114_s17 }
  0x1b   : > { %1863 = vperm.xlu1 %6833, %v5232_v4   ;;  %1853 = vperm.xlu0 %6832, %v5230_v5   ;;  %v371_v6 = vld [vmem:[%s360_s23] sm:$0xff]  ;;  %v372_v7 = vld [vmem:[%s360_s23 + $0x8] sm:$0xff]  ;;  %v373_v8 = vld [vmem:[%s360_s23 + $0x10] sm:$0xff]  ;;  %s370_s28 = scalar_lea.vmem %s9117_s2, %s7114_s17 }
  0x1c   : > { %v6406_v9 = vpack.c.bf16 %v372_v7, %v371_v6  ;;  %v374_v12 = vld [vmem:[%s360_s23 + $0x18] sm:$0xff]  ;;  %v5270_v25 = vld [vmem:[%s9119_s4 + $0x2a8] sm:$0xff]  ;;  %v5269_v26 = vld [vmem:[%s9119_s4 + $0x2a0] sm:$0xff]  ;;  %s6936_s23 = scalar_lea.vmem %s6935_s22, 2048 }
  0x1d   : > { %v6410_v13 = vpack.c.bf16 %v374_v12, %v373_v8  ;;  %v381_v27 = vld [vmem:[%s9118_s3 + $0x30] sm:$0xff]  ;;  %v382_v28 = vld [vmem:[%s9118_s3 + $0x38] sm:$0xff]  ;;  %v383_v31 = vld [vmem:[%s9118_s3 + $0x40] sm:$0xff] }
  0x1e   : > { %6407 = vmatprep.subr.bf16.mxu0 %v6406_v9  ;;  %v5272_v29 = vld [vmem:[%s9119_s4 + $0x2b8] sm:$0xff]  ;;  %v5271_v30 = vld [vmem:[%s9119_s4 + $0x2b0] sm:$0xff]  ;;  %v384_v32 = vld [vmem:[%s9118_s3 + $0x48] sm:$0xff] }
  0x1f   : > { %1873 = vperm.xlu1 %6833, %v5234_v10   ;;  %1868 = vperm.xlu0 %6832, %v5233_v11   ;;  %v5274_v33 = vld [vmem:[%s9119_s4 + $0x2c8] sm:$0xff]  ;;  %v5273_v34 = vld [vmem:[%s9119_s4 + $0x2c0] sm:$0xff]  ;;  %v385_v35 = vld [vmem:[%s9118_s3 + $0x50] sm:$0xff] }
  0x20   : > { %6409 = vmatpush3.bf16.msra.mxu0 %v6406_v9  ;;  %v386_v36 = vld [vmem:[%s9118_s3 + $0x58] sm:$0xff]  ;;  %v5275_v38 = vld [vmem:[%s9119_s4 + $0x2d0] sm:$0xff]  ;;  %v387_v39 = vld [vmem:[%s9118_s3 + $0x60] sm:$0xff] }
  0x21   : > { %6411 = vmatprep.subr.bf16.mxu0 %v6410_v13  ;;  %v5276_v37 = vld [vmem:[%s9119_s4 + $0x2d8] sm:$0xff]  ;;  %v388_v40 = vld [vmem:[%s9118_s3 + $0x68] sm:$0xff]  ;;  %v5277_v42 = vld [vmem:[%s9119_s4 + $0x2e0] sm:$0xff] }
  0x22   : > { %v5278_v41 = vld [vmem:[%s9119_s4 + $0x2e8] sm:$0xff]  ;;  %v389_v43 = vld [vmem:[%s9118_s3 + $0x70] sm:$0xff]  ;;  %v390_v44 = vld [vmem:[%s9118_s3 + $0x78] sm:$0xff] }
  0x23   : > { %1883 = vperm.xlu1 %6833, %v5236_v14   ;;  %1878 = vperm.xlu0 %6832, %v5235_v15   ;;  %v5280_v45 = vld [vmem:[%s9119_s4 + $0x2f8] sm:$0xff]  ;;  %v5279_v46 = vld [vmem:[%s9119_s4 + $0x2f0] sm:$0xff]  ;;  %v391_v47 = vld [vmem:[%s9118_s3 + $0x80] sm:$0xff] }
  0x24   : > { %6413 = vmatpush3.bf16.msra.mxu0 %v6410_v13  ;;  %v392_v48 = vld [vmem:[%s9118_s3 + $0x88] sm:$0xff]  ;;  %v5281_v50 = vld [vmem:[%s9119_s4 + $0x300] sm:$0xff]  ;;  %v393_v51 = vld [vmem:[%s9118_s3 + $0x90] sm:$0xff] }
  0x25   : > { %v5282_v49 = vld [vmem:[%s9119_s4 + $0x308] sm:$0xff]  ;;  %v394_v52 = vld [vmem:[%s9118_s3 + $0x98] sm:$0xff]  ;;  %v5283_v54 = vld [vmem:[%s9119_s4 + $0x310] sm:$0xff] }
  0x26   : > { %v5284_v53 = vld [vmem:[%s9119_s4 + $0x318] sm:$0xff]  ;;  %v5313_v55 = vld [vmem:[%s9119_s4 + $0x320] sm:$0xff]  ;;  %v5314_v57 = vld [vmem:[%s9119_s4 + $0x328] sm:$0xff] }
  0x27   : > { %5879 = vmatmul.mubr.msk.f32.vlgmr.msra.gmra.mrb[0].mxu0 %vm395_vm0, %v376_v16  ;;  %2188 = vperm.xlu1 %6833, %v5266_v17   ;;  %v5101_v56 = vld [vmem:[%s9119_s4 + $0xa0] sm:$0xff]  ;;  %v5102_v58 = vld [vmem:[%s9119_s4 + $0xa8] sm:$0xff]  ;;  %v5315_v59 = vld [vmem:[%s9119_s4 + $0x330] sm:$0xff] }
  0x28   : > { %2183 = vperm.xlu0 %6832, %v5265_v18   ;;  %5881 = vmatprep.mubr.msk.f32.mxu0 %vm395_vm0, %v377_v19  ;;  %v5103_v60 = vld [vmem:[%s9119_s4 + $0xb0] sm:$0xff]  ;;  %v5316_v61 = vld [vmem:[%s9119_s4 + $0x338] sm:$0xff]  ;;  %v5317_v63 = vld [vmem:[%s9119_s4 + $0x340] sm:$0xff] }
  0x29   : > { %v5104_v62 = vld [vmem:[%s9119_s4 + $0xb8] sm:$0xff]  ;;  %v5105_v0 = vld [vmem:[%s9119_s4 + $0xc0] sm:$0xff]  ;;  %v5318_v1 = vld [vmem:[%s9119_s4 + $0x348] sm:$0xff] }
  0x2a   : > { %v5106_v2 = vld [vmem:[%s9119_s4 + $0xc8] sm:$0xff]  ;;  %v5319_v3 = vld [vmem:[%s9119_s4 + $0x350] sm:$0xff]  ;;  %v5320_v5 = vld [vmem:[%s9119_s4 + $0x358] sm:$0xff] }
  0x2b   : > { %5882 = vmatmul.mubr.msk.f32.gmra.mrb[2].mxu0 %vm395_vm0, %v378_v20  ;;  %2198 = vperm.xlu1 %6833, %v5268_v21   ;;  %v5107_v4 = vld [vmem:[%s9119_s4 + $0xd0] sm:$0xff]  ;;  %v5108_v6 = vld [vmem:[%s9119_s4 + $0xd8] sm:$0xff]  ;;  %v5321_v7 = vld [vmem:[%s9119_s4 + $0x360] sm:$0xff] }
  0x2c   : > { %2193 = vperm.xlu0 %6832, %v5267_v22   ;;  %5884 = vmatprep.mubr.msk.f32.mxu0 %vm395_vm0, %v379_v23  ;;  %v5121_v8 = vld [vmem:[%s9120_s5 + $0x40] sm:$0xff]  ;;  %v5122_v9 = vld [vmem:[%s9120_s5 + $0x48] sm:$0xff]  ;;  %v5123_v13 = vld [vmem:[%s9120_s5 + $0x50] sm:$0xff] }
  0x2d   : > { %v5109_v10 = vld [vmem:[%s9119_s4 + $0xe0] sm:$0xff]  ;;  %v6414_v11 = vpack.c.bf16 %v5122_v9, %v5121_v8  ;;  %v5322_v12 = vld [vmem:[%s9119_s4 + $0x368] sm:$0xff]  ;;  %v5124_v14 = vld [vmem:[%s9120_s5 + $0x58] sm:$0xff] }
  0x2e   : > { %v5110_v15 = vld [vmem:[%s9119_s4 + $0xe8] sm:$0xff]  ;;  %v6418_v16 = vpack.c.bf16 %v5124_v14, %v5123_v13  ;;  %v5323_v17 = vld [vmem:[%s9119_s4 + $0x370] sm:$0xff]  ;;  %v5125_v18 = vld [vmem:[%s9120_s5 + $0x60] sm:$0xff] }
  0x2f   : > { %5885 = vmatmul.mubr.msk.f32.gmra.mrb[4].mxu0 %vm395_vm0, %v380_v24  ;;  %2208 = vperm.xlu1 %6833, %v5270_v25   ;;  %v5126_v19 = vld [vmem:[%s9120_s5 + $0x68] sm:$0xff]  ;;  %v5111_v20 = vld [vmem:[%s9119_s4 + $0xf0] sm:$0xff]  ;;  %v5324_v22 = vld [vmem:[%s9119_s4 + $0x378] sm:$0xff] }
  0x30   : > { %2203 = vperm.xlu0 %6832, %v5269_v26   ;;  %5887 = vmatprep.mubr.msk.f32.mxu0 %vm395_vm0, %v381_v27  ;;  %v6422_v21 = vpack.c.bf16 %v5126_v19, %v5125_v18  ;;  %v5127_v23 = vld [vmem:[%s9120_s5 + $0x70] sm:$0xff]  ;;  %v5128_v24 = vld [vmem:[%s9120_s5 + $0x78] sm:$0xff]  ;;  %v5325_v27 = vld [vmem:[%s9119_s4 + $0x380] sm:$0xff] }
  0x31   : > { %6415 = vmatprep.subr.bf16.mxu0 %v6414_v11  ;;  %v5112_v25 = vld [vmem:[%s9119_s4 + $0xf8] sm:$0xff]  ;;  %v6426_v26 = vpack.c.bf16 %v5128_v24, %v5127_v23  ;;  %v5363_v9 = vld [vmem:[%s9119_s4 + $0x3d0] sm:$0xff]  ;;  %v625_v18 = vld [vmem:[%s9119_s4 + $0x20] sm:$0xff] }
  0x32   : > { %6417 = vmatpush3.bf16.msra.mxu0 %v6414_v11  ;;  %v5364_v13 = vld [vmem:[%s9119_s4 + $0x3d8] sm:$0xff] }
  0x33   : > { %5888 = vmatmul.mubr.msk.f32.gmra.mrb[6].mxu0 %vm395_vm0, %v382_v28  ;;  %2218 = vperm.xlu1 %6833, %v5272_v29   ;;  %v5113_v28 = vld [vmem:[%s9119_s4 + $0x100] sm:$0xff]  ;;  %v5326_v29 = vld [vmem:[%s9119_s4 + $0x388] sm:$0xff]  ;;  %v624_v14 = vld [vmem:[%s9119_s4 + $0x18] sm:$0xff] }
  0x34   : > { %2213 = vperm.xlu0 %6832, %v5271_v30   ;;  %5890 = vmatprep.mubr.msk.f32.mxu0 %vm395_vm0, %v383_v31  ;;  %v5114_v30 = vld [vmem:[%s9119_s4 + $0x108] sm:$0xff]  ;;  %v5327_v31 = vld [vmem:[%s9119_s4 + $0x390] sm:$0xff] }
  0x35   : > { %6419 = vmatprep.subr.bf16.mxu0 %v6418_v16 }
  0x36   : > { %6421 = vmatpush3.bf16.msra.mxu0 %v6418_v16 }
  0x37   : > { %5891 = vmatmul.mubr.msk.f32.gmra.mrb[8].mxu0 %vm395_vm0, %v384_v32  ;;  %2228 = vperm.xlu1 %6833, %v5274_v33   ;;  %v5237_v32 = vld [vmem:[%s9120_s5 + $0xc0] sm:$0xff]  ;;  %v5238_v33 = vld [vmem:[%s9120_s5 + $0xc8] sm:$0xff] }
  0x38   : > { %2223 = vperm.xlu0 %6832, %v5273_v34   ;;  %5893 = vmatprep.mubr.msk.f32.mxu0 %vm395_vm0, %v385_v35  ;;  %v5115_v34 = vld [vmem:[%s9119_s4 + $0x110] sm:$0xff]  ;;  %v7388_v35 = vpack.c.bf16 %v5238_v33, %v5237_v32  ;;  %v5369_v33 = vld [vmem:[%s9119_s4 + $0x400] sm:$0xff] }
  0x39   : > { %6423 = vmatprep.subr.bf16.mxu0 %v6422_v21 }
  0x3a   : > { %6425 = vmatpush3.bf16.msra.mxu0 %v6422_v21  ;;  %6614 = vmatprep.subr.bf16.mxu1 %v7388_v35  ;;  %v5366_v21 = vld [vmem:[%s9119_s4 + $0x3e8] sm:$0xff] }
  0x3b   : > { %5894 = vmatmul.mubr.msk.f32.gmra.mrb[10].mxu0 %vm395_vm0, %v386_v36  ;;  %2238 = vperm.xlu1 %6833, %v5276_v37   ;;  %v5328_v36 = vld [vmem:[%s9119_s4 + $0x398] sm:$0xff]  ;;  %v5239_v37 = vld [vmem:[%s9120_s5 + $0xd0] sm:$0xff] }
  0x3c   : > { %2233 = vperm.xlu0 %6832, %v5275_v38   ;;  %5896 = vmatprep.mubr.msk.f32.mxu0 %vm395_vm0, %v387_v39  ;;  %v5240_v38 = vld [vmem:[%s9120_s5 + $0xd8] sm:$0xff] }
  0x3d   : > { %6427 = vmatprep.subr.bf16.mxu0 %v6426_v26  ;;  %6618 = vmatpush3.bf16.msra.mxu1 %v7388_v35  ;;  %v5116_v39 = vld [vmem:[%s9119_s4 + $0x118] sm:$0xff] }
  0x3e   : > { %6429 = vmatpush3.bf16.msra.mxu0 %v6426_v26  ;;  %v627_v26 = vld [vmem:[%s9119_s4 + $0x30] sm:$0xff] }
  0x3f   : > { %5897 = vmatmul.mubr.msk.f32.gmra.mrb[12].mxu0 %vm395_vm0, %v388_v40  ;;  %2248 = vperm.xlu1 %6833, %v5278_v41   ;;  %v7404_v40 = vpack.c.bf16 %v5240_v38, %v5239_v37  ;;  %v5329_v41 = vld [vmem:[%s9119_s4 + $0x3a0] sm:$0xff]  ;;  %v5370_v38 = vld [vmem:[%s9119_s4 + $0x408] sm:$0xff] }
  0x40   : > { %2243 = vperm.xlu0 %6832, %v5277_v42   ;;  %5899 = vmatprep.mubr.msk.f32.mxu0 %vm395_vm0, %v389_v43  ;;  %v5241_v42 = vld [vmem:[%s9120_s5 + $0xe0] sm:$0xff]  ;;  %v5242_v43 = vld [vmem:[%s9120_s5 + $0xe8] sm:$0xff] }
  0x41   : > { %9133 = vst [vmem:[#allocation5_spill] sm:$0xff] %v7404_v40  ;;  %6615 = vmatprep.subr.bf16.mxu1 %v7404_v40 }
  0x42   : > { %6619 = vmatpush3.bf16.msra.mxu1 %v7404_v40 }
  0x43   : > { %5900 = vmatmul.mubr.msk.f32.gmra.mrb[14].mxu0 %vm395_vm0, %v390_v44  ;;  %2258 = vperm.xlu1 %6833, %v5280_v45   ;;  %v5117_v44 = vld [vmem:[%s9119_s4 + $0x120] sm:$0xff]  ;;  %v7420_v45 = vpack.c.bf16 %v5242_v43, %v5241_v42  ;;  %v5371_v43 = vld [vmem:[%s9119_s4 + $0x410] sm:$0xff] }
  0x44   : > { %2253 = vperm.xlu0 %6832, %v5279_v46   ;;  %5902 = vmatprep.mubr.msk.f32.mxu0 %vm395_vm0, %v391_v47  ;;  %v5330_v46 = vld [vmem:[%s9119_s4 + $0x3a8] sm:$0xff]  ;;  %v5243_v47 = vld [vmem:[%s9120_s5 + $0xf0] sm:$0xff] }
  0x45   : > { %9134 = vst [vmem:[#allocation6_spill] sm:$0xff] %v7420_v45  ;;  %6616 = vmatprep.subr.bf16.mxu1 %v7420_v45 }
  0x46   : > { %6620 = vmatpush3.bf16.msra.mxu1 %v7420_v45  ;;  %v5413_v45 = vld [vmem:[%s9119_s4 + $0x480] sm:$0xff] }
  0x47   : > { %5903 = vmatmul.mubr.msk.f32.gmra.mrb[16].mxu0 %vm395_vm0, %v392_v48  ;;  %2268 = vperm.xlu1 %6833, %v5282_v49   ;;  %v5244_v48 = vld [vmem:[%s9120_s5 + $0xf8] sm:$0xff]  ;;  %v5118_v49 = vld [vmem:[%s9119_s4 + $0x128] sm:$0xff] }
  0x48   : > { %2263 = vperm.xlu0 %6832, %v5281_v50   ;;  %5905 = vmatprep.mubr.msk.f32.mxu0 %vm395_vm0, %v393_v51  ;;  %v7436_v50 = vpack.c.bf16 %v5244_v48, %v5243_v47  ;;  %v5331_v51 = vld [vmem:[%s9119_s4 + $0x3b0] sm:$0xff]  ;;  %v5372_v48 = vld [vmem:[%s9119_s4 + $0x418] sm:$0xff] }
  0x4a   : > { %9135 = vst [vmem:[#allocation7_spill] sm:$0xff] %v7436_v50  ;;  %6617 = vmatprep.subr.bf16.mxu1 %v7436_v50 }
  0x4b   : > { %5906 = vmatmul.mubr.msk.f32.gmra.mrb[18].mxu0 %vm395_vm0, %v394_v52  ;;  %2278 = vperm.xlu1 %6833, %v5284_v53   ;;  %v5285_v52 = vld [vmem:[%s9120_s5 + $0x100] sm:$0xff]  ;;  %v5286_v53 = vld [vmem:[%s9120_s5 + $0x108] sm:$0xff] }
  0x4c   : > { %2273 = vperm.xlu0 %6832, %v5283_v54   ;;  %6621 = vmatpush3.bf16.msra.mxu1 %v7436_v50  ;;  %v761_v54 = vld [vmem:[%s9120_s5] sm:$0xff] }
  0x4f   : > { %2578 = vperm.xlu1 %6833, %v5313_v55   ;;  %v5119_v55 = vld [vmem:[%s9119_s4 + $0x130] sm:$0xff] }
  0x50   : > { %792 = vperm.xlu0 %6832, %v5101_v56   ;;  %v7455_v56 = vpack.c.bf16 %v5286_v53, %v5285_v52  ;;  %v5373_v53 = vld [vmem:[%s9119_s4 + $0x420] sm:$0xff] }
  0x52   : > { %6479 = vmatprep.subr.bf16.mxu1 %v7455_v56 }
  0x53   : > { %2583 = vperm.xlu1 %6833, %v5314_v57   ;;  %v762_v57 = vld [vmem:[%s9120_s5 + $0x8] sm:$0xff] }
  0x54   : > { %797 = vperm.xlu0 %6832, %v5102_v58  }
  0x57   : > { %2588 = vperm.xlu1 %6833, %v5315_v59  }
  0x58   : > { %802 = vperm.xlu0 %6832, %v5103_v60   ;;  %v7464_v60 = vpack.c.bf16 %v762_v57, %v761_v54  ;;  %v633_v54 = vld [vmem:[%s9119_s4 + $0x60] sm:$0xff] }
  0x5a   : > { %6431 = vmatprep.subr.bf16.mxu0 %v7464_v60 }
  0x5b   : > { %2593 = vperm.xlu1 %6833, %v5316_v61   ;;  %v5332_v61 = vld [vmem:[%s9119_s4 + $0x3b8] sm:$0xff] }
  0x5c   : > { %807 = vperm.xlu0 %6832, %v5104_v62   ;;  %v5120_v62 = vld [vmem:[%s9119_s4 + $0x138] sm:$0xff] }
  0x5f   : > { %2598 = vperm.xlu1 %6833, %v5317_v63  }
  0x60   : > { %812 = vperm.xlu0 %6832, %v5105_v0  }
  0x63   : > { %2603 = vperm.xlu1 %6833, %v5318_v1   ;;  %v5361_v1 = vld [vmem:[%s9119_s4 + $0x3c0] sm:$0xff] }
  0x64   : > { %817 = vperm.xlu0 %6832, %v5106_v2   ;;  %v621_v2 = vld [vmem:[%s9119_s4] sm:$0xff] }
  0x67   : > { %2608 = vperm.xlu1 %6833, %v5319_v3  }
  0x68   : > { %822 = vperm.xlu0 %6832, %v5107_v4  }
  0x6b   : > { %2613 = vperm.xlu1 %6833, %v5320_v5   ;;  %v5362_v5 = vld [vmem:[%s9119_s4 + $0x3c8] sm:$0xff] }
  0x6c   : > { %827 = vperm.xlu0 %6832, %v5108_v6   ;;  %v622_v6 = vld [vmem:[%s9119_s4 + $0x8] sm:$0xff] }
  0x6f   : > { %2618 = vperm.xlu1 %6833, %v5321_v7  }
  0x70   : > { %832 = vperm.xlu0 %6832, %v5109_v10   ;;  %v623_v10 = vld [vmem:[%s9119_s4 + $0x10] sm:$0xff] }
  0x73   : > { %2623 = vperm.xlu1 %6833, %v5322_v12  }
  0x74   : > { %837 = vperm.xlu0 %6832, %v5110_v15  }
  0x77   : > { %2628 = vperm.xlu1 %6833, %v5323_v17   ;;  %v5365_v17 = vld [vmem:[%s9119_s4 + $0x3e0] sm:$0xff] }
  0x78   : > { %842 = vperm.xlu0 %6832, %v5111_v20  }
  0x7b   : > { %2633 = vperm.xlu1 %6833, %v5324_v22   ;;  %v626_v22 = vld [vmem:[%s9119_s4 + $0x28] sm:$0xff] }
  0x7c   : > { %847 = vperm.xlu0 %6832, %v5112_v25   ;;  %v5367_v25 = vld [vmem:[%s9119_s4 + $0x3f0] sm:$0xff] }
  0x7f   : > { %2638 = vperm.xlu1 %6833, %v5325_v27  }
  0x80   : > { %852 = vperm.xlu0 %6832, %v5113_v28  }
  0x83   : > { %2643 = vperm.xlu1 %6833, %v5326_v29   ;;  %v5368_v29 = vld [vmem:[%s9119_s4 + $0x3f8] sm:$0xff] }
  0x84   : > { %857 = vperm.xlu0 %6832, %v5114_v30   ;;  %v628_v30 = vld [vmem:[%s9119_s4 + $0x38] sm:$0xff] }
  0x87   : > { %2648 = vperm.xlu1 %6833, %v5327_v31  }
  0x88   : > { %862 = vperm.xlu0 %6832, %v5115_v34   ;;  %v629_v34 = vld [vmem:[%s9119_s4 + $0x40] sm:$0xff] }
  0x8b   : > { %2653 = vperm.xlu1 %6833, %v5328_v36  }
  0x8c   : > { %867 = vperm.xlu0 %6832, %v5116_v39   ;;  %v630_v39 = vld [vmem:[%s9119_s4 + $0x48] sm:$0xff] }
  0x8f   : > { %2658 = vperm.xlu1 %6833, %v5329_v41  }
  0x90   : > { %872 = vperm.xlu0 %6832, %v5117_v44   ;;  %v631_v44 = vld [vmem:[%s9119_s4 + $0x50] sm:$0xff] }
  0x93   : > { %2663 = vperm.xlu1 %6833, %v5330_v46  }
  0x94   : > { %877 = vperm.xlu0 %6832, %v5118_v49   ;;  %v632_v49 = vld [vmem:[%s9119_s4 + $0x58] sm:$0xff] }
  0x96   : > { %v7460_v58 = vpop.permute.xlu1 %1858  ;;  %v7462_v59 = vpop.permute.xlu0 %1848 }
  0x97   : > { %2668 = vperm.xlu1 %6833, %v5331_v51  }
  0x98   : > { %882 = vperm.xlu0 %6832, %v5119_v55  }
  0x9a   : > { %v7474_v63 = vpop.permute.xlu1 %1863  ;;  %v7476_v0 = vpop.permute.xlu0 %1853 }
  0x9b   : > { %2673 = vperm.xlu1 %6833, %v5332_v61   ;;  %v5374_v61 = vld [vmem:[%s9119_s4 + $0x428] sm:$0xff] }
  0x9c   : > { %887 = vperm.xlu0 %6832, %v5120_v62   ;;  %v634_v62 = vld [vmem:[%s9119_s4 + $0x68] sm:$0xff] }
  0x9e   : > { %v7484_v3 = vpop.permute.xlu1 %1873  ;;  %v7486_v4 = vpop.permute.xlu0 %1868 }
  0x9f   : > { %2973 = vperm.xlu1 %6833, %v5361_v1  }
  0xa0   : > { %643 = vperm.xlu0 %6832, %v621_v2  }
  0xa2   : > { %v7494_v7 = vpop.permute.xlu1 %1883  ;;  %v7496_v8 = vpop.permute.xlu0 %1878 }
  0xa3   : > { %2978 = vperm.xlu1 %6833, %v5362_v5   ;;  %v5375_v5 = vld [vmem:[%s9119_s4 + $0x430] sm:$0xff] }
  0xa4   : > { %648 = vperm.xlu0 %6832, %v622_v6   ;;  %v635_v6 = vld [vmem:[%s9119_s4 + $0x70] sm:$0xff] }
  0xa6   : > { %v7504_v11 = vpop.permute.xlu1 %2188 }
  0xa7   : > { %v7506_v12 = vpop.permute.xlu0 %2183  ;;  %2983 = vperm.xlu1 %6833, %v5363_v9  }
  0xa8   : > { %653 = vperm.xlu0 %6832, %v623_v10  }
  0xaa   : > { %v7514_v15 = vpop.permute.xlu1 %2198 }
  0xab   : > { %v7516_v16 = vpop.permute.xlu0 %2193  ;;  %2988 = vperm.xlu1 %6833, %v5364_v13   ;;  %v5376_v13 = vld [vmem:[%s9119_s4 + $0x438] sm:$0xff] }
  0xac   : > { %658 = vperm.xlu0 %6832, %v624_v14   ;;  %v636_v14 = vld [vmem:[%s9119_s4 + $0x78] sm:$0xff] }
  0xae   : > { %v7524_v19 = vpop.permute.xlu1 %2208 }
  0xaf   : > { %v7526_v20 = vpop.permute.xlu0 %2203  ;;  %2993 = vperm.xlu1 %6833, %v5365_v17  }
  0xb0   : > { %663 = vperm.xlu0 %6832, %v625_v18  }
  0xb2   : > { %v7534_v23 = vpop.permute.xlu1 %2218 }
  0xb3   : > { %v7536_v24 = vpop.permute.xlu0 %2213  ;;  %2998 = vperm.xlu1 %6833, %v5366_v21   ;;  %v5377_v21 = vld [vmem:[%s9119_s4 + $0x440] sm:$0xff] }
  0xb4   : > { %668 = vperm.xlu0 %6832, %v626_v22   ;;  %v637_v22 = vld [vmem:[%s9119_s4 + $0x80] sm:$0xff] }
  0xb6   : > { %v7544_v27 = vpop.permute.xlu1 %2228 }
  0xb7   : > { %v7546_v28 = vpop.permute.xlu0 %2223  ;;  %3003 = vperm.xlu1 %6833, %v5367_v25  }
  0xb8   : > { %673 = vperm.xlu0 %6832, %v627_v26  }
  0xba   : > { %v7554_v31 = vpop.permute.xlu1 %2238 }
  0xbb   : > { %v7556_v32 = vpop.permute.xlu0 %2233  ;;  %3008 = vperm.xlu1 %6833, %v5368_v29   ;;  %v5378_v29 = vld [vmem:[%s9119_s4 + $0x448] sm:$0xff] }
  0xbc   : > { %678 = vperm.xlu0 %6832, %v628_v30   ;;  %v638_v30 = vld [vmem:[%s9119_s4 + $0x88] sm:$0xff] }
  0xbe   : > { %v7564_v36 = vpop.permute.xlu1 %2248 }
  0xbf   : > { %v7566_v37 = vpop.permute.xlu0 %2243  ;;  %3013 = vperm.xlu1 %6833, %v5369_v33  }
  0xc0   : > { %683 = vperm.xlu0 %6832, %v629_v34  }
  0xc2   : > { %v7574_v41 = vpop.permute.xlu1 %2258 }
  0xc3   : > { %v7576_v42 = vpop.permute.xlu0 %2253  ;;  %3018 = vperm.xlu1 %6833, %v5370_v38   ;;  %v5379_v38 = vld [vmem:[%s9119_s4 + $0x450] sm:$0xff] }
  0xc4   : > { %688 = vperm.xlu0 %6832, %v630_v39   ;;  %v639_v39 = vld [vmem:[%s9119_s4 + $0x90] sm:$0xff] }
  0xc6   : > { %v7584_v46 = vpop.permute.xlu1 %2268 }
  0xc7   : > { %v7586_v47 = vpop.permute.xlu0 %2263  ;;  %3023 = vperm.xlu1 %6833, %v5371_v43  }
  0xc8   : > { %693 = vperm.xlu0 %6832, %v631_v44  }
  0xca   : > { %v7594_v51 = vpop.permute.xlu1 %2278 }
  0xcb   : > { %v7596_v52 = vpop.permute.xlu0 %2273  ;;  %3028 = vperm.xlu1 %6833, %v5372_v48   ;;  %v5380_v48 = vld [vmem:[%s9119_s4 + $0x458] sm:$0xff] }
  0xcc   : > { %698 = vperm.xlu0 %6832, %v632_v49   ;;  %v640_v49 = vld [vmem:[%s9119_s4 + $0x98] sm:$0xff] }
  0xce   : > { %v7604_v55 = vpop.permute.xlu1 %2578 }
  0xcf   : > { %v7606_v57 = vpop.permute.xlu0 %792  ;;  %3033 = vperm.xlu1 %6833, %v5373_v53  }
  0xd0   : > { %703 = vperm.xlu0 %6832, %v633_v54  }
  0xd2   : > { %v7614_v1 = vpop.permute.xlu1 %2583 }
  0xd3   : > { %v7616_v2 = vpop.permute.xlu0 %797  ;;  %3038 = vperm.xlu1 %6833, %v5374_v61   ;;  %v5409_v61 = vld [vmem:[%s9119_s4 + $0x460] sm:$0xff] }
  0xd4   : > { %708 = vperm.xlu0 %6832, %v634_v62   ;;  %v5169_v62 = vld [vmem:[%s9119_s4 + $0x140] sm:$0xff] }
  0xd6   : > { %v7624_v9 = vpop.permute.xlu1 %2588 }
  0xd7   : > { %v7626_v10 = vpop.permute.xlu0 %802  ;;  %3043 = vperm.xlu1 %6833, %v5375_v5  }
  0xd8   : > { %713 = vperm.xlu0 %6832, %v635_v6  }
  0xda   : > { %v7634_v17 = vpop.permute.xlu1 %2593 }
  0xdb   : > { %9136 = vst [vmem:[#allocation8_spill] sm:$0xff] %v7634_v17  ;;  %v7636_v18 = vpop.permute.xlu0 %807  ;;  %3048 = vperm.xlu1 %6833, %v5376_v13   ;;  %v5410_v13 = vld [vmem:[%s9119_s4 + $0x468] sm:$0xff] }
  0xdc   : > { %718 = vperm.xlu0 %6832, %v636_v14   ;;  %v5170_v14 = vld [vmem:[%s9119_s4 + $0x148] sm:$0xff] }
  0xde   : > { %v7644_v25 = vpop.permute.xlu1 %2598 }
  0xdf   : > { %9137 = vst [vmem:[#allocation9_spill] sm:$0xff] %v7644_v25  ;;  %v7646_v26 = vpop.permute.xlu0 %812  ;;  %3053 = vperm.xlu1 %6833, %v5377_v21  }
  0xe0   : > { %723 = vperm.xlu0 %6832, %v637_v22  }
  0xe2   : > { %v7654_v33 = vpop.permute.xlu1 %2603 }
  0xe3   : > { %9138 = vst [vmem:[#allocation10_spill] sm:$0xff] %v7654_v33  ;;  %v7656_v34 = vpop.permute.xlu0 %817  ;;  %3058 = vperm.xlu1 %6833, %v5378_v29   ;;  %v5411_v29 = vld [vmem:[%s9119_s4 + $0x470] sm:$0xff] }
  0xe4   : > { %728 = vperm.xlu0 %6832, %v638_v30   ;;  %v5171_v30 = vld [vmem:[%s9119_s4 + $0x150] sm:$0xff] }
  0xe6   : > { %v7664_v43 = vpop.permute.xlu1 %2608 }
  0xe7   : > { %9139 = vst [vmem:[#allocation11_spill] sm:$0xff] %v7664_v43  ;;  %v7666_v44 = vpop.permute.xlu0 %822  ;;  %3063 = vperm.xlu1 %6833, %v5379_v38  }
  0xe8   : > { %733 = vperm.xlu0 %6832, %v639_v39  }
  0xea   : > { %v7674_v53 = vpop.permute.xlu1 %2613 }
  0xeb   : > { %9140 = vst [vmem:[#allocation12_spill] sm:$0xff] %v7674_v53  ;;  %v7676_v54 = vpop.permute.xlu0 %827  ;;  %3068 = vperm.xlu1 %6833, %v5380_v48   ;;  %v5412_v48 = vld [vmem:[%s9119_s4 + $0x478] sm:$0xff] }
  0xec   : > { %738 = vperm.xlu0 %6832, %v640_v49   ;;  %v5172_v49 = vld [vmem:[%s9119_s4 + $0x158] sm:$0xff] }
  0xee   : > { %v7684_v5 = vpop.permute.xlu1 %2618 }
  0xef   : > { %9141 = vst [vmem:[#allocation13_spill] sm:$0xff] %v7684_v5  ;;  %v7686_v6 = vpop.permute.xlu0 %832  ;;  %3368 = vperm.xlu1 %6833, %v5409_v61  }
  0xf0   : > { %1393 = vperm.xlu0 %6832, %v5169_v62  }
  0xf2   : > { %v7694_v21 = vpop.permute.xlu1 %2623 }
  0xf3   : > { %9142 = vst [vmem:[#allocation14_spill] sm:$0xff] %v7694_v21  ;;  %v7696_v22 = vpop.permute.xlu0 %837  ;;  %3373 = vperm.xlu1 %6833, %v5410_v13   ;;  %v763_v13 = vld [vmem:[%s9120_s5 + $0x10] sm:$0xff] }
  0xf4   : > { %1398 = vperm.xlu0 %6832, %v5170_v14   ;;  %v764_v14 = vld [vmem:[%s9120_s5 + $0x18] sm:$0xff] }
  0xf6   : > { %v7704_v38 = vpop.permute.xlu1 %2628 }
  0xf7   : > { %9143 = vst [vmem:[#allocation15_spill] sm:$0xff] %v7704_v38  ;;  %v7706_v39 = vpop.permute.xlu0 %842  ;;  %3378 = vperm.xlu1 %6833, %v5411_v29   ;;  %v6434_v38 = vpack.c.bf16 %v764_v14, %v763_v13  ;;  %v5414_v13 = vld [vmem:[%s9119_s4 + $0x488] sm:$0xff] }
  0xf8   : > { %1403 = vperm.xlu0 %6832, %v5171_v30  }
  0xfa   : > { %v7714_v61 = vpop.f32.mrb[0].mxu0  ;;  %v7716_v62 = vpop.permute.xlu1 %2633 }
  0xfb   : > { %9144 = vst [vmem:[#allocation16_spill] sm:$0xff] %v7716_v62  ;;  %v7724_v29 = vpop.permute.xlu0 %847  ;;  %v7726_v30 = vpop.f32.mrb[1].mxu0  ;;  %3383 = vperm.xlu1 %6833, %v5412_v48   ;;  %v891_v40 = vmul.f32 %v7714_v61, %v7616_v2  ;;  %v5173_v62 = vld [vmem:[%s9119_s4 + $0x160] sm:$0xff] }
  0xfc   : > { %1408 = vperm.xlu0 %6832, %v5172_v49   ;;  %v890_v50 = vmul.f32 %v7606_v57, %v7726_v30  ;;  %v765_v57 = vld [vmem:[%s9120_s5 + $0x20] sm:$0xff]  ;;  %v766_v49 = vld [vmem:[%s9120_s5 + $0x28] sm:$0xff] }
  0xfe   : > { %v7738_v21 = vpop.f32.mrb[2].mxu0  ;;  %5924 = vmatprep.mubr.msk.f32.mxu0 %vm919_vm1, %v890_v50  ;;  %v7741_v48 = vpop.permute.xlu1 %2638 }
  0xff   : > { %9145 = vst [vmem:[#allocation17_spill] sm:$0xff] %v7741_v48  ;;  %v7749_v2 = vpop.permute.xlu0 %852  ;;  %v7751_v5 = vpop.f32.mrb[3].mxu0  ;;  %5925 = vmatmul.mubr.msk.f32.vlgmr.msra.gmra.mrb[20].mxu0 %vm919_vm1, %v891_v40  ;;  %3388 = vperm.xlu1 %6833, %v5413_v45   ;;  %v893_v14 = vmul.f32 %v7738_v21, %v7636_v18  ;;  %v5174_v48 = vld [vmem:[%s9119_s4 + $0x168] sm:$0xff]  ;;  %v6438_v40 = vpack.c.bf16 %v766_v49, %v765_v57  ;;  %v5415_v49 = vld [vmem:[%s9119_s4 + $0x490] sm:$0xff] }
 0x100   : > { %1413 = vperm.xlu0 %6832, %v5173_v62   ;;  %v892_v50 = vmul.f32 %v7626_v10, %v7751_v5  ;;  %6433 = vmatpush3.bf16.msra.mxu0 %v7464_v60  ;;  %v767_v62 = vld [vmem:[%s9120_s5 + $0x30] sm:$0xff]  ;;  %v768_v60 = vld [vmem:[%s9120_s5 + $0x38] sm:$0xff] }
 0x101   : > { %6435 = vmatprep.subr.bf16.mxu0 %v6434_v38  ;;  %v6442_v43 = vpack.c.bf16 %v768_v60, %v767_v62  ;;  %v5416_v60 = vld [vmem:[%s9119_s4 + $0x498] sm:$0xff] }
 0x102   : > { %v7765_v45 = vpop.f32.mrb[4].mxu0  ;;  %5927 = vmatprep.mubr.msk.f32.mxu0 %vm919_vm1, %v892_v50  ;;  %v7768_v10 = vpop.permute.xlu1 %2643 }
 0x103   : > { %9146 = vst [vmem:[#allocation18_spill] sm:$0xff] %v7768_v10  ;;  %v7776_v18 = vpop.permute.xlu0 %857  ;;  %v7778_v53 = vpop.f32.mrb[5].mxu0  ;;  %5928 = vmatmul.mubr.msk.f32.gmra.mrb[22].mxu0 %vm919_vm1, %v893_v14  ;;  %3393 = vperm.xlu1 %6833, %v5414_v13   ;;  %v895_v50 = vmul.f32 %v7765_v45, %v7656_v34  ;;  %v5175_v10 = vld [vmem:[%s9119_s4 + $0x170] sm:$0xff]  ;;  %v5190_v34 = vld [vmem:[%s9120_s5 + $0x88] sm:$0xff] }
 0x104   : > { %1418 = vperm.xlu0 %6832, %v5174_v48   ;;  %v894_v57 = vmul.f32 %v7646_v26, %v7778_v53  ;;  %6437 = vmatpush3.bf16.msra.mxu0 %v6434_v38  ;;  %v5189_v26 = vld [vmem:[%s9120_s5 + $0x80] sm:$0xff] }
 0x105   : > { %6439 = vmatprep.subr.bf16.mxu0 %v6438_v40  ;;  %v7817_v33 = vpack.c.bf16 %v5190_v34, %v5189_v26  ;;  %v5177_v34 = vld [vmem:[%s9119_s4 + $0x180] sm:$0xff] }
 0x106   : > { %v7791_v14 = vpop.f32.mrb[6].mxu0  ;;  %5930 = vmatprep.mubr.msk.f32.mxu0 %vm919_vm1, %v894_v57  ;;  %v7794_v48 = vpop.permute.xlu1 %2648 }
 0x107   : > { %9147 = vst [vmem:[#allocation19_spill] sm:$0xff] %v7794_v48  ;;  %v7802_v38 = vpop.permute.xlu0 %862  ;;  %v7804_v13 = vpop.f32.mrb[7].mxu0  ;;  %5931 = vmatmul.mubr.msk.f32.gmra.mrb[24].mxu0 %vm919_vm1, %v895_v50  ;;  %3398 = vperm.xlu1 %6833, %v5415_v49   ;;  %v897_v57 = vmul.f32 %v7791_v14, %v7676_v54  ;;  %v5176_v48 = vld [vmem:[%s9119_s4 + $0x178] sm:$0xff] }
 0x108   : > { %1423 = vperm.xlu0 %6832, %v5175_v10   ;;  %v896_v62 = vmul.f32 %v7666_v44, %v7804_v13  ;;  %6441 = vmatpush3.bf16.msra.mxu0 %v6438_v40  ;;  %v5417_v40 = vld [vmem:[%s9119_s4 + $0x4a0] sm:$0xff] }
 0x109   : > { %6443 = vmatprep.subr.bf16.mxu0 %v6442_v43 }
 0x10a   : > { %v7819_v49 = vpop.f32.mrb[8].mxu0  ;;  %5933 = vmatprep.mubr.msk.f32.mxu0 %vm919_vm1, %v896_v62  ;;  %v7822_v44 = vpop.permute.xlu1 %2653 }
 0x10b   : > { %9148 = vst [vmem:[#allocation20_spill] sm:$0xff] %v7822_v44  ;;  %v868_v10 = vpop.permute.xlu0 %867  ;;  %v7824_v50 = vpop.f32.mrb[9].mxu0  ;;  %5934 = vmatmul.mubr.msk.f32.gmra.mrb[26].mxu0 %vm919_vm1, %v897_v57  ;;  %3403 = vperm.xlu1 %6833, %v5416_v60   ;;  %v899_v26 = vmul.f32 %v7819_v49, %v7696_v22  ;;  %v5418_v22 = vld [vmem:[%s9119_s4 + $0x4a8] sm:$0xff]  ;;  %v5419_v44 = vld [vmem:[%s9119_s4 + $0x4b0] sm:$0xff] }
 0x10c   : > { %1428 = vperm.xlu0 %6832, %v5176_v48   ;;  %v898_v54 = vmul.f32 %v7686_v6, %v7824_v50  ;;  %6445 = vmatpush3.bf16.msra.mxu0 %v6442_v43 }
 0x10d   : > { %6447 = vmatprep.subr.bf16.mxu0 %v7817_v33 }
 0x10e   : > { %v7838_v62 = vpop.f32.mrb[10].mxu0  ;;  %5936 = vmatprep.mubr.msk.f32.mxu0 %vm919_vm1, %v898_v54  ;;  %v7841_v48 = vpop.permute.xlu1 %2658  ;;  %v5178_v54 = vld [vmem:[%s9119_s4 + $0x188] sm:$0xff] }
 0x10f   : > { %9149 = vst [vmem:[#allocation21_spill] sm:$0xff] %v7841_v48  ;;  %v873_v6 = vpop.permute.xlu0 %872  ;;  %v7843_v60 = vpop.f32.mrb[11].mxu0  ;;  %5937 = vmatmul.mubr.msk.f32.gmra.mrb[28].mxu0 %vm919_vm1, %v899_v26  ;;  %3408 = vperm.xlu1 %6833, %v5417_v40   ;;  %v901_v57 = vmul.f32 %v7838_v62, %v7724_v29 }
 0x110   : > { %1433 = vperm.xlu0 %6832, %v5177_v34   ;;  %v900_v43 = vmul.f32 %v7706_v39, %v7843_v60 }
 0x112   : > { %v7856_v48 = vpop.f32.mrb[12].mxu0  ;;  %5939 = vmatprep.mubr.msk.f32.mxu0 %vm919_vm1, %v900_v43  ;;  %v7859_v40 = vpop.permute.xlu1 %2663 }
 0x113   : > { %9150 = vst [vmem:[#allocation22_spill] sm:$0xff] %v7859_v40  ;;  %v878_v26 = vpop.permute.xlu0 %877  ;;  %v7861_v34 = vpop.f32.mrb[13].mxu0  ;;  %5940 = vmatmul.mubr.msk.f32.gmra.mrb[30].mxu0 %vm919_vm1, %v901_v57  ;;  %3413 = vperm.xlu1 %6833, %v5418_v22   ;;  %v903_v43 = vmul.f32 %v7856_v48, %v7776_v18  ;;  %v1899_v40 = vmul.f32 %v7856_v48, %v7476_v0  ;;  %v5179_v22 = vld [vmem:[%s9119_s4 + $0x190] sm:$0xff] }
 0x114   : > { %1438 = vperm.xlu0 %6832, %v5178_v54   ;;  %v902_v39 = vmul.f32 %v7749_v2, %v7861_v34  ;;  %v1898_v29 = vmul.f32 %v7462_v59, %v7861_v34  ;;  %v5287_v2 = vld [vmem:[%s9120_s5 + $0x110] sm:$0xff]  ;;  %v5288_v59 = vld [vmem:[%s9120_s5 + $0x118] sm:$0xff] }
 0x116   : > { %v7884_v57 = vpop.f32.mrb[14].mxu0  ;;  %5942 = vmatprep.mubr.msk.f32.mxu0 %vm919_vm1, %v902_v39  ;;  %6080 = vmatprep.mubr.msk.f32.mxu1 %vm919_vm1, %v1898_v29  ;;  %v7888_v18 = vpop.permute.xlu1 %2668  ;;  %v6482_v39 = vpack.c.bf16 %v5288_v59, %v5287_v2 }
 0x117   : > { %9151 = vst [vmem:[#allocation23_spill] sm:$0xff] %v7888_v18  ;;  %v883_v0 = vpop.permute.xlu0 %882  ;;  %v7890_v54 = vpop.f32.mrb[15].mxu0  ;;  %5943 = vmatmul.mubr.msk.f32.gmra.mrb[32].mxu0 %vm919_vm1, %v903_v43  ;;  %6081 = vmatmul.mubr.msk.f32.vlgmr.msra.gmra.mrb[0].mxu1 %vm919_vm1, %v1899_v40  ;;  %v905_v29 = vmul.f32 %v7884_v57, %v868_v10  ;;  %v1901_v18 = vmul.f32 %v7884_v57, %v7474_v63  ;;  %v5420_v40 = vld [vmem:[%s9119_s4 + $0x4b8] sm:$0xff] }
 0x118   : > { %3418 = vperm.xlu1 %6833, %v5419_v44   ;;  %1443 = vperm.xlu0 %6832, %v5179_v22   ;;  %v904_v25 = vmul.f32 %v7802_v38, %v7890_v54  ;;  %v1900_v17 = vmul.f32 %v7460_v58, %v7890_v54  ;;  %v5289_v44 = vld [vmem:[%s9120_s5 + $0x120] sm:$0xff]  ;;  %v5290_v58 = vld [vmem:[%s9120_s5 + $0x128] sm:$0xff]  ;;  %v5180_v63 = vld [vmem:[%s9119_s4 + $0x198] sm:$0xff] }
 0x119   : > { %6481 = vmatpush3.bf16.msra.mxu1 %v7455_v56 }
 0x11a   : > { %v7911_v38 = vpop.f32.mrb[16].mxu0  ;;  %5945 = vmatprep.mubr.msk.f32.mxu0 %vm919_vm1, %v904_v25  ;;  %6083 = vmatprep.mubr.msk.f32.mxu1 %vm919_vm1, %v1900_v17  ;;  %v7915_v56 = vpop.permute.xlu1 %2673  ;;  %v6486_v25 = vpack.c.bf16 %v5290_v58, %v5289_v44 }
 0x11b   : > { %v888_v10 = vpop.permute.xlu0 %887  ;;  %v7920_v43 = vpop.f32.mrb[17].mxu0  ;;  %5946 = vmatmul.mubr.msk.f32.gmra.mrb[34].mxu0 %vm919_vm1, %v905_v29  ;;  %6084 = vmatmul.mubr.msk.f32.gmra.mrb[2].mxu1 %vm919_vm1, %v1901_v18  ;;  %v907_v2 = vmul.f32 %v7911_v38, %v878_v26  ;;  %v1903_v59 = vmul.f32 %v7911_v38, %v7484_v3  ;;  %v5421_v29 = vld [vmem:[%s9119_s4 + $0x4c0] sm:$0xff]  ;;  %v5291_v18 = vld [vmem:[%s9120_s5 + $0x130] sm:$0xff] }
 0x11c   : > { %6483 = vmatprep.subr.bf16.mxu1 %v6482_v39  ;;  %3423 = vperm.xlu1 %6833, %v5420_v40   ;;  %v906_v22 = vmul.f32 %v873_v6, %v7920_v43  ;;  %v1902_v17 = vmul.f32 %v7486_v4, %v7920_v43  ;;  %v5292_v4 = vld [vmem:[%s9120_s5 + $0x138] sm:$0xff]  ;;  %v5181_v3 = vld [vmem:[%s9119_s4 + $0x1a0] sm:$0xff] }
 0x11d   : > { %1448 = vperm.xlu0 %6832, %v5180_v63   ;;  %6485 = vmatpush3.bf16.msra.mxu1 %v6482_v39  ;;  %v6490_v63 = vpack.c.bf16 %v5292_v4, %v5291_v18  ;;  %v2281_v4 = vmul.f32 %v7506_v12, %v7726_v30  ;;  %v5336_v12 = vld [vmem:[%s9120_s5 + $0x158] sm:$0xff] }
 0x11e   : > { %v7939_v6 = vpop.f32.mrb[18].mxu0  ;;  %5948 = vmatprep.mubr.msk.f32.mxu0 %vm919_vm1, %v906_v22  ;;  %6086 = vmatprep.mubr.msk.f32.mxu1 %vm919_vm1, %v1902_v17  ;;  %v7943_v26 = vpop.permute.xlu1 %2973  ;;  %v5333_v22 = vld [vmem:[%s9120_s5 + $0x140] sm:$0xff]  ;;  %v5334_v17 = vld [vmem:[%s9120_s5 + $0x148] sm:$0xff] }
 0x11f   : > { %v644_v39 = vpop.permute.xlu0 %643  ;;  %v7948_v40 = vpop.f32.mrb[19].mxu0  ;;  %5949 = vmatmul.mubr.msk.f32.gmra.mrb[36].mxu0 %vm919_vm1, %v907_v2  ;;  %6087 = vmatmul.mubr.msk.f32.gmra.mrb[4].mxu1 %vm919_vm1, %v1903_v59  ;;  %v909_v2 = vmul.f32 %v7939_v6, %v888_v10  ;;  %v1905_v59 = vmul.f32 %v7939_v6, %v7494_v7  ;;  %v6494_v7 = vpack.c.bf16 %v5334_v17, %v5333_v22  ;;  %v5183_v17 = vld [vmem:[%s9119_s4 + $0x1b0] sm:$0xff] }
 0x120   : > { %6487 = vmatprep.subr.bf16.mxu1 %v6486_v25  ;;  %3428 = vperm.xlu1 %6833, %v5421_v29   ;;  %v908_v44 = vmul.f32 %v883_v0, %v7948_v40  ;;  %v1904_v58 = vmul.f32 %v7496_v8, %v7948_v40  ;;  %v5422_v8 = vld [vmem:[%s9119_s4 + $0x4c8] sm:$0xff] }
 0x121   : > { %1453 = vperm.xlu0 %6832, %v5181_v3   ;;  %6489 = vmatpush3.bf16.msra.mxu1 %v6486_v25  ;;  %v5182_v29 = vld [vmem:[%s9119_s4 + $0x1a8] sm:$0xff]  ;;  %v741_v25 = vmul.f32 %v644_v39, %v7726_v30  ;;  %v5191_v3 = vld [vmem:[%s9120_s5 + $0x90] sm:$0xff]  ;;  %v5192_v39 = vld [vmem:[%s9120_s5 + $0x98] sm:$0xff] }
 0x122   : > { %5951 = vmatprep.mubr.msk.f32.mxu0 %vm919_vm1, %v908_v44  ;;  %6089 = vmatprep.mubr.msk.f32.mxu1 %vm919_vm1, %v1904_v58  ;;  %v7969_v0 = vpop.permute.xlu1 %2978  ;;  %v5423_v44 = vld [vmem:[%s9119_s4 + $0x4d0] sm:$0xff] }
 0x123   : > { %v649_v10 = vpop.permute.xlu0 %648  ;;  %5952 = vmatmul.mubr.msk.f32.gmra.mrb[38].mxu0 %vm919_vm1, %v909_v2  ;;  %6090 = vmatmul.mubr.msk.f32.gmra.mrb[6].mxu1 %vm919_vm1, %v1905_v59  ;;  %v5335_v58 = vld [vmem:[%s9120_s5 + $0x150] sm:$0xff]  ;;  %v2282_v59 = vmul.f32 %v7714_v61, %v7504_v11  ;;  %v5337_v11 = vld [vmem:[%s9120_s5 + $0x160] sm:$0xff] }
 0x124   : > { %v742_v18 = vmul.f32 %v7714_v61, %v649_v10  ;;  %6491 = vmatprep.subr.bf16.mxu1 %v6490_v63  ;;  %3433 = vperm.xlu1 %6833, %v5422_v8   ;;  %v6450_v8 = vpack.c.bf16 %v5192_v39, %v5191_v3  ;;  %v5424_v10 = vld [vmem:[%s9119_s4 + $0x4d8] sm:$0xff]  ;;  %v2284_v3 = vmul.f32 %v7738_v21, %v7514_v15  ;;  %v5425_v15 = vld [vmem:[%s9119_s4 + $0x4e0] sm:$0xff] }
 0x125   : > { %1458 = vperm.xlu0 %6832, %v5182_v29   ;;  %5970 = vmatprep.mubr.msk.f32.mxu0 %vm919_vm1, %v741_v25  ;;  %v6498_v25 = vpack.c.bf16 %v5336_v12, %v5335_v58  ;;  %v5193_v12 = vld [vmem:[%s9120_s5 + $0xa0] sm:$0xff] }
 0x126   : > { %6493 = vmatpush3.bf16.msra.mxu1 %v6490_v63  ;;  %6108 = vmatprep.mubr.msk.f32.mxu1 %vm919_vm1, %v2281_v4  ;;  %v7997_v22 = vpop.permute.xlu1 %2983  ;;  %v2283_v63 = vmul.f32 %v7516_v16, %v7751_v5 }
 0x127   : > { %v654_v2 = vpop.permute.xlu0 %653  ;;  %5971 = vmatmul.mubr.msk.f32.vlgmr.msra.gmra.mrb[20].mxu0 %vm919_vm1, %v742_v18  ;;  %6495 = vmatprep.subr.bf16.mxu1 %v6494_v7  ;;  %v5338_v18 = vld [vmem:[%s9120_s5 + $0x168] sm:$0xff] }
 0x128   : > { %v743_v29 = vmul.f32 %v654_v2, %v7751_v5  ;;  %3438 = vperm.xlu1 %6833, %v5423_v44   ;;  %6449 = vmatpush3.bf16.msra.mxu0 %v7817_v33  ;;  %v5184_v33 = vld [vmem:[%s9119_s4 + $0x1b8] sm:$0xff]  ;;  %v2285_v44 = vmul.f32 %v7526_v20, %v7778_v53  ;;  %v6502_v58 = vpack.c.bf16 %v5338_v18, %v5337_v11  ;;  %v5339_v20 = vld [vmem:[%s9120_s5 + $0x170] sm:$0xff] }
 0x129   : > { %6109 = vmatmul.mubr.msk.f32.vlgmr.msra.gmra.mrb[8].mxu1 %vm919_vm1, %v2282_v59  ;;  %1463 = vperm.xlu0 %6832, %v5183_v17   ;;  %v5194_v17 = vld [vmem:[%s9120_s5 + $0xa8] sm:$0xff]  ;;  %v5185_v59 = vld [vmem:[%s9119_s4 + $0x1c0] sm:$0xff]  ;;  %v2287_v18 = vmul.f32 %v7536_v24, %v7804_v13 }
 0x12a   : > { %6111 = vmatprep.mubr.msk.f32.mxu1 %vm919_vm1, %v2283_v63  ;;  %5973 = vmatprep.mubr.msk.f32.mxu0 %vm919_vm1, %v743_v29  ;;  %v8021_v16 = vpop.permute.xlu1 %2988  ;;  %v2286_v63 = vmul.f32 %v7765_v45, %v7524_v19  ;;  %v5381_v19 = vld [vmem:[%s9120_s5 + $0x180] sm:$0xff] }
 0x12b   : > { %v659_v4 = vpop.permute.xlu0 %658  ;;  %6497 = vmatpush3.bf16.msra.mxu1 %v6494_v7  ;;  %6451 = vmatprep.subr.bf16.mxu0 %v6450_v8  ;;  %v5340_v7 = vld [vmem:[%s9120_s5 + $0x178] sm:$0xff] }
 0x12c   : > { %v744_v39 = vmul.f32 %v7738_v21, %v659_v4  ;;  %3443 = vperm.xlu1 %6833, %v5424_v10   ;;  %6499 = vmatprep.subr.bf16.mxu1 %v6498_v25  ;;  %v6454_v10 = vpack.c.bf16 %v5194_v17, %v5193_v12  ;;  %v5426_v4 = vld [vmem:[%s9119_s4 + $0x4e8] sm:$0xff]  ;;  %v2289_v12 = vmul.f32 %v7546_v28, %v7824_v50 }
 0x12d   : > { %6112 = vmatmul.mubr.msk.f32.gmra.mrb[10].mxu1 %vm919_vm1, %v2284_v3  ;;  %1468 = vperm.xlu0 %6832, %v5184_v33   ;;  %v6506_v33 = vpack.c.bf16 %v5340_v7, %v5339_v20  ;;  %v5196_v20 = vld [vmem:[%s9120_s5 + $0xb8] sm:$0xff] }
 0x12e   : > { %6114 = vmatprep.mubr.msk.f32.mxu1 %vm919_vm1, %v2285_v44  ;;  %5974 = vmatmul.mubr.msk.f32.gmra.mrb[22].mxu0 %vm919_vm1, %v744_v39  ;;  %v8049_v2 = vpop.permute.xlu1 %2993  ;;  %v2288_v39 = vmul.f32 %v7791_v14, %v7534_v23  ;;  %v5427_v23 = vld [vmem:[%s9119_s4 + $0x4f0] sm:$0xff] }
 0x12f   : > { %v664_v29 = vpop.permute.xlu0 %663  ;;  %6501 = vmatpush3.bf16.msra.mxu1 %v6498_v25  ;;  %6453 = vmatpush3.bf16.msra.mxu0 %v6450_v8  ;;  %v5382_v8 = vld [vmem:[%s9120_s5 + $0x188] sm:$0xff] }
 0x130   : > { %v745_v11 = vmul.f32 %v664_v29, %v7778_v53  ;;  %3448 = vperm.xlu1 %6833, %v5425_v15   ;;  %6503 = vmatprep.subr.bf16.mxu1 %v6502_v58  ;;  %v5186_v25 = vld [vmem:[%s9119_s4 + $0x1c8] sm:$0xff]  ;;  %v8081_v17 = vpack.c.bf16 %v5382_v8, %v5381_v19  ;;  %v5195_v15 = vld [vmem:[%s9120_s5 + $0xb0] sm:$0xff]  ;;  %v2293_v19 = vmul.f32 %v7566_v37, %v7861_v34  ;;  %v5457_v8 = vld [vmem:[%s9119_s4 + $0x500] sm:$0xff] }
 0x131   : > { %6115 = vmatmul.mubr.msk.f32.gmra.mrb[12].mxu1 %vm919_vm1, %v2286_v63  ;;  %1473 = vperm.xlu0 %6832, %v5185_v59   ;;  %v2290_v59 = vmul.f32 %v7819_v49, %v7544_v27  ;;  %v6458_v29 = vpack.c.bf16 %v5196_v20, %v5195_v15  ;;  %v2294_v37 = vmul.f32 %v7856_v48, %v7564_v36  ;;  %v5218_v15 = vld [vmem:[%s9119_s4 + $0x1e8] sm:$0xff] }
 0x132   : > { %6117 = vmatprep.mubr.msk.f32.mxu1 %vm919_vm1, %v2287_v18  ;;  %5976 = vmatprep.mubr.msk.f32.mxu0 %vm919_vm1, %v745_v11  ;;  %v8071_v24 = vpop.permute.xlu1 %2998  ;;  %v2291_v11 = vmul.f32 %v7556_v32, %v7843_v60  ;;  %v5428_v18 = vld [vmem:[%s9119_s4 + $0x4f8] sm:$0xff] }
 0x133   : > { %v669_v3 = vpop.permute.xlu0 %668  ;;  %6505 = vmatpush3.bf16.msra.mxu1 %v6502_v58  ;;  %6455 = vmatprep.subr.bf16.mxu0 %v6454_v10  ;;  %v5187_v58 = vld [vmem:[%s9119_s4 + $0x1d0] sm:$0xff] }
 0x134   : > { %v746_v44 = vmul.f32 %v7765_v45, %v669_v3  ;;  %3453 = vperm.xlu1 %6833, %v5426_v4   ;;  %6507 = vmatprep.subr.bf16.mxu1 %v6506_v33 }
 0x135   : > { %6118 = vmatmul.mubr.msk.f32.gmra.mrb[14].mxu1 %vm919_vm1, %v2288_v39  ;;  %1478 = vperm.xlu0 %6832, %v5186_v25   ;;  %v5217_v25 = vld [vmem:[%s9119_s4 + $0x1e0] sm:$0xff] }
 0x136   : > { %6120 = vmatprep.mubr.msk.f32.mxu1 %vm919_vm1, %v2289_v12  ;;  %5977 = vmatmul.mubr.msk.f32.gmra.mrb[24].mxu0 %vm919_vm1, %v746_v44  ;;  %v8095_v28 = vpop.permute.xlu1 %3003  ;;  %v2295_v44 = vmul.f32 %v7576_v42, %v7890_v54  ;;  %v5458_v12 = vld [vmem:[%s9119_s4 + $0x508] sm:$0xff]  ;;  %v2296_v42 = vmul.f32 %v7884_v57, %v7574_v41  ;;  %v5219_v41 = vld [vmem:[%s9119_s4 + $0x1f0] sm:$0xff] }
 0x137   : > { %v674_v7 = vpop.permute.xlu0 %673  ;;  %6509 = vmatpush3.bf16.msra.mxu1 %v6506_v33  ;;  %6457 = vmatpush3.bf16.msra.mxu0 %v6454_v10  ;;  %v5188_v10 = vld [vmem:[%s9119_s4 + $0x1d8] sm:$0xff]  ;;  %v2292_v33 = vmul.f32 %v7838_v62, %v7554_v31 }
 0x138   : > { %v747_v63 = vmul.f32 %v674_v7, %v7804_v13  ;;  %3458 = vperm.xlu1 %6833, %v5427_v23   ;;  %6511 = vmatprep.subr.bf16.mxu1 %v8081_v17  ;;  %v5459_v7 = vld [vmem:[%s9119_s4 + $0x510] sm:$0xff] }
 0x139   : > { %6121 = vmatmul.mubr.msk.f32.gmra.mrb[16].mxu1 %vm919_vm1, %v2290_v59  ;;  %1483 = vperm.xlu0 %6832, %v5187_v58   ;;  %v2297_v58 = vmul.f32 %v7586_v47, %v7920_v43  ;;  %v2298_v47 = vmul.f32 %v7911_v38, %v7584_v46  ;;  %v5220_v46 = vld [vmem:[%s9119_s4 + $0x1f8] sm:$0xff] }
 0x13a   : > { %6123 = vmatprep.mubr.msk.f32.mxu1 %vm919_vm1, %v2291_v11  ;;  %5979 = vmatprep.mubr.msk.f32.mxu0 %vm919_vm1, %v747_v63  ;;  %v8112_v27 = vpop.permute.xlu1 %3008  ;;  %v2299_v11 = vmul.f32 %v7596_v52, %v7948_v40  ;;  %v2300_v52 = vmul.f32 %v7939_v6, %v7594_v51  ;;  %v5384_v51 = vld [vmem:[%s9120_s5 + $0x198] sm:$0xff] }
 0x13b   : > { %v679_v32 = vpop.permute.xlu0 %678  ;;  %6459 = vmatprep.subr.bf16.mxu0 %v6458_v29 }
 0x13c   : > { %v748_v4 = vmul.f32 %v7791_v14, %v679_v32  ;;  %3463 = vperm.xlu1 %6833, %v5428_v18   ;;  %6461 = vmatpush3.bf16.msra.mxu0 %v6458_v29  ;;  %v5460_v18 = vld [vmem:[%s9119_s4 + $0x518] sm:$0xff] }
 0x13d   : > { %6124 = vmatmul.mubr.msk.f32.gmra.mrb[18].mxu1 %vm919_vm1, %v2292_v33  ;;  %1488 = vperm.xlu0 %6832, %v5188_v10  }
 0x13e   : > { %6126 = vmatprep.mubr.msk.f32.mxu1 %vm919_vm1, %v2293_v19  ;;  %5980 = vmatmul.mubr.msk.f32.gmra.mrb[26].mxu0 %vm919_vm1, %v748_v4  ;;  %v8128_v31 = vpop.permute.xlu1 %3013  ;;  %v2676_v4 = vmul.f32 %v7604_v55, %v7726_v30  ;;  %v5461_v19 = vld [vmem:[%s9119_s4 + $0x520] sm:$0xff] }
 0x13f   : > { %v684_v3 = vpop.permute.xlu0 %683  ;;  %6463 = vmatprep.subr.bf16.mxu0 %v7388_v35 }
 0x140   : > { %v749_v39 = vmul.f32 %v684_v3, %v7824_v50  ;;  %3763 = vperm.xlu1 %6833, %v5457_v8   ;;  %v5383_v8 = vld [vmem:[%s9120_s5 + $0x190] sm:$0xff] }
 0x141   : > { %6127 = vmatmul.mubr.msk.f32.gmra.mrb[0].mxu1 %vm919_vm1, %v2294_v37  ;;  %1788 = vperm.xlu0 %6832, %v5217_v25   ;;  %v5221_v25 = vld [vmem:[%s9119_s4 + $0x200] sm:$0xff]  ;;  %v2677_v37 = vmul.f32 %v7714_v61, %v7614_v1  ;;  %v5386_v1 = vld [vmem:[%s9120_s5 + $0x1a8] sm:$0xff] }
 0x142   : > { %6129 = vmatprep.mubr.msk.f32.mxu1 %vm919_vm1, %v2295_v44  ;;  %5982 = vmatprep.mubr.msk.f32.mxu0 %vm919_vm1, %v749_v39  ;;  %v8145_v36 = vpop.permute.xlu1 %3018  ;;  %v2678_v44 = vmul.f32 %v7624_v9, %v7751_v5 }
 0x143   : > { %v689_v20 = vpop.permute.xlu0 %688 }
 0x144   : > { %v750_v23 = vmul.f32 %v7819_v49, %v689_v20  ;;  %3768 = vperm.xlu1 %6833, %v5458_v12   ;;  %v6514_v12 = vpack.c.bf16 %v5384_v51, %v5383_v8  ;;  %v5385_v20 = vld [vmem:[%s9120_s5 + $0x1a0] sm:$0xff]  ;;  %v9155_v8 = vld [vmem:[#allocation11_spill] sm:$0xff] }
 0x145   : > { %6130 = vmatmul.mubr.msk.f32.gmra.mrb[2].mxu1 %vm919_vm1, %v2296_v42  ;;  %1793 = vperm.xlu0 %6832, %v5218_v15   ;;  %v5462_v15 = vld [vmem:[%s9119_s4 + $0x528] sm:$0xff]  ;;  %v2682_v51 = vmul.f32 %v9155_v8, %v7804_v13 }
 0x146   : > { %6132 = vmatprep.mubr.msk.f32.mxu1 %vm919_vm1, %v2297_v58  ;;  %5983 = vmatmul.mubr.msk.f32.gmra.mrb[28].mxu0 %vm919_vm1, %v750_v23  ;;  %v8161_v59 = vpop.permute.xlu1 %3023  ;;  %v5222_v42 = vld [vmem:[%s9119_s4 + $0x208] sm:$0xff]  ;;  %v9152_v58 = vld [vmem:[#allocation8_spill] sm:$0xff] }
 0x147   : > { %v694_v29 = vpop.permute.xlu0 %693 }
 0x148   : > { %v751_v63 = vmul.f32 %v694_v29, %v7843_v60  ;;  %3773 = vperm.xlu1 %6833, %v5459_v7   ;;  %v2679_v7 = vmul.f32 %v7738_v21, %v9152_v58  ;;  %v9153_v29 = vld [vmem:[#allocation9_spill] sm:$0xff] }
 0x149   : > { %6133 = vmatmul.mubr.msk.f32.gmra.mrb[4].mxu1 %vm919_vm1, %v2298_v47  ;;  %1798 = vperm.xlu0 %6832, %v5219_v41   ;;  %v2680_v47 = vmul.f32 %v9153_v29, %v7778_v53 }
 0x14a   : > { %6135 = vmatprep.mubr.msk.f32.mxu1 %vm919_vm1, %v2299_v11  ;;  %5985 = vmatprep.mubr.msk.f32.mxu0 %vm919_vm1, %v751_v63  ;;  %v8177_v10 = vpop.permute.xlu1 %3028  ;;  %v6518_v63 = vpack.c.bf16 %v5386_v1, %v5385_v20  ;;  %v5463_v11 = vld [vmem:[%s9119_s4 + $0x530] sm:$0xff]  ;;  %v9156_v20 = vld [vmem:[#allocation12_spill] sm:$0xff] }
 0x14b   : > { %v699_v32 = vpop.permute.xlu0 %698  ;;  %v2683_v1 = vmul.f32 %v7791_v14, %v9156_v20  ;;  %v5227_v20 = vld [vmem:[%s9119_s4 + $0x230] sm:$0xff] }
 0x14c   : > { %v752_v33 = vmul.f32 %v7838_v62, %v699_v32  ;;  %3778 = vperm.xlu1 %6833, %v5460_v18   ;;  %v5387_v18 = vld [vmem:[%s9120_s5 + $0x1b0] sm:$0xff] }
 0x14d   : > { %6136 = vmatmul.mubr.msk.f32.gmra.mrb[6].mxu1 %vm919_vm1, %v2300_v52  ;;  %1803 = vperm.xlu0 %6832, %v5220_v46   ;;  %v5223_v32 = vld [vmem:[%s9119_s4 + $0x210] sm:$0xff] }
 0x14e   : > { %6154 = vmatprep.mubr.msk.f32.mxu1 %vm919_vm1, %v2676_v4  ;;  %5986 = vmatmul.mubr.msk.f32.gmra.mrb[30].mxu0 %vm919_vm1, %v752_v33  ;;  %v8199_v55 = vpop.permute.xlu1 %3033  ;;  %v9154_v33 = vld [vmem:[#allocation10_spill] sm:$0xff] }
 0x14f   : > { %v704_v3 = vpop.permute.xlu0 %703  ;;  %v2681_v4 = vmul.f32 %v7765_v45, %v9154_v33  ;;  %v5466_v33 = vld [vmem:[%s9119_s4 + $0x548] sm:$0xff] }
 0x150   : > { %v753_v39 = vmul.f32 %v704_v3, %v7861_v34  ;;  %3783 = vperm.xlu1 %6833, %v5461_v19   ;;  %v5464_v3 = vld [vmem:[%s9119_s4 + $0x538] sm:$0xff] }
 0x151   : > { %6155 = vmatmul.mubr.msk.f32.vlgmr.msra.gmra.mrb[8].mxu1 %vm919_vm1, %v2677_v37  ;;  %1808 = vperm.xlu0 %6832, %v5221_v25   ;;  %v5429_v37 = vld [vmem:[%s9120_s5 + $0x1c0] sm:$0xff] }
 0x152   : > { %6157 = vmatprep.mubr.msk.f32.mxu1 %vm919_vm1, %v2678_v44  ;;  %5988 = vmatprep.mubr.msk.f32.mxu0 %vm919_vm1, %v753_v39  ;;  %v8221_v9 = vpop.permute.xlu1 %3038  ;;  %v5430_v39 = vld [vmem:[%s9120_s5 + $0x1c8] sm:$0xff] }
 0x153   : > { %v709_v23 = vpop.permute.xlu0 %708  ;;  %6513 = vmatpush3.bf16.msra.mxu1 %v8081_v17  ;;  %v5388_v17 = vld [vmem:[%s9120_s5 + $0x1b8] sm:$0xff] }
 0x154   : > { %v754_v41 = vmul.f32 %v7856_v48, %v709_v23  ;;  %3788 = vperm.xlu1 %6833, %v5462_v15   ;;  %6515 = vmatprep.subr.bf16.mxu1 %v6514_v12  ;;  %v6522_v25 = vpack.c.bf16 %v5388_v17, %v5387_v18  ;;  %v9157_v23 = vld [vmem:[#allocation13_spill] sm:$0xff] }
 0x155   : > { %6158 = vmatmul.mubr.msk.f32.gmra.mrb[10].mxu1 %vm919_vm1, %v2679_v7  ;;  %1813 = vperm.xlu0 %6832, %v5222_v42   ;;  %v2684_v58 = vmul.f32 %v9157_v23, %v7824_v50  ;;  %v8276_v7 = vpack.c.bf16 %v5430_v39, %v5429_v37  ;;  %v9161_v37 = vld [vmem:[#allocation17_spill] sm:$0xff] }
 0x156   : > { %6160 = vmatprep.mubr.msk.f32.mxu1 %vm919_vm1, %v2680_v47  ;;  %5989 = vmatmul.mubr.msk.f32.gmra.mrb[32].mxu0 %vm919_vm1, %v754_v41  ;;  %v8244_v46 = vpop.permute.xlu1 %3043  ;;  %v5465_v41 = vld [vmem:[%s9119_s4 + $0x540] sm:$0xff]  ;;  %v2688_v39 = vmul.f32 %v9161_v37, %v7861_v34 }
 0x157   : > { %v714_v52 = vpop.permute.xlu0 %713  ;;  %6517 = vmatpush3.bf16.msra.mxu1 %v6514_v12  ;;  %v5224_v12 = vld [vmem:[%s9119_s4 + $0x218] sm:$0xff]  ;;  %v5225_v47 = vld [vmem:[%s9119_s4 + $0x220] sm:$0xff] }
 0x158   : > { %v755_v19 = vmul.f32 %v714_v52, %v7890_v54  ;;  %3793 = vperm.xlu1 %6833, %v5463_v11   ;;  %6519 = vmatprep.subr.bf16.mxu1 %v6518_v63  ;;  %v9158_v11 = vld [vmem:[#allocation14_spill] sm:$0xff] }
 0x159   : > { %6161 = vmatmul.mubr.msk.f32.gmra.mrb[12].mxu1 %vm919_vm1, %v2681_v4  ;;  %1818 = vperm.xlu0 %6832, %v5223_v32   ;;  %v2685_v18 = vmul.f32 %v7819_v49, %v9158_v11  ;;  %v9159_v32 = vld [vmem:[#allocation15_spill] sm:$0xff] }
 0x15a   : > { %6163 = vmatprep.mubr.msk.f32.mxu1 %vm919_vm1, %v2682_v51  ;;  %5991 = vmatprep.mubr.msk.f32.mxu0 %vm919_vm1, %v755_v19  ;;  %v8266_v44 = vpop.permute.xlu1 %3048  ;;  %v2686_v52 = vmul.f32 %v9159_v32, %v7843_v60  ;;  %v5226_v19 = vld [vmem:[%s9119_s4 + $0x228] sm:$0xff]  ;;  %v9160_v51 = vld [vmem:[#allocation16_spill] sm:$0xff] }
 0x15b   : > { %v719_v15 = vpop.permute.xlu0 %718  ;;  %6521 = vmatpush3.bf16.msra.mxu1 %v6518_v63  ;;  %v9164_v32 = vld [vmem:[#allocation20_spill] sm:$0xff] }
 0x15c   : > { %v756_v42 = vmul.f32 %v7884_v57, %v719_v15  ;;  %3798 = vperm.xlu1 %6833, %v5464_v3   ;;  %6523 = vmatprep.subr.bf16.mxu1 %v6522_v25 }
 0x15d   : > { %6164 = vmatmul.mubr.msk.f32.gmra.mrb[14].mxu1 %vm919_vm1, %v2683_v1  ;;  %1823 = vperm.xlu0 %6832, %v5224_v12   ;;  %v5467_v12 = vld [vmem:[%s9119_s4 + $0x550] sm:$0xff] }
 0x15e   : > { %6166 = vmatprep.mubr.msk.f32.mxu1 %vm919_vm1, %v2684_v58  ;;  %5992 = vmatmul.mubr.msk.f32.gmra.mrb[34].mxu0 %vm919_vm1, %v756_v42  ;;  %v8284_v29 = vpop.permute.xlu1 %3053  ;;  %v9162_v42 = vld [vmem:[#allocation18_spill] sm:$0xff] }
 0x15f   : > { %v724_v63 = vpop.permute.xlu0 %723  ;;  %6525 = vmatpush3.bf16.msra.mxu1 %v6522_v25  ;;  %v2687_v25 = vmul.f32 %v7838_v62, %v9160_v51  ;;  %v2689_v23 = vmul.f32 %v7856_v48, %v9162_v42  ;;  %v5470_v51 = vld [vmem:[%s9119_s4 + $0x568] sm:$0xff] }
 0x160   : > { %v757_v17 = vmul.f32 %v724_v63, %v7920_v43  ;;  %3803 = vperm.xlu1 %6833, %v5465_v41   ;;  %6527 = vmatprep.subr.bf16.mxu1 %v8276_v7  ;;  %v9163_v41 = vld [vmem:[#allocation19_spill] sm:$0xff]  ;;  %v5468_v63 = vld [vmem:[%s9119_s4 + $0x558] sm:$0xff] }
 0x161   : > { %6167 = vmatmul.mubr.msk.f32.gmra.mrb[16].mxu1 %vm919_vm1, %v2685_v18  ;;  %1828 = vperm.xlu0 %6832, %v5225_v47   ;;  %v2690_v47 = vmul.f32 %v9163_v41, %v7890_v54  ;;  %v5228_v18 = vld [vmem:[%s9119_s4 + $0x238] sm:$0xff]  ;;  %v5471_v41 = vld [vmem:[%s9119_s4 + $0x570] sm:$0xff] }
 0x162   : > { %6169 = vmatprep.mubr.msk.f32.mxu1 %vm919_vm1, %v2686_v52  ;;  %5994 = vmatprep.mubr.msk.f32.mxu0 %vm919_vm1, %v757_v17  ;;  %v8301_v4 = vpop.permute.xlu1 %3058  ;;  %v2691_v52 = vmul.f32 %v7884_v57, %v9164_v32  ;;  %v5431_v32 = vld [vmem:[%s9120_s5 + $0x1d0] sm:$0xff] }
 0x163   : > { %v729_v8 = vpop.permute.xlu0 %728 }
 0x164   : > { %v758_v3 = vmul.f32 %v7911_v38, %v729_v8  ;;  %3808 = vperm.xlu1 %6833, %v5466_v33  }
 0x165   : > { %6170 = vmatmul.mubr.msk.f32.gmra.mrb[18].mxu1 %vm919_vm1, %v2687_v25  ;;  %1833 = vperm.xlu0 %6832, %v5226_v19   ;;  %v9165_v19 = vld [vmem:[#allocation21_spill] sm:$0xff] }
 0x166   : > { %6172 = vmatprep.mubr.msk.f32.mxu1 %vm919_vm1, %v2688_v39  ;;  %5995 = vmatmul.mubr.msk.f32.gmra.mrb[36].mxu0 %vm919_vm1, %v758_v3  ;;  %v8317_v15 = vpop.permute.xlu1 %3063  ;;  %v2692_v8 = vmul.f32 %v9165_v19, %v7920_v43  ;;  %v5469_v3 = vld [vmem:[%s9119_s4 + $0x560] sm:$0xff]  ;;  %v9166_v39 = vld [vmem:[#allocation22_spill] sm:$0xff]  ;;  %v3073_v19 = vmul.f32 %v7997_v22, %v7751_v5  ;;  %v3074_v22 = vmul.f32 %v7738_v21, %v8021_v16  ;;  %v5435_v16 = vld [vmem:[%s9120_s5 + $0x1f0] sm:$0xff] }
 0x167   : > { %v734_v1 = vpop.permute.xlu0 %733 }
 0x168   : > { %v759_v58 = vmul.f32 %v734_v1, %v7948_v40  ;;  %3813 = vperm.xlu1 %6833, %v5467_v12   ;;  %v2693_v12 = vmul.f32 %v7911_v38, %v9166_v39  ;;  %v9167_v1 = vld [vmem:[#allocation23_spill] sm:$0xff] }
 0x169   : > { %6173 = vmatmul.mubr.msk.f32.gmra.mrb[0].mxu1 %vm919_vm1, %v2689_v23  ;;  %1838 = vperm.xlu0 %6832, %v5227_v20   ;;  %v2694_v42 = vmul.f32 %v9167_v1, %v7948_v40  ;;  %v5472_v23 = vld [vmem:[%s9119_s4 + $0x578] sm:$0xff] }
 0x16a   : > { %6175 = vmatprep.mubr.msk.f32.mxu1 %vm919_vm1, %v2690_v47  ;;  %5997 = vmatprep.mubr.msk.f32.mxu0 %vm919_vm1, %v759_v58  ;;  %v8333_v11 = vpop.permute.xlu1 %3068 }
 0x16b   : > { %v739_v17 = vpop.permute.xlu0 %738 }
 0x16c   : > { %v760_v33 = vmul.f32 %v7939_v6, %v739_v17  ;;  %3818 = vperm.xlu1 %6833, %v5468_v63   ;;  %v2695_v63 = vmul.f32 %v7939_v6, %v7915_v56 }
 0x16d   : > { %6176 = vmatmul.mubr.msk.f32.gmra.mrb[2].mxu1 %vm919_vm1, %v2691_v52  ;;  %1843 = vperm.xlu0 %6832, %v5228_v18   ;;  %v3071_v18 = vmul.f32 %v7943_v26, %v7726_v30  ;;  %v5432_v52 = vld [vmem:[%s9120_s5 + $0x1d8] sm:$0xff]  ;;  %v3072_v26 = vmul.f32 %v7714_v61, %v7969_v0  ;;  %v5434_v0 = vld [vmem:[%s9120_s5 + $0x1e8] sm:$0xff] }
 0x16e   : > { %6178 = vmatprep.mubr.msk.f32.mxu1 %vm919_vm1, %v2692_v8  ;;  %5998 = vmatmul.mubr.msk.f32.gmra.mrb[38].mxu0 %vm919_vm1, %v760_v33  ;;  %v8349_v25 = vpop.permute.xlu1 %3368 }
 0x16f   : > { %v1394_v37 = vpop.permute.xlu0 %1393 }
 0x170   : > { %v1491_v20 = vmul.f32 %v1394_v37, %v7726_v30  ;;  %3828 = vperm.xlu1 %6833, %v5470_v51   ;;  %v6530_v51 = vpack.c.bf16 %v5432_v52, %v5431_v32  ;;  %v5433_v37 = vld [vmem:[%s9120_s5 + $0x1e0] sm:$0xff]  ;;  %v3078_v52 = vmul.f32 %v7791_v14, %v8112_v27  ;;  %v3080_v27 = vmul.f32 %v7819_v49, %v8145_v36 }
 0x171   : > { %6179 = vmatmul.mubr.msk.f32.gmra.mrb[4].mxu1 %vm919_vm1, %v2693_v12  ;;  %3823 = vperm.xlu0 %6832, %v5469_v3   ;;  %v9168_v3 = vld [vmem:[#allocation5_spill] sm:$0xff]  ;;  %v3075_v12 = vmul.f32 %v8049_v2, %v7778_v53  ;;  %v6534_v1 = vpack.c.bf16 %v5434_v0, %v5433_v37  ;;  %v3082_v36 = vmul.f32 %v7838_v62, %v8177_v10 }
 0x172   : > { %6181 = vmatprep.mubr.msk.f32.mxu1 %vm919_vm1, %v2694_v42  ;;  %6016 = vmatprep.mubr.msk.f32.mxu0 %vm919_vm1, %v1491_v20  ;;  %v8365_v58 = vpop.permute.xlu1 %3373  ;;  %v9169_v42 = vld [vmem:[#allocation6_spill] sm:$0xff]  ;;  %v5477_v32 = vld [vmem:[%s9120_s5 + $0x200] sm:$0xff]  ;;  %v3085_v10 = vmul.f32 %v8244_v46, %v7890_v54  ;;  %v3088_v46 = vmul.f32 %v7911_v38, %v8301_v4  ;;  %v3466_v4 = vmul.f32 %v8349_v25, %v7726_v30 }
 0x173   : > { %v1399_v47 = vpop.permute.xlu0 %1398 }
 0x174   : > { %v1492_v17 = vmul.f32 %v7714_v61, %v1399_v47  ;;  %3838 = vperm.xlu1 %6833, %v5472_v23   ;;  %v3076_v23 = vmul.f32 %v7765_v45, %v8071_v24  ;;  %v3077_v47 = vmul.f32 %v8095_v28, %v7804_v13  ;;  %v5478_v24 = vld [vmem:[%s9120_s5 + $0x208] sm:$0xff] }
 0x175   : > { %6182 = vmatmul.mubr.msk.f32.gmra.mrb[6].mxu1 %vm919_vm1, %v2695_v63  ;;  %3833 = vperm.xlu0 %6832, %v5471_v41  }
 0x176   : > { %6200 = vmatprep.mubr.msk.f32.mxu1 %vm919_vm1, %v3071_v18  ;;  %6017 = vmatmul.mubr.msk.f32.vlgmr.msra.gmra.mrb[20].mxu0 %vm919_vm1, %v1492_v17  ;;  %v8384_v56 = vpop.permute.xlu1 %3378  ;;  %v9170_v17 = vld [vmem:[#allocation7_spill] sm:$0xff] }
 0x177   : > { %v1404_v33 = vpop.permute.xlu0 %1403  ;;  %6465 = vmatpush3.bf16.msra.mxu0 %v7388_v35 }
 0x178   : > { %v1493_v8 = vmul.f32 %v1404_v33, %v7751_v5  ;;  %6467 = vmatprep.subr.bf16.mxu0 %v9168_v3  ;;  %v3079_v33 = vmul.f32 %v8128_v31, %v7824_v50  ;;  %v3081_v31 = vmul.f32 %v8161_v59, %v7843_v60 }
 0x179   : > { %6201 = vmatmul.mubr.msk.f32.vlgmr.msra.gmra.mrb[8].mxu1 %vm919_vm1, %v3072_v26 }
 0x17a   : > { %6203 = vmatprep.mubr.msk.f32.mxu1 %vm919_vm1, %v3073_v19  ;;  %6019 = vmatprep.mubr.msk.f32.mxu0 %vm919_vm1, %v1493_v8  ;;  %v8402_v35 = vpop.permute.xlu1 %3383  ;;  %v8447_v8 = vpack.c.bf16 %v5478_v24, %v5477_v32  ;;  %v5480_v32 = vld [vmem:[%s9120_s5 + $0x218] sm:$0xff] }
 0x17b   : > { %v1409_v39 = vpop.permute.xlu0 %1408  ;;  %6529 = vmatpush3.bf16.msra.mxu1 %v8276_v7  ;;  %6469 = vmatpush3.bf16.msra.mxu0 %v9168_v3  ;;  %v5436_v7 = vld [vmem:[%s9120_s5 + $0x1f8] sm:$0xff] }
 0x17c   : > { %v1494_v20 = vmul.f32 %v7738_v21, %v1409_v39  ;;  %6531 = vmatprep.subr.bf16.mxu1 %v6530_v51  ;;  %6471 = vmatprep.subr.bf16.mxu0 %v9169_v42  ;;  %v6538_v18 = vpack.c.bf16 %v5436_v7, %v5435_v16  ;;  %v3083_v39 = vmul.f32 %v8199_v55, %v7861_v34 }
 0x17d   : > { %6204 = vmatmul.mubr.msk.f32.gmra.mrb[10].mxu1 %vm919_vm1, %v3074_v22  ;;  %v3086_v16 = vmul.f32 %v7884_v57, %v8266_v44  ;;  %v3089_v44 = vmul.f32 %v8317_v15, %v7948_v40  ;;  %v5479_v15 = vld [vmem:[%s9120_s5 + $0x210] sm:$0xff] }
 0x17e   : > { %6206 = vmatprep.mubr.msk.f32.mxu1 %vm919_vm1, %v3075_v12  ;;  %6020 = vmatmul.mubr.msk.f32.gmra.mrb[22].mxu0 %vm919_vm1, %v1494_v20  ;;  %v8421_v2 = vpop.permute.xlu1 %3388  ;;  %v3084_v20 = vmul.f32 %v7856_v48, %v8221_v9  ;;  %v3087_v9 = vmul.f32 %v8284_v29, %v7920_v43  ;;  %v3090_v29 = vmul.f32 %v7939_v6, %v8333_v11 }
 0x17f   : > { %v1414_v41 = vpop.permute.xlu0 %1413  ;;  %6533 = vmatpush3.bf16.msra.mxu1 %v6530_v51  ;;  %6473 = vmatpush3.bf16.msra.mxu0 %v9169_v42  ;;  %v3467_v11 = vmul.f32 %v7714_v61, %v8365_v58  ;;  %v3469_v58 = vmul.f32 %v7738_v21, %v8402_v35 }
 0x180   : > { %v1495_v63 = vmul.f32 %v1414_v41, %v7778_v53  ;;  %6535 = vmatprep.subr.bf16.mxu1 %v6534_v1  ;;  %6475 = vmatprep.subr.bf16.mxu0 %v9170_v17 }
 0x181   : > { %6207 = vmatmul.mubr.msk.f32.gmra.mrb[12].mxu1 %vm919_vm1, %v3076_v23 }
 0x182   : > { %6209 = vmatprep.mubr.msk.f32.mxu1 %vm919_vm1, %v3077_v47  ;;  %6022 = vmatprep.mubr.msk.f32.mxu0 %vm919_vm1, %v1495_v63  ;;  %v8439_v28 = vpop.permute.xlu1 %3393 }
 0x183   : > { %v1419_v26 = vpop.permute.xlu0 %1418  ;;  %6537 = vmatpush3.bf16.msra.mxu1 %v6534_v1  ;;  %6477 = vmatpush3.bf16.msra.mxu0 %v9170_v17  ;;  %v3471_v35 = vmul.f32 %v7765_v45, %v8439_v28 }
 0x184   : > { %v1496_v19 = vmul.f32 %v7765_v45, %v1419_v26  ;;  %6539 = vmatprep.subr.bf16.mxu1 %v6538_v18  ;;  %v3468_v26 = vmul.f32 %v8384_v56, %v7751_v5 }
 0x185   : > { %6210 = vmatmul.mubr.msk.f32.gmra.mrb[14].mxu1 %vm919_vm1, %v3078_v52  ;;  %v6546_v52 = vpack.c.bf16 %v5480_v32, %v5479_v15 }
 0x186   : > { %6212 = vmatprep.mubr.msk.f32.mxu1 %vm919_vm1, %v3079_v33  ;;  %6023 = vmatmul.mubr.msk.f32.gmra.mrb[24].mxu0 %vm919_vm1, %v1496_v19  ;;  %v8452_v51 = vpop.permute.xlu1 %3398  ;;  %v5481_v19 = vld [vmem:[%s9120_s5 + $0x220] sm:$0xff] }
 0x187   : > { %v1424_v3 = vpop.permute.xlu0 %1423  ;;  %6541 = vmatpush3.bf16.msra.mxu1 %v6538_v18 }
 0x188   : > { %v1497_v37 = vmul.f32 %v1424_v3, %v7804_v13  ;;  %6543 = vmatprep.subr.bf16.mxu1 %v8447_v8 }
 0x189   : > { %6213 = vmatmul.mubr.msk.f32.gmra.mrb[16].mxu1 %vm919_vm1, %v3080_v27  ;;  %v5482_v27 = vld [vmem:[%s9120_s5 + $0x228] sm:$0xff] }
 0x18a   : > { %6215 = vmatprep.mubr.msk.f32.mxu1 %vm919_vm1, %v3081_v31  ;;  %6025 = vmatprep.mubr.msk.f32.mxu0 %vm919_vm1, %v1497_v37  ;;  %v8463_v0 = vpop.permute.xlu1 %3403  ;;  %v6550_v31 = vpack.c.bf16 %v5482_v27, %v5481_v19  ;;  %v3470_v37 = vmul.f32 %v8421_v2, %v7778_v53 }
 0x18b   : > { %v1429_v22 = vpop.permute.xlu0 %1428 }
 0x18c   : > { %v1498_v59 = vmul.f32 %v7791_v14, %v1429_v22  ;;  %v5483_v22 = vld [vmem:[%s9120_s5 + $0x230] sm:$0xff] }
 0x18d   : > { %6216 = vmatmul.mubr.msk.f32.gmra.mrb[18].mxu1 %vm919_vm1, %v3082_v36 }
 0x18e   : > { %6218 = vmatprep.mubr.msk.f32.mxu1 %vm919_vm1, %v3083_v39  ;;  %6026 = vmatmul.mubr.msk.f32.gmra.mrb[26].mxu0 %vm919_vm1, %v1498_v59  ;;  %v8473_v12 = vpop.permute.xlu1 %3408 }
 0x18f   : > { %v1434_v1 = vpop.permute.xlu0 %1433 }
 0x190   : > { %v1499_v42 = vmul.f32 %v1434_v1, %v7824_v50 }
 0x191   : > { %6219 = vmatmul.mubr.msk.f32.gmra.mrb[0].mxu1 %vm919_vm1, %v3084_v20  ;;  %v3472_v20 = vmul.f32 %v8452_v51, %v7804_v13 }
 0x192   : > { %6221 = vmatprep.mubr.msk.f32.mxu1 %vm919_vm1, %v3085_v10  ;;  %6028 = vmatprep.mubr.msk.f32.mxu0 %vm919_vm1, %v1499_v42  ;;  %v8483_v55 = vpop.permute.xlu1 %3413  ;;  %v3473_v42 = vmul.f32 %v7791_v14, %v8463_v0 }
 0x193   : > { %v1439_v7 = vpop.permute.xlu0 %1438 }
 0x194   : > { %v1500_v23 = vmul.f32 %v7819_v49, %v1439_v7 }
 0x195   : > { %6222 = vmatmul.mubr.msk.f32.gmra.mrb[2].mxu1 %vm919_vm1, %v3086_v16  ;;  %v3474_v16 = vmul.f32 %v8473_v12, %v7824_v50 }
 0x196   : > { %6224 = vmatprep.mubr.msk.f32.mxu1 %vm919_vm1, %v3087_v9  ;;  %6029 = vmatmul.mubr.msk.f32.gmra.mrb[28].mxu0 %vm919_vm1, %v1500_v23  ;;  %v3475_v9 = vmul.f32 %v7819_v49, %v8483_v55 }
 0x197   : > { %v8495_v41 = vpop.permute.xlu1 %3418  ;;  %v1444_v47 = vpop.permute.xlu0 %1443 }
 0x198   : > { %v1501_v63 = vmul.f32 %v1444_v47, %v7843_v60  ;;  %v3476_v23 = vmul.f32 %v8495_v41, %v7843_v60 }
 0x199   : > { %6225 = vmatmul.mubr.msk.f32.gmra.mrb[4].mxu1 %vm919_vm1, %v3088_v46 }
 0x19a   : > { %6227 = vmatprep.mubr.msk.f32.mxu1 %vm919_vm1, %v3089_v44  ;;  %6031 = vmatprep.mubr.msk.f32.mxu0 %vm919_vm1, %v1501_v63 }
 0x19b   : > { %v3424_v18 = vpop.permute.xlu1 %3423 }
 0x19c   : > { %v1449_v17 = vpop.permute.xlu0 %1448  ;;  %v3477_v47 = vmul.f32 %v7838_v62, %v3424_v18 }
 0x19d   : > { %v1502_v24 = vmul.f32 %v7838_v62, %v1449_v17  ;;  %6228 = vmatmul.mubr.msk.f32.gmra.mrb[6].mxu1 %vm919_vm1, %v3090_v29 }
 0x19e   : > { %6246 = vmatprep.mubr.msk.f32.mxu1 %vm919_vm1, %v3466_v4 }
 0x19f   : > { %6032 = vmatmul.mubr.msk.f32.gmra.mrb[30].mxu0 %vm919_vm1, %v1502_v24  ;;  %v3429_v25 = vpop.permute.xlu1 %3428 }
 0x1a0   : > { %v1454_v33 = vpop.permute.xlu0 %1453  ;;  %v3478_v55 = vmul.f32 %v3429_v25, %v7861_v34 }
 0x1a1   : > { %v1503_v3 = vmul.f32 %v1454_v33, %v7861_v34  ;;  %6247 = vmatmul.mubr.msk.f32.vlgmr.msra.gmra.mrb[8].mxu1 %vm919_vm1, %v3467_v11 }
 0x1a2   : > { %6249 = vmatprep.mubr.msk.f32.mxu1 %vm919_vm1, %v3468_v26  ;;  %6545 = vmatpush3.bf16.msra.mxu1 %v8447_v8  ;;  %v5484_v8 = vld [vmem:[%s9120_s5 + $0x238] sm:$0xff] }
 0x1a3   : > { %6034 = vmatprep.mubr.msk.f32.mxu0 %vm919_vm1, %v1503_v3  ;;  %v3434_v56 = vpop.permute.xlu1 %3433  ;;  %6547 = vmatprep.subr.bf16.mxu1 %v6546_v52  ;;  %v6554_v59 = vpack.c.bf16 %v5484_v8, %v5483_v22 }
 0x1a4   : > { %v1459_v36 = vpop.permute.xlu0 %1458  ;;  %v3479_v41 = vmul.f32 %v7856_v48, %v3434_v56 }
 0x1a5   : > { %v1504_v39 = vmul.f32 %v7856_v48, %v1459_v36  ;;  %6250 = vmatmul.mubr.msk.f32.gmra.mrb[10].mxu1 %vm919_vm1, %v3469_v58 }
 0x1a6   : > { %6252 = vmatprep.mubr.msk.f32.mxu1 %vm919_vm1, %v3470_v37  ;;  %6549 = vmatpush3.bf16.msra.mxu1 %v6546_v52 }
 0x1a7   : > { %6035 = vmatmul.mubr.msk.f32.gmra.mrb[32].mxu0 %vm919_vm1, %v1504_v39  ;;  %v3439_v2 = vpop.permute.xlu1 %3438  ;;  %6551 = vmatprep.subr.bf16.mxu1 %v6550_v31 }
 0x1a8   : > { %v1464_v1 = vpop.permute.xlu0 %1463  ;;  %v3480_v17 = vmul.f32 %v3439_v2, %v7890_v54 }
 0x1a9   : > { %v1505_v10 = vmul.f32 %v1464_v1, %v7890_v54  ;;  %6253 = vmatmul.mubr.msk.f32.gmra.mrb[12].mxu1 %vm919_vm1, %v3471_v35 }
 0x1aa   : > { %6255 = vmatprep.mubr.msk.f32.mxu1 %vm919_vm1, %v3472_v20  ;;  %6553 = vmatpush3.bf16.msra.mxu1 %v6550_v31 }
 0x1ab   : > { %6037 = vmatprep.mubr.msk.f32.mxu0 %vm919_vm1, %v1505_v10  ;;  %v3444_v28 = vpop.permute.xlu1 %3443  ;;  %6555 = vmatprep.subr.bf16.mxu1 %v6554_v59 }
 0x1ac   : > { %v1469_v7 = vpop.permute.xlu0 %1468  ;;  %v3481_v32 = vmul.f32 %v7884_v57, %v3444_v28 }
 0x1ad   : > { %v1506_v51 = vmul.f32 %v7884_v57, %v1469_v7  ;;  %6256 = vmatmul.mubr.msk.f32.gmra.mrb[14].mxu1 %vm919_vm1, %v3473_v42 }
 0x1ae   : > { %6258 = vmatprep.mubr.msk.f32.mxu1 %vm919_vm1, %v3474_v16  ;;  %6557 = vmatpush3.bf16.msra.mxu1 %v6554_v59 }
 0x1af   : > { %6038 = vmatmul.mubr.msk.f32.gmra.mrb[34].mxu0 %vm919_vm1, %v1506_v51  ;;  %v3449_v0 = vpop.permute.xlu1 %3448 }
 0x1b0   : > { %v1474_v46 = vpop.permute.xlu0 %1473  ;;  %v3482_v11 = vmul.f32 %v3449_v0, %v7920_v43 }
 0x1b1   : > { %v1507_v12 = vmul.f32 %v1474_v46, %v7920_v43  ;;  %6259 = vmatmul.mubr.msk.f32.gmra.mrb[16].mxu1 %vm919_vm1, %v3475_v9 }
 0x1b2   : > { %6261 = vmatprep.mubr.msk.f32.mxu1 %vm919_vm1, %v3476_v23 }
 0x1b3   : > { %6040 = vmatprep.mubr.msk.f32.mxu0 %vm919_vm1, %v1507_v12  ;;  %v3454_v44 = vpop.permute.xlu1 %3453 }
 0x1b4   : > { %v1479_v63 = vpop.permute.xlu0 %1478  ;;  %v3483_v26 = vmul.f32 %v7911_v38, %v3454_v44 }
 0x1b5   : > { %v1508_v29 = vmul.f32 %v7911_v38, %v1479_v63  ;;  %6262 = vmatmul.mubr.msk.f32.gmra.mrb[18].mxu1 %vm919_vm1, %v3477_v47 }
 0x1b6   : > { %6264 = vmatprep.mubr.msk.f32.mxu1 %vm919_vm1, %v3478_v55 }
 0x1b7   : > { %6041 = vmatmul.mubr.msk.f32.gmra.mrb[36].mxu0 %vm919_vm1, %v1508_v29  ;;  %v3459_v4 = vpop.permute.xlu1 %3458 }
 0x1b8   : > { %v1484_v18 = vpop.permute.xlu0 %1483  ;;  %v3484_v19 = vmul.f32 %v3459_v4, %v7948_v40 }
 0x1b9   : > { %v1509_v15 = vmul.f32 %v1484_v18, %v7948_v40  ;;  %6265 = vmatmul.mubr.msk.f32.gmra.mrb[0].mxu1 %vm919_vm1, %v3479_v41 }
 0x1ba   : > { %6267 = vmatprep.mubr.msk.f32.mxu1 %vm919_vm1, %v3480_v17 }
 0x1bb   : > { %6043 = vmatprep.mubr.msk.f32.mxu0 %vm919_vm1, %v1509_v15  ;;  %v3464_v24 = vpop.permute.xlu1 %3463 }
 0x1bc   : > { %v1489_v25 = vpop.permute.xlu0 %1488  ;;  %v3485_v58 = vmul.f32 %v7939_v6, %v3464_v24 }
 0x1bd   : > { %v1510_v52 = vmul.f32 %v7939_v6, %v1489_v25  ;;  %6268 = vmatmul.mubr.msk.f32.gmra.mrb[2].mxu1 %vm919_vm1, %v3481_v32 }
 0x1be   : > { %6270 = vmatprep.mubr.msk.f32.mxu1 %vm919_vm1, %v3482_v11 }
 0x1bf   : > { %6044 = vmatmul.mubr.msk.f32.gmra.mrb[38].mxu0 %vm919_vm1, %v1510_v52  ;;  %v3764_v33 = vpop.permute.xlu1 %3763 }
 0x1c0   : > { %v1789_v27 = vpop.permute.xlu0 %1788  ;;  %v3861_v31 = vmul.f32 %v3764_v33, %v7726_v30 }
 0x1c1   : > { %v1886_v3 = vmul.f32 %v1789_v27, %v7726_v30  ;;  %6271 = vmatmul.mubr.msk.f32.gmra.mrb[4].mxu1 %vm919_vm1, %v3483_v26 }
 0x1c2   : > { %6273 = vmatprep.mubr.msk.f32.mxu1 %vm919_vm1, %v3484_v19 }
 0x1c3   : > { %6062 = vmatprep.mubr.msk.f32.mxu0 %vm919_vm1, %v1886_v3  ;;  %v3769_v56 = vpop.permute.xlu1 %3768 }
 0x1c4   : > { %v1794_v37 = vpop.permute.xlu0 %1793  ;;  %v3862_v36 = vmul.f32 %v7714_v61, %v3769_v56 }
 0x1c5   : > { %v1887_v22 = vmul.f32 %v7714_v61, %v1794_v37  ;;  %6274 = vmatmul.mubr.msk.f32.gmra.mrb[6].mxu1 %vm919_vm1, %v3485_v58 }
 0x1c6   : > { %6292 = vmatprep.mubr.msk.f32.mxu1 %vm919_vm1, %v3861_v31 }
 0x1c7   : > { %6063 = vmatmul.mubr.msk.f32.vlgmr.msra.gmra.mrb[20].mxu0 %vm919_vm1, %v1887_v22  ;;  %v3774_v8 = vpop.permute.xlu1 %3773 }
 0x1c8   : > { %v3863_v39 = vmul.f32 %v3774_v8, %v7751_v5  ;;  %v1799_v35 = vpop.permute.xlu0 %1798 }
 0x1c9   : > { %v1888_v2 = vmul.f32 %v1799_v35, %v7751_v5  ;;  %6293 = vmatmul.mubr.msk.f32.vlgmr.msra.gmra.mrb[8].mxu1 %vm919_vm1, %v3862_v36 }
 0x1ca   : > { %6295 = vmatprep.mubr.msk.f32.mxu1 %vm919_vm1, %v3863_v39 }
 0x1cb   : > { %6065 = vmatprep.mubr.msk.f32.mxu0 %vm919_vm1, %v1888_v2  ;;  %v3779_v30 = vpop.permute.xlu1 %3778 }
 0x1cc   : > { %v3864_v61 = vmul.f32 %v7738_v21, %v3779_v30  ;;  %v1804_v59 = vpop.permute.xlu0 %1803 }
 0x1cd   : > { %v1889_v20 = vmul.f32 %v7738_v21, %v1804_v59 }
 0x1ce   : > { %6296 = vmatmul.mubr.msk.f32.gmra.mrb[10].mxu1 %vm919_vm1, %v3864_v61 }
 0x1cf   : > { %6066 = vmatmul.mubr.msk.f32.gmra.mrb[22].mxu0 %vm919_vm1, %v1889_v20  ;;  %v3784_v1 = vpop.permute.xlu1 %3783 }
 0x1d0   : > { %v3865_v10 = vmul.f32 %v3784_v1, %v7778_v53  ;;  %v1809_v5 = vpop.permute.xlu0 %1808 }
 0x1d1   : > { %v1890_v42 = vmul.f32 %v1809_v5, %v7778_v53 }
 0x1d2   : > { %6298 = vmatprep.mubr.msk.f32.mxu1 %vm919_vm1, %v3865_v10 }
 0x1d3   : > { %6068 = vmatprep.mubr.msk.f32.mxu0 %vm919_vm1, %v1890_v42  ;;  %v3789_v28 = vpop.permute.xlu1 %3788 }
 0x1d4   : > { %v3866_v16 = vmul.f32 %v7765_v45, %v3789_v28  ;;  %v1814_v7 = vpop.permute.xlu0 %1813 }
 0x1d5   : > { %v1891_v21 = vmul.f32 %v7765_v45, %v1814_v7 }
 0x1d6   : > { %6299 = vmatmul.mubr.msk.f32.gmra.mrb[12].mxu1 %vm919_vm1, %v3866_v16 }
 0x1d7   : > { %6069 = vmatmul.mubr.msk.f32.gmra.mrb[24].mxu0 %vm919_vm1, %v1891_v21  ;;  %v3794_v51 = vpop.permute.xlu1 %3793 }
 0x1d8   : > { %v3867_v9 = vmul.f32 %v3794_v51, %v7804_v13  ;;  %v1819_v0 = vpop.permute.xlu0 %1818 }
 0x1d9   : > { %v1892_v53 = vmul.f32 %v1819_v0, %v7804_v13 }
 0x1da   : > { %6301 = vmatprep.mubr.msk.f32.mxu1 %vm919_vm1, %v3867_v9 }
 0x1db   : > { %6071 = vmatprep.mubr.msk.f32.mxu0 %vm919_vm1, %v1892_v53  ;;  %v3799_v23 = vpop.permute.xlu1 %3798 }
 0x1dc   : > { %v3868_v46 = vmul.f32 %v7791_v14, %v3799_v23  ;;  %v1824_v12 = vpop.permute.xlu0 %1823 }
 0x1dd   : > { %v1893_v45 = vmul.f32 %v7791_v14, %v1824_v12 }
 0x1de   : > { %6302 = vmatmul.mubr.msk.f32.gmra.mrb[14].mxu1 %vm919_vm1, %v3868_v46 }
 0x1df   : > { %6072 = vmatmul.mubr.msk.f32.gmra.mrb[26].mxu0 %vm919_vm1, %v1893_v45  ;;  %v3804_v47 = vpop.permute.xlu1 %3803 }
 0x1e0   : > { %v3869_v44 = vmul.f32 %v3804_v47, %v7824_v50  ;;  %v1829_v55 = vpop.permute.xlu0 %1828 }
 0x1e1   : > { %v1894_v13 = vmul.f32 %v1829_v55, %v7824_v50 }
 0x1e2   : > { %6304 = vmatprep.mubr.msk.f32.mxu1 %vm919_vm1, %v3869_v44  ;;  %v4136_v44 = vld [vmem:[%s365_s24 + $0x8] sm:$0xff] }
 0x1e3   : > { %6074 = vmatprep.mubr.msk.f32.mxu0 %vm919_vm1, %v1894_v13  ;;  %v3809_v63 = vpop.permute.xlu1 %3808  ;;  %v4135_v13 = vld [vmem:[%s365_s24] sm:$0xff] }
 0x1e4   : > { %v3870_v29 = vmul.f32 %v7819_v49, %v3809_v63  ;;  %v1834_v41 = vpop.permute.xlu0 %1833 }
 0x1e5   : > { %v1895_v14 = vmul.f32 %v7819_v49, %v1834_v41 }
 0x1e6   : > { %6305 = vmatmul.mubr.msk.f32.gmra.mrb[16].mxu1 %vm919_vm1, %v3870_v29 }
 0x1e7   : > { %6075 = vmatmul.mubr.msk.f32.gmra.mrb[28].mxu0 %vm919_vm1, %v1895_v14  ;;  %v3814_v4 = vpop.permute.xlu1 %3813 }
 0x1e8   : > { %v3871_v17 = vmul.f32 %v3814_v4, %v7843_v60  ;;  %v1839_v18 = vpop.permute.xlu0 %1838 }
 0x1e9   : > { %v1896_v50 = vmul.f32 %v1839_v18, %v7843_v60 }
 0x1ea   : > { %6307 = vmatprep.mubr.msk.f32.mxu1 %vm919_vm1, %v3871_v17 }
 0x1eb   : > { %6077 = vmatprep.mubr.msk.f32.mxu0 %vm919_vm1, %v1896_v50  ;;  %v3819_v15 = vpop.permute.xlu1 %3818 }
 0x1ec   : > { %v3872_v32 = vmul.f32 %v7838_v62, %v3819_v15  ;;  %v1844_v24 = vpop.permute.xlu0 %1843 }
 0x1ed   : > { %v1897_v49 = vmul.f32 %v7838_v62, %v1844_v24 }
 0x1ee   : > { %6308 = vmatmul.mubr.msk.f32.gmra.mrb[18].mxu1 %vm919_vm1, %v3872_v32 }
 0x1ef   : > { %6078 = vmatmul.mubr.msk.f32.gmra.mrb[30].mxu0 %vm919_vm1, %v1897_v49  ;;  %v3829_v11 = vpop.permute.xlu1 %3828 }
 0x1f0   : > { %v3874_v25 = vmul.f32 %v7856_v48, %v3829_v11  ;;  %v3824_v52 = vpop.permute.xlu0 %3823  ;;  %v4138_v11 = vld [vmem:[%s365_s24 + $0x18] sm:$0xff] }
 0x1f1   : > { %v3873_v60 = vmul.f32 %v3824_v52, %v7861_v34 }
 0x1f3   : > { %6310 = vmatprep.mubr.msk.f32.mxu1 %vm919_vm1, %v3873_v60  ;;  %v3839_v26 = vpop.permute.xlu1 %3838 }
 0x1f4   : > { %v3876_v33 = vmul.f32 %v7884_v57, %v3839_v26  ;;  %v3834_v19 = vpop.permute.xlu0 %3833  ;;  %6311 = vmatmul.mubr.msk.f32.gmra.mrb[0].mxu1 %vm919_vm1, %v3874_v25  ;;  %v4137_v25 = vld [vmem:[%s365_s24 + $0x10] sm:$0xff]  ;;  %s353_s24 = sand.u32 1, %s6984_s10  }
 0x1f5   : > { %v3875_v62 = vmul.f32 %v3834_v19, %v7890_v54  ;;  %s5074_s26 = sshll.u32 %s353_s24, 6  ;;  %s9074_s13 = scalar_lea.sflag [#allocation3], %s353_s24 }
 0x1f7   : > { %6313 = vmatprep.mubr.msk.f32.mxu1 %vm919_vm1, %v3875_v62 }
 0x1f8   : > { %6314 = vmatmul.mubr.msk.f32.gmra.mrb[2].mxu1 %vm919_vm1, %v3876_v33 }
 0x27a   : > { %v6036_v27 = vpop.f32.mrb[32].mxu0 }
 0x27b   : > { %v8650_v3 = vpop.f32.mrb[33].mxu0 }
 0x282   : > { %v8652_v48 = vpop.f32.mrb[34].mxu0 }
 0x283   : > { %v8654_v34 = vpop.f32.mrb[35].mxu0 }
 0x28a   : > { %v8656_v58 = vpop.f32.mrb[36].mxu0 }
 0x28b   : > { %v8658_v56 = vpop.f32.mrb[37].mxu0 }
 0x292   : > { %v8660_v57 = vpop.f32.mrb[38].mxu0 }
 0x293   : > { %v8662_v31 = vpop.f32.mrb[39].mxu0 }
 0x29a   : > { %v6064_v54 = vpop.f32.mrb[20].mxu0 }
 0x29b   : > { %v2041_v37 = vpop.f32.mrb[21].mxu0 }
 0x29c   : > { %v6294_v36 = vpop.f32.mrb[8].mxu1 }
 0x29d   : > { %v8664_v22 = vadd.f32 %v6294_v36, %v6064_v54  ;;  %v4016_v8 = vpop.f32.mrb[9].mxu1  ;;  %v4140_v54 = vld [vmem:[%s370_s28 + $0x8] sm:$0xff]  ;;  %v4139_v36 = vld [vmem:[%s370_s28] sm:$0xff] }
 0x29e   : > { %v8666_v39 = vadd.f32 %v4016_v8, %v2041_v37 }
 0x2a1   : > { %v6297_v35 = vpop.f32.mrb[10].mxu1 }
 0x2a2   : > { %v6067_v2 = vpop.f32.mrb[22].mxu0  ;;  %v4026_v30 = vpop.f32.mrb[11].mxu1 }
 0x2a3   : > { %v8668_v61 = vadd.f32 %v6297_v35, %v6067_v2  ;;  %v2051_v59 = vpop.f32.mrb[23].mxu0 }
 0x2a4   : > { %v8670_v20 = vadd.f32 %v4026_v30, %v2051_v59 }
 0x2a9   : > { %v6300_v1 = vpop.f32.mrb[12].mxu1 }
 0x2aa   : > { %v6070_v10 = vpop.f32.mrb[24].mxu0  ;;  %v4036_v5 = vpop.f32.mrb[13].mxu1 }
 0x2ab   : > { %v8672_v42 = vadd.f32 %v6300_v1, %v6070_v10  ;;  %v2061_v28 = vpop.f32.mrb[25].mxu0  ;;  %v4142_v10 = vld [vmem:[%s370_s28 + $0x18] sm:$0xff] }
 0x2ac   : > { %v8674_v16 = vadd.f32 %v4036_v5, %v2061_v28  ;;  %v4141_v28 = vld [vmem:[%s370_s28 + $0x10] sm:$0xff]  ;;  %s355_s28 = scalar_lea.vmem [#allocation2], %s5074_s26 }
 0x2ad   : > { %s4984_s17 = sshll.u32 %s355_s28, 4  ;;  %s9068_s17 = int_to_ptr.vmem [resolvable:$true] %s4984_s17 }
 0x2ae   : > { %s6930_s16 = scalar_lea.vmem %s9068_s17, 1024  ;;  %p6937_p0 = scmp.lt.s32.totalorder %s9068_s17, %s6935_s22 }
 0x2af   : > { %p6931_p11 = scmp.ne.s32.totalorder %s9068_s17, %s6930_s16  ;;  %p6938_p1 = scmp.lt.s32.totalorder %s6936_s23, %s6930_s16 }
 0x2b1   : > { %v6303_v7 = vpop.f32.mrb[14].mxu1  ;;  %p6932_p12 = pnand %p6931_p11, %p7086_p5  ;;  %p6939_p2 = por %p6938_p1, %p6937_p0 }
 0x2b2   : > { %v6073_v21 = vpop.f32.mrb[26].mxu0  ;;  %v4046_v51 = vpop.f32.mrb[15].mxu1 }
 0x2b3   : > { %v8676_v9 = vadd.f32 %v6303_v7, %v6073_v21  ;;  %v2071_v0 = vpop.f32.mrb[27].mxu0  ;;  %p6933_p13 = pneg %p6932_p12 }
 0x2b4   : > { %v8678_v53 = vadd.f32 %v4046_v51, %v2071_v0  ;;  %v8722_v0 = vadd.f32 %v8666_v39, %v4135_v13  ;;  %v8736_v39 = vadd.f32 %v8670_v20, %v4137_v25 }
 0x2b5   : > { %p6940_p3 = pnand %p6939_p2, %p6933_p13 }
 0x2b9   : > { %v6306_v23 = vpop.f32.mrb[16].mxu1 }
 0x2ba   : > { %v6076_v46 = vpop.f32.mrb[28].mxu0  ;;  %v4056_v12 = vpop.f32.mrb[17].mxu1 }
 0x2bb   : > { %v6638_v45 = vadd.f32 %v6306_v23, %v6076_v46  ;;  %v2081_v47 = vpop.f32.mrb[29].mxu0  ;;  %v8730_v46 = vadd.f32 %v8664_v22, %v4136_v44 }
 0x2bc   : > { %v6639_v55 = vadd.f32 %v4056_v12, %v2081_v47 }
 0x2bd   : > { %v8684_v63 = vadd.f32 %v6638_v45, %v4136_v44  ;;  %v4160_v44 = vmul.f32 %v8730_v46, %v8730_v46 }
 0x2be   : > { %v8686_v29 = vadd.f32 %v6639_v55, %v4135_v13  ;;  %v4159_v55 = vmul.f32 %v8722_v0, %v8722_v0  ;;  %v8742_v13 = vadd.f32 %v8668_v61, %v4138_v11 }
 0x2bf   : > { %v4272_v41 = vmul.f32 %v8684_v63, %v8684_v63  ;;  %v4166_v61 = vsel %vm919_vm1, %v4160_v44, 0.0 }
 0x2c0   : > { %v4271_v14 = vmul.f32 %v8686_v29, %v8686_v29  ;;  %v4163_v20 = vsel %vm919_vm1, %v4159_v55, 0.0 }
 0x2c1   : > { %v6309_v4 = vpop.f32.mrb[18].mxu1  ;;  %v4278_v17 = vsel %vm919_vm1, %v4272_v41, 0.0  ;;  %v8748_v41 = vadd.f32 %v8674_v16, %v4139_v36 }
 0x2c2   : > { %4279 = vadd.xlane.f32.xlu1 %v4278_v17  ;;  %v6079_v18 = vpop.f32.mrb[30].mxu0  ;;  %v4066_v50 = vpop.f32.mrb[19].mxu1  ;;  %v4275_v15 = vsel %vm919_vm1, %v4271_v14, 0.0  ;;  %v4161_v14 = vmul.f32 %v8736_v39, %v8736_v39  ;;  %v4162_v17 = vmul.f32 %v8742_v13, %v8742_v13 }
 0x2c3   : > { %v6640_v32 = vadd.f32 %v6309_v4, %v6079_v18  ;;  %4276 = vadd.xlane.f32.xlu0 %v4275_v15  ;;  %v2091_v24 = vpop.f32.mrb[31].mxu0  ;;  %v8754_v4 = vadd.f32 %v8672_v42, %v4140_v54  ;;  %v8760_v18 = vadd.f32 %v8678_v53, %v4141_v28  ;;  %v8766_v15 = vadd.f32 %v8676_v9, %v4142_v10 }
 0x2c4   : > { %v6641_v49 = vadd.f32 %v4066_v50, %v2091_v24  ;;  %v4169_v16 = vsel %vm919_vm1, %v4161_v14, 0.0  ;;  %v4215_v50 = vmul.f32 %v8748_v41, %v8748_v41  ;;  %v4172_v42 = vsel %vm919_vm1, %v4162_v17, 0.0 }
 0x2c5   : > { %v8698_v52 = vadd.f32 %v6640_v32, %v4138_v11  ;;  %v4216_v32 = vmul.f32 %v8754_v4, %v8754_v4  ;;  %v4217_v53 = vmul.f32 %v8760_v18, %v8760_v18  ;;  %v4218_v11 = vmul.f32 %v8766_v15, %v8766_v15 }
 0x2c6   : > { %v8700_v60 = vadd.f32 %v6641_v49, %v4137_v25  ;;  %v4219_v24 = vsel %vm919_vm1, %v4215_v50, 0.0 }
 0x2c7   : > { %v6312_v26 = vpop.f32.mrb[0].mxu1  ;;  %v4274_v2 = vmul.f32 %v8698_v52, %v8698_v52  ;;  %v4222_v49 = vsel %vm919_vm1, %v4216_v32, 0.0  ;;  %v4225_v9 = vsel %vm919_vm1, %v4217_v53, 0.0  ;;  %v4228_v25 = vsel %vm919_vm1, %v4218_v11, 0.0 }
 0x2c8   : > { %v6642_v33 = vadd.f32 %v6312_v26, %v6036_v27  ;;  %v4076_v19 = vpop.f32.mrb[1].mxu1  ;;  %v4273_v62 = vmul.f32 %v8700_v60, %v8700_v60  ;;  %v5473_v26 = vld [vmem:[%s9119_s4 + $0x580] sm:$0xff] }
 0x2c9   : > { %v6643_v37 = vadd.f32 %v4076_v19, %v8650_v3  ;;  %v4284_v21 = vsel %vm919_vm1, %v4274_v2, 0.0  ;;  %v5476_v19 = vld [vmem:[%s9119_s4 + $0x598] sm:$0xff]  ;;  %v4541_v2 = vld [vmem:[%s9121_s6 + $0x28] sm:$0xff] }
 0x2ca   : > { %v8705_v8 = vadd.f32 %v6642_v33, %v4140_v54  ;;  %v4281_v35 = vsel %vm919_vm1, %v4273_v62, 0.0  ;;  %v5475_v33 = vld [vmem:[%s9119_s4 + $0x590] sm:$0xff]  ;;  %v5474_v62 = vld [vmem:[%s9119_s4 + $0x588] sm:$0xff] }
 0x2cb   : > { %v8710_v30 = vadd.f32 %v6643_v37, %v4139_v36  ;;  %v6315_v59 = vpop.f32.mrb[2].mxu1  ;;  %4282 = vadd.xlane.f32.xlu0 %v4281_v35  ;;  %v4537_v54 = vld [vmem:[%s9121_s6 + $0x8] sm:$0xff]  ;;  %v4536_v37 = vld [vmem:[%s9121_s6] sm:$0xff]  ;;  %v4539_v36 = vld [vmem:[%s9121_s6 + $0x18] sm:$0xff] }
 0x2cc   : > { %v6644_v27 = vadd.f32 %v6315_v59, %v8652_v48  ;;  %v4086_v1 = vpop.f32.mrb[3].mxu1  ;;  %v4328_v51 = vmul.f32 %v8705_v8, %v8705_v8  ;;  %v4538_v35 = vld [vmem:[%s9121_s6 + $0x10] sm:$0xff]  ;;  %v4540_v59 = vld [vmem:[%s9121_s6 + $0x20] sm:$0xff] }
 0x2cd   : > { %v6645_v5 = vadd.f32 %v4086_v1, %v8654_v34  ;;  %v4327_v3 = vmul.f32 %v8710_v30, %v8710_v30  ;;  %v4542_v1 = vld [vmem:[%s9121_s6 + $0x30] sm:$0xff] }
 0x2ce   : > { %v8716_v7 = vadd.f32 %v6644_v27, %v4142_v10  ;;  %v4334_v12 = vsel %vm919_vm1, %v4328_v51, 0.0  ;;  %v4543_v27 = vld [vmem:[%s9121_s6 + $0x38] sm:$0xff] }
 0x2cf   : > { %v8724_v23 = vadd.f32 %v6645_v5, %v4141_v28  ;;  %4285 = vadd.xlane.f32.xlu0 %v4284_v21  ;;  %v4331_v48 = vsel %vm919_vm1, %v4327_v3, 0.0 }
 0x2d0   : > { %4332 = vadd.xlane.f32.xlu1 %v4331_v48  ;;  %v4330_v45 = vmul.f32 %v8716_v7, %v8716_v7 }
 0x2d1   : > { %v4329_v34 = vmul.f32 %v8724_v23, %v8724_v23 }
 0x2d2   : > { %v4340_v22 = vsel %vm919_vm1, %v4330_v45, 0.0 }
 0x2d3   : > { %4335 = vadd.xlane.f32.xlu0 %v4334_v12  ;;  %v4337_v47 = vsel %vm919_vm1, %v4329_v34, 0.0 }
 0x2d4   : > { %4338 = vadd.xlane.f32.xlu1 %v4337_v47 }
 0x2d7   : > { %4341 = vadd.xlane.f32.xlu0 %v4340_v22 }
 0x2d8   : > { %4164 = vadd.xlane.f32.xlu1 %v4163_v20 }
 0x2db   : > { %4167 = vadd.xlane.f32.xlu0 %v4166_v61 }
 0x2dc   : > { %4170 = vadd.xlane.f32.xlu1 %v4169_v16 }
 0x2df   : > { %4173 = vadd.xlane.f32.xlu0 %v4172_v42 }
 0x2e0   : > { %4220 = vadd.xlane.f32.xlu1 %v4219_v24 }
 0x2e3   : > { %4223 = vadd.xlane.f32.xlu0 %v4222_v49 }
 0x2e4   : > { %4226 = vadd.xlane.f32.xlu1 %v4225_v9 }
 0x2e7   : > { %4229 = vadd.xlane.f32.xlu0 %v4228_v25 }
 0x2f5   : > { %3843 = vperm.xlu1 %6833, %v5473_v26  }
 0x2f9   : > { %3853 = vperm.xlu1 %6833, %v5475_v33  }
 0x2fd   : > { %3858 = vperm.xlu1 %6833, %v5476_v19   ;;  %3848 = vperm.xlu0 %6832, %v5474_v62  }
 0x301   : > { %4551 = vperm.xlu1 %6833, %v4537_v54   ;;  %4546 = vperm.xlu0 %6832, %v4536_v37  }
 0x305   : > { %4561 = vperm.xlu1 %6833, %v4539_v36   ;;  %4556 = vperm.xlu0 %6832, %v4538_v35  }
 0x309   : > { %4571 = vperm.xlu1 %6833, %v4541_v2   ;;  %4566 = vperm.xlu0 %6832, %v4540_v59  }
 0x30d   : > { %4581 = vperm.xlu1 %6833, %v4543_v27   ;;  %4576 = vperm.xlu0 %6832, %v4542_v1  }
 0x34f   : > { %v4280_v10 = vpop.xlane.xlu1 %4279 }
 0x350   : > { %6834 = vrsqrt.f32 %v4280_v10  ;;  %v4277_v5 = vpop.xlane.xlu0 %4276  ;;  %vm4296_vm2 = vcmp.eq.f32.partialorder %v4280_v10, inf  ;;  %vm4298_vm3 = vcmp.eq.f32.partialorder %v4280_v10, 0.0  ;;  %v4299_v48 = vand.u32 2147483648, %v4280_v10 }
 0x351   : > { %6836 = vrsqrt.f32 %v4277_v5  ;;  %vm4289_vm4 = vcmp.eq.f32.partialorder %v4277_v5, inf  ;;  %v4292_v47 = vand.u32 2147483648, %v4277_v5  ;;  %vm4291_vm5 = vcmp.eq.f32.partialorder %v4277_v5, 0.0 }
 0x358   : > { %v4283_v3 = vpop.xlane.xlu0 %4282 }
 0x359   : > { %6838 = vrsqrt.f32 %v4283_v3  ;;  %vm4303_vm6 = vcmp.eq.f32.partialorder %v4283_v3, inf  ;;  %v4306_v24 = vand.u32 2147483648, %v4283_v3  ;;  %vm4305_vm7 = vcmp.eq.f32.partialorder %v4283_v3, 0.0 }
 0x35a   : > { %v6835_v28 = vpop.eup %6834 }
 0x35b   : > { %v6837_v21 = vpop.eup %6836  ;;  %v4295_v51 = vmul.f32 %v6835_v28, %v4280_v10 }
 0x35c   : > { %v4288_v34 = vmul.f32 %v6837_v21, %v4277_v5  ;;  %v4286_v12 = vpop.xlane.xlu0 %4285 }
 0x35d   : > { %v4297_v45 = vsel %vm4296_vm2, %v4280_v10, %v4295_v51  ;;  %6840 = vrsqrt.f32 %v4286_v12  ;;  %v4333_v55 = vpop.xlane.xlu1 %4332  ;;  %vm4310_vm8 = vcmp.eq.f32.partialorder %v4286_v12, inf  ;;  %vm4312_vm9 = vcmp.eq.f32.partialorder %v4286_v12, 0.0 }
 0x35e   : > { %v4300_v22 = vsel %vm4298_vm3, %v4299_v48, %v4297_v45  ;;  %v4290_v44 = vsel %vm4289_vm4, %v4277_v5, %v4288_v34  ;;  %6842 = vrsqrt.f32 %v4333_v55  ;;  %v4313_v33 = vand.u32 2147483648, %v4286_v12 }
 0x35f   : > { %v4316_v20 = vmax.f32 %v4300_v22, 1e-12  ;;  %v4293_v14 = vsel %vm4291_vm5, %v4292_v47, %v4290_v44  ;;  %vm4345_vm10 = vcmp.eq.f32.partialorder %v4333_v55, inf  ;;  %vm4347_vm11 = vcmp.eq.f32.partialorder %v4333_v55, 0.0  ;;  %vm8884_vm5 = vmpackc.low %vm919_vm1, %vm919_vm1 }
 0x360   : > { %v4315_v61 = vmax.f32 %v4293_v14, 1e-12  ;;  %v8815_v17 = vpop.xlane.xlu0 %4335  ;;  %v4348_v35 = vand.u32 2147483648, %v4333_v55 }
 0x361   : > { %6844 = vrcp.f32 %v4316_v20  ;;  %v8817_v16 = vpop.xlane.xlu1 %4338  ;;  %vm4352_vm12 = vcmp.eq.f32.partialorder %v8815_v17, inf  ;;  %vm4354_vm13 = vcmp.eq.f32.partialorder %v8815_v17, 0.0  ;;  %v4355_v1 = vand.u32 2147483648, %v8815_v17 }
 0x362   : > { %6846 = vrcp.f32 %v4315_v61  ;;  %vm4359_vm14 = vcmp.eq.f32.partialorder %v8817_v16, inf  ;;  %vm4361_vm15 = vcmp.eq.f32.partialorder %v8817_v16, 0.0  ;;  %v4362_v48 = vand.u32 2147483648, %v8817_v16 }
 0x363   : > { %v6839_v50 = vpop.eup %6838  ;;  %6848 = vrsqrt.f32 %v8815_v17 }
 0x364   : > { %v4302_v42 = vmul.f32 %v6839_v50, %v4283_v3  ;;  %6850 = vrsqrt.f32 %v8817_v16  ;;  %v8821_v32 = vpop.xlane.xlu0 %4341 }
 0x365   : > { %6852 = vrsqrt.f32 %v8821_v32  ;;  %v8824_v53 = vpop.xlane.xlu1 %4164  ;;  %vm4366_vm0 = vcmp.eq.f32.partialorder %v8821_v32, inf  ;;  %vm4368_vm2 = vcmp.eq.f32.partialorder %v8821_v32, 0.0  ;;  %v4369_v47 = vand.u32 2147483648, %v8821_v32 }
 0x366   : > { %v4304_v49 = vsel %vm4303_vm6, %v4283_v3, %v4302_v42  ;;  %6854 = vrsqrt.f32 %v8824_v53  ;;  %vm4177_vm3 = vcmp.eq.f32.partialorder %v8824_v53, inf  ;;  %vm4179_vm4 = vcmp.eq.f32.partialorder %v8824_v53, 0.0 }
 0x367   : > { %v6841_v11 = vpop.eup %6840  ;;  %v4307_v9 = vsel %vm4305_vm7, %v4306_v24, %v4304_v49  ;;  %v4180_v61 = vand.u32 2147483648, %v8824_v53 }
 0x368   : > { %v6843_v25 = vpop.eup %6842  ;;  %v4309_v26 = vmul.f32 %v6841_v11, %v4286_v12  ;;  %v8827_v19 = vpop.xlane.xlu0 %4167  ;;  %v4317_v62 = vmax.f32 %v4307_v9, 1e-12 }
 0x369   : > { %v4344_v54 = vmul.f32 %v6843_v25, %v4333_v55  ;;  %v8829_v37 = vpop.xlane.xlu1 %4170  ;;  %6856 = vrsqrt.f32 %v8827_v19  ;;  %vm4184_vm6 = vcmp.eq.f32.partialorder %v8827_v19, inf }
 0x36a   : > { %v4311_v36 = vsel %vm4310_vm8, %v4286_v12, %v4309_v26  ;;  %6858 = vrcp.f32 %v4317_v62  ;;  %vm4191_vm7 = vcmp.eq.f32.partialorder %v8829_v37, inf  ;;  %vm4186_vm8 = vcmp.eq.f32.partialorder %v8827_v19, 0.0 }
 0x36b   : > { %v6845_v2 = vpop.eup %6844  ;;  %v4314_v59 = vsel %vm4312_vm9, %v4313_v33, %v4311_v36  ;;  %v4346_v27 = vsel %vm4345_vm10, %v4333_v55, %v4344_v54  ;;  %6860 = vrsqrt.f32 %v8829_v37  ;;  %vm4193_vm9 = vcmp.eq.f32.partialorder %v8829_v37, 0.0 }
 0x36c   : > { %v6847_v10 = vpop.eup %6846  ;;  %v4318_v5 = vmax.f32 %v4314_v59, 1e-12  ;;  %v4349_v3 = vsel %vm4347_vm11, %v4348_v35, %v4346_v27  ;;  %v8837_v28 = vpop.xlane.xlu0 %4173 }
 0x36d   : > { %v6849_v21 = vpop.eup %6848  ;;  %v4371_v51 = vmax.f32 %v4349_v3, 1e-12  ;;  %v8841_v34 = vpop.xlane.xlu1 %4220  ;;  %6862 = vrsqrt.f32 %v8837_v28  ;;  %v4323_v54 = vmul.f32 %v6847_v10, %v8686_v29  ;;  %vm4198_vm10 = vcmp.eq.f32.partialorder %v8837_v28, inf }
 0x36e   : > { %v6851_v12 = vpop.eup %6850  ;;  %v4351_v45 = vmul.f32 %v6849_v21, %v8815_v17  ;;  %6864 = vrcp.f32 %v4318_v5  ;;  %vm4233_vm11 = vcmp.eq.f32.partialorder %v8841_v34, inf }
 0x36f   : > { %v6853_v55 = vpop.eup %6852  ;;  %v4358_v22 = vmul.f32 %v6851_v12, %v8817_v16  ;;  %6866 = vrcp.f32 %v4371_v51 }
 0x370   : > { %v6855_v44 = vpop.eup %6854  ;;  %v4353_v20 = vsel %vm4352_vm12, %v8815_v17, %v4351_v45  ;;  %v4365_v14 = vmul.f32 %v6853_v55, %v8821_v32  ;;  %6868 = vrsqrt.f32 %v8841_v34  ;;  %v8868_v25 = vpop.xlane.xlu0 %4223  ;;  %v4324_v17 = vmul.f32 %v6845_v2, %v8684_v63 }
 0x371   : > { %v4356_v50 = vsel %vm4354_vm13, %v4355_v1, %v4353_v20  ;;  %v4360_v42 = vsel %vm4359_vm14, %v8817_v16, %v4358_v22  ;;  %v4176_v24 = vmul.f32 %v6855_v44, %v8824_v53  ;;  %v8862_v49 = vpop.xlane.xlu1 %4226  ;;  %vm4200_vm12 = vcmp.eq.f32.partialorder %v8837_v28, 0.0 }
 0x372   : > { %v4372_v11 = vmax.f32 %v4356_v50, 1e-12  ;;  %v4367_v9 = vsel %vm4366_vm0, %v8821_v32, %v4365_v14  ;;  %v4363_v26 = vsel %vm4361_vm15, %v4362_v48, %v4360_v42  ;;  %v6558_v29 = vpack.c.bf16 %v4324_v17, %v4323_v54 }
 0x373   : > { %v4370_v33 = vsel %vm4368_vm2, %v4369_v47, %v4367_v9  ;;  %v4178_v62 = vsel %vm4177_vm3, %v8824_v53, %v4176_v24  ;;  %v6857_v16 = vpop.eup %6856  ;;  %v4373_v2 = vmax.f32 %v4363_v26, 1e-12  ;;  %vm4235_vm13 = vcmp.eq.f32.partialorder %v8841_v34, 0.0 }
 0x374   : > { %6870 = vrcp.f32 %v4372_v11  ;;  %v4374_v36 = vmax.f32 %v4370_v33, 1e-12  ;;  %v4181_v35 = vsel %vm4179_vm4, %v4180_v61, %v4178_v62  ;;  %v6859_v27 = vpop.eup %6858  ;;  %v8889_v53 = vpop.xlane.xlu0 %4229  ;;  %6560 = vmatprep.subr.msk.bf16.mxu0 %vm8884_vm5, %v6558_v29  ;;  %v4183_v12 = vmul.f32 %v6857_v16, %v8827_v19 }
 0x375   : > { %v4203_v59 = vmax.f32 %v4181_v35, 1e-12  ;;  %6872 = vrsqrt.f32 %v8868_v25  ;;  %v3844_v63 = vpop.permute.xlu1 %3843  ;;  %v6861_v1 = vpop.eup %6860  ;;  %6563 = vmatpush3.bf16.xpose.msk.msra.mxu0 %vm8884_vm5, %v6558_v29  ;;  %v4325_v22 = vmul.f32 %v6859_v27, %v8700_v60  ;;  %v4187_v60 = vand.u32 2147483648, %v8827_v19 }
 0x376   : > { %6874 = vrcp.f32 %v4374_v36  ;;  %v3877_v51 = vmul.f32 %v3844_v63, %v7920_v43  ;;  %v4190_v47 = vmul.f32 %v6861_v1, %v8829_v37  ;;  %v4194_v33 = vand.u32 2147483648, %v8829_v37 }
 0x377   : > { %6876 = vrcp.f32 %v4203_v59  ;;  %v6863_v10 = vpop.eup %6862  ;;  %v4236_v27 = vand.u32 2147483648, %v8841_v34  ;;  %vm4240_vm14 = vcmp.eq.f32.partialorder %v8868_v25, inf  ;;  %vm4247_vm15 = vcmp.eq.f32.partialorder %v8862_v49, inf }
 0x378   : > { %6878 = vrsqrt.f32 %v8862_v49  ;;  %v6865_v3 = vpop.eup %6864  ;;  %6316 = vmatprep.mubr.msk.f32.mxu1 %vm919_vm1, %v3877_v51  ;;  %v4192_v9 = vsel %vm4191_vm7, %v8829_v37, %v4190_v47  ;;  %v4201_v37 = vand.u32 2147483648, %v8837_v28  ;;  %vm4242_vm0 = vcmp.eq.f32.partialorder %v8868_v25, 0.0 }
 0x379   : > { %v3854_v5 = vpop.permute.xlu1 %3853  ;;  %6880 = vrcp.f32 %v4373_v2  ;;  %v6867_v21 = vpop.eup %6866  ;;  %v4326_v44 = vmul.f32 %v6865_v3, %v8698_v52  ;;  %v4195_v36 = vsel %vm4193_vm9, %v4194_v33, %v4192_v9  ;;  %vm4249_vm2 = vcmp.eq.f32.partialorder %v8862_v49, 0.0 }
 0x37a   : > { %6882 = vrsqrt.f32 %v8889_v53  ;;  %v6869_v48 = vpop.eup %6868  ;;  %v3879_v14 = vmul.f32 %v3854_v5, %v7948_v40  ;;  %v4379_v42 = vmul.f32 %v6867_v21, %v8710_v30  ;;  %v4197_v40 = vmul.f32 %v6863_v10, %v8837_v28 }
 0x37b   : > { %v6564_v43 = vpack.c.bf16 %v4326_v44, %v4325_v22  ;;  %v4232_v17 = vmul.f32 %v6869_v48, %v8841_v34  ;;  %v4205_v29 = vmax.f32 %v4195_v36, 1e-12  ;;  %vm4254_vm3 = vcmp.eq.f32.partialorder %v8889_v53, inf }
 0x37c   : > { %v3849_v45 = vpop.permute.xlu0 %3848  ;;  %v4257_v47 = vand.u32 2147483648, %v8889_v53  ;;  %vm4256_vm4 = vcmp.eq.f32.partialorder %v8889_v53, 0.0 }
 0x37d   : > { %v3878_v55 = vmul.f32 %v7911_v38, %v3849_v45  ;;  %v3859_v61 = vpop.permute.xlu1 %3858  ;;  %v4185_v38 = vsel %vm4184_vm6, %v8827_v19, %v4183_v12  ;;  %6566 = vmatprep.subr.msk.bf16.mxu0 %vm8884_vm5, %v6564_v43  ;;  %v4199_v19 = vsel %vm4198_vm10, %v8837_v28, %v4197_v40  ;;  %v4234_v59 = vsel %vm4233_vm11, %v8841_v34, %v4232_v17 }
 0x37e   : > { %v6871_v20 = vpop.eup %6870  ;;  %v3880_v30 = vmul.f32 %v7939_v6, %v3859_v61  ;;  %6569 = vmatpush3.bf16.xpose.msk.msra.mxu0 %vm8884_vm5, %v6564_v43  ;;  %v4188_v54 = vsel %vm4186_vm8, %v4187_v60, %v4185_v38  ;;  %v4202_v1 = vsel %vm4200_vm12, %v4201_v37, %v4199_v19  ;;  %v4237_v5 = vsel %vm4235_vm13, %v4236_v27, %v4234_v59  ;;  %v4594_v59 = vld [vmem:[%s9122_s7 + $0x10] sm:$0xff] }
 0x37f   : > { %v6873_v50 = vpop.eup %6872  ;;  %6317 = vmatmul.mubr.msk.f32.gmra.mrb[4].mxu1 %vm919_vm1, %v3878_v55  ;;  %v4380_v24 = vmul.f32 %v6871_v20, %v8705_v8  ;;  %v4204_v2 = vmax.f32 %v4188_v54, 1e-12  ;;  %v4243_v28 = vand.u32 2147483648, %v8868_v25  ;;  %v4206_v51 = vmax.f32 %v4202_v1, 1e-12  ;;  %v4592_v54 = vld [vmem:[%s9122_s7] sm:$0xff] }
 0x380   : > { %v6875_v11 = vpop.eup %6874  ;;  %6319 = vmatprep.mubr.msk.f32.mxu1 %vm919_vm1, %v3879_v14  ;;  %v4239_v35 = vmul.f32 %v6873_v50, %v8868_v25  ;;  %v4259_v48 = vmax.f32 %v4237_v5, 1e-12 }
 0x381   : > { %v6877_v52 = vpop.eup %6876  ;;  %v6570_v8 = vpack.c.bf16 %v4380_v24, %v4379_v42  ;;  %v4382_v16 = vmul.f32 %v6875_v11, %v8716_v7  ;;  %6884 = vrcp.f32 %v4204_v2  ;;  %v4595_v2 = vld [vmem:[%s9122_s7 + $0x18] sm:$0xff] }
 0x382   : > { %v6879_v26 = vpop.eup %6878  ;;  %v4211_v62 = vmul.f32 %v6877_v52, %v8722_v0  ;;  %v4241_v3 = vsel %vm4240_vm14, %v8868_v25, %v4239_v35  ;;  %6886 = vrcp.f32 %v4205_v29 }
 0x383   : > { %6572 = vmatprep.subr.msk.bf16.mxu0 %vm8884_vm5, %v6570_v8  ;;  %6320 = vmatmul.mubr.msk.f32.gmra.mrb[6].mxu1 %vm919_vm1, %v3880_v30  ;;  %v6881_v6 = vpop.eup %6880  ;;  %v4246_v63 = vmul.f32 %v6879_v26, %v8862_v49  ;;  %v4244_v12 = vsel %vm4242_vm0, %v4243_v28, %v4241_v3  ;;  %6888 = vrcp.f32 %v4206_v51  ;;  %v4596_v28 = vld [vmem:[%s9122_s7 + $0x20] sm:$0xff] }
 0x384   : > { %6338 = vmatprep.mubr.msk.f32.mxu0 %vm919_vm1, %v4211_v62  ;;  %v6883_v0 = vpop.eup %6882  ;;  %v4381_v10 = vmul.f32 %v6881_v6, %v8724_v23  ;;  %v4250_v23 = vand.u32 2147483648, %v8862_v49  ;;  %v4260_v55 = vmax.f32 %v4244_v12, 1e-12  ;;  %6890 = vrcp.f32 %v4259_v48 }
 0x385   : > { %v4253_v7 = vmul.f32 %v6883_v0, %v8889_v53  ;;  %v4248_v21 = vsel %vm4247_vm15, %v8862_v49, %v4246_v63 }
 0x386   : > { %v6576_v34 = vpack.c.bf16 %v4382_v16, %v4381_v10  ;;  %6575 = vmatpush3.bf16.xpose.msk.msra.mxu0 %vm8884_vm5, %v6570_v8  ;;  %v4251_v25 = vsel %vm4249_vm2, %v4250_v23, %v4248_v21  ;;  %6892 = vrcp.f32 %v4260_v55  ;;  %v4597_v23 = vld [vmem:[%s9122_s7 + $0x28] sm:$0xff]  ;;  %v4598_v55 = vld [vmem:[%s9122_s7 + $0x30] sm:$0xff] }
 0x387   : > { %v4255_v45 = vsel %vm4254_vm3, %v8889_v53, %v4253_v7  ;;  %v4261_v49 = vmax.f32 %v4251_v25, 1e-12 }
 0x388   : > { %6578 = vmatprep.subr.msk.bf16.mxu0 %vm8884_vm5, %v6576_v34  ;;  %v4258_v22 = vsel %vm4256_vm4, %v4257_v47, %v4255_v45 }
 0x389   : > { %v4262_v44 = vmax.f32 %v4258_v22, 1e-12  ;;  %6894 = vrcp.f32 %v4261_v49 }
 0x38b   : > { %v6885_v20 = vpop.eup %6884  ;;  %6896 = vrcp.f32 %v4262_v44 }
 0x38c   : > { %v6887_v14 = vpop.eup %6886  ;;  %v4212_v61 = vmul.f32 %v6885_v20, %v8730_v46 }
 0x38d   : > { %v6889_v50 = vpop.eup %6888  ;;  %v4213_v43 = vmul.f32 %v6887_v14, %v8736_v39 }
 0x38e   : > { %6581 = vmatpush3.bf16.xpose.msk.msra.mxu0 %vm8884_vm5, %v6576_v34  ;;  %v6891_v42 = vpop.eup %6890  ;;  %v4214_v53 = vmul.f32 %v6889_v50, %v8742_v13 }
 0x38f   : > { %v4267_v32 = vmul.f32 %v6891_v42, %v8748_v41 }
 0x390   : > { %v6893_v24 = vpop.eup %6892 }
 0x391   : > { %v4268_v46 = vmul.f32 %v6893_v24, %v8754_v4 }
 0x393   : > { %v6895_v11 = vpop.eup %6894 }
 0x394   : > { %v4269_v39 = vmul.f32 %v6895_v11, %v8760_v18 }
 0x395   : > { %6339 = vmatmul.mubr.msk.f32.vlgmr.msra.gmra.mrb[40].mxu0 %vm919_vm1, %v4212_v61  ;;  %v6897_v38 = vpop.eup %6896  ;;  %v4599_v61 = vld [vmem:[%s9122_s7 + $0x38] sm:$0xff] }
 0x396   : > { %6341 = vmatprep.mubr.msk.f32.mxu0 %vm919_vm1, %v4213_v43  ;;  %v4270_v60 = vmul.f32 %v6897_v38, %v8766_v15  ;;  %v4552_v15 = vpop.permute.xlu1 %4551 }
 0x399   : > { %6342 = vmatmul.mubr.msk.f32.gmra.mrb[42].mxu0 %vm919_vm1, %v4214_v53 }
 0x39a   : > { %6344 = vmatprep.mubr.msk.f32.mxu0 %vm919_vm1, %v4267_v32  ;;  %v4562_v33 = vpop.permute.xlu1 %4561 }
 0x39d   : > { %6345 = vmatmul.mubr.msk.f32.gmra.mrb[44].mxu0 %vm919_vm1, %v4268_v46 }
 0x39e   : > { %6347 = vmatprep.mubr.msk.f32.mxu0 %vm919_vm1, %v4269_v39  ;;  %v4572_v1 = vpop.permute.xlu1 %4571 }
 0x3a1   : > { %6348 = vmatmul.mubr.msk.f32.gmra.mrb[46].mxu0 %vm919_vm1, %v4270_v60 }
 0x3a2   : > { %v4582_v45 = vpop.permute.xlu1 %4581 }
 0x452   : > { %v6318_v13 = vpop.f32.mrb[4].mxu1 }
 0x453   : > { %v6646_v41 = vadd.f32 %v6318_v13, %v8656_v58  ;;  %v4096_v40 = vpop.f32.mrb[5].mxu1  ;;  %v4547_v58 = vpop.permute.xlu0 %4546 }
 0x454   : > { %v6647_v52 = vadd.f32 %v4096_v40, %v8658_v56 }
 0x456   : > { %v6582_v9 = vpack.c.bf16 %v6646_v41, %v6647_v52  ;;  %v6321_v17 = vpop.f32.mrb[6].mxu1 }
 0x457   : > { %v6648_v4 = vadd.f32 %v6321_v17, %v8660_v57  ;;  %v4106_v30 = vpop.f32.mrb[7].mxu1  ;;  %v4557_v26 = vpop.permute.xlu0 %4556  ;;  %v4593_v57 = vld [vmem:[%s9122_s7 + $0x8] sm:$0xff] }
 0x458   : > { %v6649_v18 = vadd.f32 %v4106_v30, %v8662_v31  ;;  %6583 = vmatprep.subr.bf16.mxu0 %v6582_v9 }
 0x459   : > { %6585 = vmatpush3.bf16.msra.mxu0 %v6582_v9 }
 0x45a   : > { %v6586_v8 = vpack.c.bf16 %v6648_v4, %v6649_v18 }
 0x45b   : > { %v4567_v16 = vpop.permute.xlu0 %4566 }
 0x45c   : > { %6587 = vmatprep.subr.bf16.mxu0 %v6586_v8 }
 0x45d   : > { %6589 = vmatpush3.bf16.msra.mxu0 %v6586_v8 }
 0x45e   : > { %6591 = vmatprep.subr.bf16.mxu0 %v6582_v9 }
 0x45f   : > { %v4577_v48 = vpop.permute.xlu0 %4576 }
 0x461   : > { %6593 = vmatpush3.bf16.msra.mxu0 %v6582_v9 }
 0x462   : > { %6595 = vmatprep.subr.bf16.mxu0 %v6586_v8 }
 0x465   : > { %6597 = vmatpush3.bf16.msra.mxu0 %v6586_v8 }
 0x468   : > { %v6340_v56 = vpop.f32.mrb[40].mxu0 }
 0x469   : > { %v4585_v62 = vmul.f32 %v6340_v56, %v4552_v15  ;;  %v4497_v31 = vpop.f32.mrb[41].mxu0 }
 0x46a   : > { %v4584_v6 = vmul.f32 %v4547_v58, %v4497_v31 }
 0x46b   : > { %v4601_v36 = vadd.f32 %v4593_v57, %v4585_v62 }
 0x46c   : > { %v4600_v19 = vadd.f32 %v4592_v54, %v4584_v6  ;;  %v6343_v35 = vpop.f32.mrb[42].mxu0 }
 0x46d   : > { %v4587_v0 = vmul.f32 %v6343_v35, %v4562_v33  ;;  %v4507_v37 = vpop.f32.mrb[43].mxu0  ;;  %v4611_v63 = vsel %vm919_vm1, %v4601_v36, -inf }
 0x46e   : > { %v4586_v27 = vmul.f32 %v4557_v26, %v4507_v37  ;;  %4612 = vmax.xlane.f32.xlu1 %v4611_v63  ;;  %v4608_v29 = vsel %vm919_vm1, %v4600_v19, -inf }
 0x46f   : > { %4609 = vmax.xlane.f32.xlu0 %v4608_v29  ;;  %v4603_v3 = vadd.f32 %v4595_v2, %v4587_v0 }
 0x470   : > { %v4602_v10 = vadd.f32 %v4594_v59, %v4586_v27  ;;  %v6346_v5 = vpop.f32.mrb[44].mxu0 }
 0x471   : > { %v4517_v7 = vpop.f32.mrb[45].mxu0  ;;  %v4589_v21 = vmul.f32 %v6346_v5, %v4572_v1  ;;  %v4617_v49 = vsel %vm919_vm1, %v4603_v3, -inf }
 0x472   : > { %v4588_v34 = vmul.f32 %v4567_v16, %v4517_v7  ;;  %v4614_v51 = vsel %vm919_vm1, %v4602_v10, -inf }
 0x473   : > { %4615 = vmax.xlane.f32.xlu0 %v4614_v51  ;;  %v4605_v22 = vadd.f32 %v4597_v23, %v4589_v21 }
 0x474   : > { %v4604_v12 = vadd.f32 %v4596_v28, %v4588_v34  ;;  %v6349_v25 = vpop.f32.mrb[46].mxu0 }
 0x475   : > { %v4527_v47 = vpop.f32.mrb[47].mxu0  ;;  %v4591_v44 = vmul.f32 %v6349_v25, %v4582_v45  ;;  %v4623_v42 = vsel %vm919_vm1, %v4605_v22, -inf }
 0x476   : > { %v4590_v20 = vmul.f32 %v4577_v48, %v4527_v47  ;;  %v4620_v14 = vsel %vm919_vm1, %v4604_v12, -inf }
 0x477   : > { %4618 = vmax.xlane.f32.xlu0 %v4617_v49  ;;  %4621 = vmax.xlane.f32.xlu1 %v4620_v14  ;;  %v4607_v43 = vadd.f32 %v4599_v61, %v4591_v44 }
 0x478   : > { %v4606_v50 = vadd.f32 %v4598_v55, %v4590_v20 }
 0x479   : > { %v4629_v24 = vsel %vm919_vm1, %v4607_v43, -inf }
 0x47a   : > { %v4626_v53 = vsel %vm919_vm1, %v4606_v50, -inf }
 0x47b   : > { %4624 = vmax.xlane.f32.xlu0 %v4623_v42  ;;  %4627 = vmax.xlane.f32.xlu1 %v4626_v53 }
 0x47f   : > { %4630 = vmax.xlane.f32.xlu0 %v4629_v24 }
 0x4fb   : > { %v4613_v32 = vpop.xlane.xlu1 %4612 }
 0x4fc   : > { %v4633_v11 = vsub.f32 %v4601_v36, %v4613_v32  ;;  %v4610_v46 = vpop.xlane.xlu0 %4609  ;;  %v4825_v32 = vld [vmem:[%s9123_s8] sm:$0xff] }
 0x4fd   : > { %v4632_v38 = vsub.f32 %v4600_v19, %v4610_v46 }
 0x4fe   : > { %v4642_v39 = vmul.f32 1.442695, %v4633_v11  ;;  %v4829_v11 = vld [vmem:[%s9123_s8 + $0x20] sm:$0xff] }
 0x4ff   : > { %v4640_v60 = vmul.f32 1.442695, %v4632_v38  ;;  %6400 = vmatprep.mubr.msk.f32.mxu1 %vm919_vm1, %v4829_v11 }
 0x500   : > { %6898 = vpow2.f32 %v4642_v39  ;;  %v4616_v13 = vpop.xlane.xlu0 %4615 }
 0x501   : > { %6900 = vpow2.f32 %v4640_v60  ;;  %v4634_v41 = vsub.f32 %v4602_v10, %v4616_v13 }
 0x503   : > { %v4644_v40 = vmul.f32 1.442695, %v4634_v41 }
 0x504   : > { %v4622_v52 = vpop.xlane.xlu1 %4621  ;;  %v4619_v9 = vpop.xlane.xlu0 %4618 }
 0x505   : > { %6902 = vpow2.f32 %v4644_v40  ;;  %v4636_v17 = vsub.f32 %v4604_v12, %v4622_v52  ;;  %v4635_v4 = vsub.f32 %v4603_v3, %v4619_v9 }
 0x507   : > { %v4648_v30 = vmul.f32 1.442695, %v4636_v17  ;;  %v4646_v18 = vmul.f32 1.442695, %v4635_v4 }
 0x508   : > { %v4628_v8 = vpop.xlane.xlu1 %4627  ;;  %v4625_v58 = vpop.xlane.xlu0 %4624 }
 0x509   : > { %6904 = vpow2.f32 %v4648_v30  ;;  %v4638_v15 = vsub.f32 %v4606_v50, %v4628_v8  ;;  %v4637_v26 = vsub.f32 %v4605_v22, %v4625_v58  ;;  %v4830_v8 = vld [vmem:[%s9123_s8 + $0x28] sm:$0xff]  ;;  %v4827_v58 = vld [vmem:[%s9123_s8 + $0x10] sm:$0xff] }
 0x50a   : > { %v6899_v56 = vpop.eup %6898  ;;  %6906 = vpow2.f32 %v4646_v18  ;;  %v4826_v18 = vld [vmem:[%s9123_s8 + $0x8] sm:$0xff] }
 0x50b   : > { %v6901_v57 = vpop.eup %6900  ;;  %v4652_v33 = vmul.f32 1.442695, %v4638_v15  ;;  %v4650_v62 = vmul.f32 1.442695, %v4637_v26  ;;  %v4659_v31 = vsel %vm919_vm1, %v6899_v56, 0.0  ;;  %v4831_v15 = vld [vmem:[%s9123_s8 + $0x30] sm:$0xff] }
 0x50c   : > { %4660 = vadd.xlane.f32.xlu0 %v4659_v31  ;;  %v4631_v54 = vpop.xlane.xlu0 %4630  ;;  %v4656_v6 = vsel %vm919_vm1, %v6901_v57, 0.0  ;;  %v4828_v26 = vld [vmem:[%s9123_s8 + $0x18] sm:$0xff] }
 0x50d   : > { %6908 = vpow2.f32 %v4652_v33  ;;  %v4639_v36 = vsub.f32 %v4607_v43, %v4631_v54  ;;  %4657 = vadd.xlane.f32.xlu1 %v4656_v6 }
 0x50e   : > { %6910 = vpow2.f32 %v4650_v62 }
 0x50f   : > { %v6903_v19 = vpop.eup %6902  ;;  %v4654_v35 = vmul.f32 1.442695, %v4639_v36 }
 0x510   : > { %v4662_v0 = vsel %vm919_vm1, %v6903_v19, 0.0 }
 0x511   : > { %6912 = vpow2.f32 %v4654_v35  ;;  %4663 = vadd.xlane.f32.xlu1 %v4662_v0 }
 0x513   : > { %v6905_v37 = vpop.eup %6904 }
 0x514   : > { %v6907_v59 = vpop.eup %6906  ;;  %v4668_v63 = vsel %vm919_vm1, %v6905_v37, 0.0 }
 0x515   : > { %4669 = vadd.xlane.f32.xlu1 %v4668_v63  ;;  %v4665_v16 = vsel %vm919_vm1, %v6907_v59, 0.0 }
 0x516   : > { %4666 = vadd.xlane.f32.xlu0 %v4665_v16 }
 0x517   : > { %v6909_v2 = vpop.eup %6908 }
 0x518   : > { %v6911_v27 = vpop.eup %6910  ;;  %v4674_v29 = vsel %vm919_vm1, %v6909_v2, 0.0 }
 0x519   : > { %4675 = vadd.xlane.f32.xlu1 %v4674_v29  ;;  %v4671_v1 = vsel %vm919_vm1, %v6911_v27, 0.0 }
 0x51a   : > { %4672 = vadd.xlane.f32.xlu0 %v4671_v1 }
 0x51b   : > { %v6913_v10 = vpop.eup %6912 }
 0x51c   : > { %v4677_v5 = vsel %vm919_vm1, %v6913_v10, 0.0 }
 0x51e   : > { %4678 = vadd.xlane.f32.xlu0 %v4677_v5 }
 0x599   : > { %v4661_v3 = vpop.xlane.xlu0 %4660 }
 0x59a   : > { %6914 = vrcp.f32 %v4661_v3  ;;  %v4658_v7 = vpop.xlane.xlu1 %4657 }
 0x59b   : > { %6916 = vrcp.f32 %v4658_v7 }
 0x59e   : > { %v4664_v28 = vpop.xlane.xlu1 %4663 }
 0x59f   : > { %6918 = vrcp.f32 %v4664_v28 }
 0x5a2   : > { %v4670_v21 = vpop.xlane.xlu1 %4669 }
 0x5a3   : > { %6920 = vrcp.f32 %v4670_v21  ;;  %v4667_v34 = vpop.xlane.xlu0 %4666 }
 0x5a4   : > { %v6915_v51 = vpop.eup %6914  ;;  %6922 = vrcp.f32 %v4667_v34 }
 0x5a5   : > { %v6917_v23 = vpop.eup %6916  ;;  %v4689_v25 = vmul.f32 %v6915_v51, %v6899_v56  ;;  %v4832_v56 = vld [vmem:[%s9123_s8 + $0x38] sm:$0xff] }
 0x5a6   : > { %v4676_v48 = vpop.xlane.xlu1 %4675  ;;  %v4688_v12 = vmul.f32 %v6917_v23, %v6901_v57 }
 0x5a7   : > { %6924 = vrcp.f32 %v4676_v48  ;;  %v4673_v45 = vpop.xlane.xlu0 %4672 }
 0x5a8   : > { %6926 = vrcp.f32 %v4673_v45  ;;  %6366 = vmatprep.mubr.msk.f32.mxu0 %vm919_vm1, %v4688_v12 }
 0x5a9   : > { %v6919_v47 = vpop.eup %6918  ;;  %6367 = vmatmul.mubr.msk.f32.vlgmr.msra.gmra.mrb[48].mxu0 %vm919_vm1, %v4689_v25 }
 0x5aa   : > { %v4690_v55 = vmul.f32 %v6919_v47, %v6903_v19 }
 0x5ab   : > { %v4679_v49 = vpop.xlane.xlu0 %4678 }
 0x5ac   : > { %6928 = vrcp.f32 %v4679_v49  ;;  %6369 = vmatprep.mubr.msk.f32.mxu0 %vm919_vm1, %v4690_v55 }
 0x5ad   : > { %v6921_v22 = vpop.eup %6920 }
 0x5ae   : > { %v6923_v44 = vpop.eup %6922  ;;  %v4692_v20 = vmul.f32 %v6921_v22, %v6905_v37 }
 0x5af   : > { %v4691_v14 = vmul.f32 %v6923_v44, %v6907_v59 }
 0x5b1   : > { %v6925_v61 = vpop.eup %6924  ;;  %6370 = vmatmul.mubr.msk.f32.gmra.mrb[50].mxu0 %vm919_vm1, %v4691_v14 }
 0x5b2   : > { %v6927_v50 = vpop.eup %6926  ;;  %6372 = vmatprep.mubr.msk.f32.mxu0 %vm919_vm1, %v4692_v20  ;;  %v4694_v43 = vmul.f32 %v6925_v61, %v6909_v2 }
 0x5b3   : > { %v4693_v42 = vmul.f32 %v6927_v50, %v6911_v27 }
 0x5b5   : > { %6373 = vmatmul.mubr.msk.f32.gmra.mrb[52].mxu0 %vm919_vm1, %v4693_v42 }
 0x5b6   : > { %v6929_v53 = vpop.eup %6928  ;;  %6375 = vmatprep.mubr.msk.f32.mxu0 %vm919_vm1, %v4694_v43 }
 0x5b7   : > { %v4695_v24 = vmul.f32 %v6929_v53, %v6913_v10 }
 0x5b9   : > { %6376 = vmatmul.mubr.msk.f32.gmra.mrb[54].mxu0 %vm919_vm1, %v4695_v24 }
 0x5ba   : > { %6394 = vmatprep.mubr.msk.f32.mxu0 %vm919_vm1, %v4825_v32 }
 0x67c   : > { %v6368_v46 = vpop.f32.mrb[48].mxu0 }
 0x67d   : > { %v4786_v38 = vpop.f32.mrb[49].mxu0 }
 0x67e   : > { %v6598_v39 = vpack.c.bf16 %v6368_v46, %v4786_v38 }
 0x680   : > { %6599 = vmatprep.subr.bf16.mxu0 %v6598_v39  ;;  %6622 = vmatprep.subr.bf16.mxu1 %v6598_v39 }
 0x681   : > { %6601 = vmatpush3.bf16.msra.mxu0 %v6598_v39  ;;  %6626 = vmatpush3.bf16.msra.mxu1 %v6598_v39 }
 0x684   : > { %v6371_v60 = vpop.f32.mrb[50].mxu0 }
 0x685   : > { %v4796_v13 = vpop.f32.mrb[51].mxu0 }
 0x686   : > { %v6602_v41 = vpack.c.bf16 %v6371_v60, %v4796_v13 }
 0x688   : > { %v6374_v40 = vpop.f32.mrb[52].mxu0  ;;  %6603 = vmatprep.subr.bf16.mxu0 %v6602_v41  ;;  %6623 = vmatprep.subr.bf16.mxu1 %v6602_v41 }
 0x689   : > { %v4806_v52 = vpop.f32.mrb[53].mxu0  ;;  %6605 = vmatpush3.bf16.msra.mxu0 %v6602_v41  ;;  %6627 = vmatpush3.bf16.msra.mxu1 %v6602_v41 }
 0x68a   : > { %v6606_v9 = vpack.c.bf16 %v6374_v40, %v4806_v52 }
 0x68c   : > { %v6377_v17 = vpop.f32.mrb[54].mxu0  ;;  %6607 = vmatprep.subr.bf16.mxu0 %v6606_v9  ;;  %6624 = vmatprep.subr.bf16.mxu1 %v6606_v9 }
 0x68d   : > { %v4816_v4 = vpop.f32.mrb[55].mxu0  ;;  %6609 = vmatpush3.bf16.msra.mxu0 %v6606_v9  ;;  %6628 = vmatpush3.bf16.msra.mxu1 %v6606_v9 }
 0x68e   : > { %v6610_v30 = vpack.c.bf16 %v6377_v17, %v4816_v4 }
 0x690   : > { %6611 = vmatprep.subr.bf16.mxu0 %v6610_v30  ;;  %6625 = vmatprep.subr.bf16.mxu1 %v6610_v30 }
 0x691   : > { %6613 = vmatpush3.bf16.msra.mxu0 %v6610_v30  ;;  %6629 = vmatpush3.bf16.msra.mxu1 %v6610_v30 }
 0x694   : > { %6395 = vmatmul.mubr.msk.f32.vlgmr.msra.gmra.mrb[56].mxu0 %vm919_vm1, %v4826_v18  ;;  %6401 = vmatmul.mubr.msk.f32.vlgmr.msra.gmra.mrb[20].mxu1 %vm919_vm1, %v4830_v8 }
 0x695   : > { %6397 = vmatprep.mubr.msk.f32.mxu0 %vm919_vm1, %v4827_v58  ;;  %6403 = vmatprep.mubr.msk.f32.mxu1 %vm919_vm1, %v4831_v15 }
 0x698   : > { %6398 = vmatmul.mubr.msk.f32.gmra.mrb[58].mxu0 %vm919_vm1, %v4828_v26  ;;  %6404 = vmatmul.mubr.msk.f32.gmra.mrb[22].mxu1 %vm919_vm1, %v4832_v56 }
 0x767   : > { %v6396_v57 = vpop.f32.mrb[56].mxu0  ;;  %v6402_v33 = vpop.f32.mrb[20].mxu1 }
 0x768   : > { %4963 = vst.msk [vmem:[%s355_s28 + $0x8] sm:$0xff] %vm919_vm1, %v6396_v57  ;;  %4967 = vst.msk [vmem:[%s355_s28 + $0x28] sm:$0xff] %vm919_vm1, %v6402_v33  ;;  %v4923_v62 = vpop.f32.mrb[57].mxu0  ;;  %v4943_v31 = vpop.f32.mrb[21].mxu1 }
 0x769   : > { %4962 = vst.msk [vmem:[%s355_s28] sm:$0xff] %vm919_vm1, %v4923_v62  ;;  %4966 = vst.msk [vmem:[%s355_s28 + $0x20] sm:$0xff] %vm919_vm1, %v4943_v31 }
 0x76b   : > { %v6399_v54 = vpop.f32.mrb[58].mxu0  ;;  %v6405_v6 = vpop.f32.mrb[22].mxu1 }
 0x76c   : > { %4965 = vst.msk [vmem:[%s355_s28 + $0x18] sm:$0xff] %vm919_vm1, %v6399_v54  ;;  %4969 = vst.msk [vmem:[%s355_s28 + $0x38] sm:$0xff] %vm919_vm1, %v6405_v6  ;;  %v4933_v36 = vpop.f32.mrb[59].mxu0  ;;  %v4953_v19 = vpop.f32.mrb[23].mxu1 }
 0x76d   : > { %4964 = vst.msk [vmem:[%s355_s28 + $0x10] sm:$0xff] %vm919_vm1, %v4933_v36  ;;  %4968 = vst.msk [vmem:[%s355_s28 + $0x30] sm:$0xff] %vm919_vm1, %v4953_v19 }
 0x76e   : > { %6943 = shalt.err (!%p6940_p3)
}
 0x76f   : > { %s6944_s24 = scalar_lea.hbm %s9066_s14, 1024  ;;  %s6948_s28 = scalar_lea.hbm %s9124_s9, 2048 }
 0x770   : > { %p6945_p4 = scmp.ne.s32.totalorder %s9066_s14, %s6944_s24  ;;  %p6949_p9 = scmp.lt.u32.totalorder %s9066_s14, %s9124_s9 }
 0x771   : > { %p6950_p10 = scmp.lt.u32.totalorder %s6948_s28, %s6944_s24  ;;  %p6952_p12 = scmp.lt.u32.totalorder %s6944_s24, %s9066_s14 }
 0x772   : > { %p6946_p7 = pnand %p6945_p4, %p7086_p5 }
 0x773   : > { %p6951_p11 = por %p6950_p10, %p6949_p9 }
 0x774   : > { %p6947_p8 = pneg %p6946_p7 }
 0x775   : > { %p6953_p13 = por %p6952_p12, %p6951_p11 }
 0x777   : > { %p6954_p0 = pnand %p6953_p13, %p6947_p8 }
 0x779   : > { %6957 = shalt.err (!%p6954_p0)
}
 0x77a   : > { %s6996_s16 = smov 128   ;;  %s6997_s21 = smov 8  }
 0x77b   : > { %6790 = dma.vmem_to_hbm [thread:$0]  (%p7086_p5), %s9068_s17, 1024, %s9066_s14, %s9074_s13, %s6996_s16, %s6996_s16, %s6997_s21  }
 0x77c PF: > { %p6796_p1 = scmp.ge.s32.totalorder %s6992_s12, 2  ;;  %s4999_s22 = sand.u32 1, %s6980_s30  }
 0x77d   : > { %s5000_s23 = scalar_lea.sflag [#allocation3], %s4999_s22 }
 0x77e   : > { %p6793_p2 = pnand %p6796_p1, %p7090_p6 }
 0x780   : > { %6975 = dma.done.wait (!%p6793_p2), %s5000_s23, 1024  }
 0x781   : > { %6977 = vsyncadd (!%p6793_p2), %s5000_s23, 4294966272  ;;  %p19_p3 = scmp.ge.s32.totalorder %s7073_s15, 4   ;;  %s9173_s30 = smov %s6984_s10 }
 0x782   : > { %s9174_s10 = smov %s6988_s11  ;;  %s9175_s11 = smov %s7084_s18 }
 0x783   : > { %s9176_s12 = smov %s7073_s15  ;;  %21 = sbr.rel (!%p19_p3) target bundleno = 3 (0x3), region = 113 }
 0x78a   :  { %5005 = vsyncpa [#allocation3], 1 }
 0x78b   :  { %5007 = vsyncpa [#allocation3 + $0x1], 1 }

</bundles_post_ra>
